<compile_context>
chip_gen: v7x
topology: tpu7x:2x2x1
jax: 0.10.0
libtpu: 0.0.40
codegen_flags: <defaults>
</compile_context>

<pallas_src>
import functools

import jax
import jax.numpy as jnp
import numpy as np
from jax import lax
from jax.experimental import pallas as pl
from jax.experimental.pallas import tpu as pltpu

HIDDEN = 64
BN_EPS = 1e-5

# hyper-parameters from PitchCRnn.__init__
K1, S1 = 16, 10      # Conv1d(1, 16, kernel_size=16, stride=10)
PK1, PS1 = 8, 4      # MaxPool1d(8, 4)
K2, S2 = 8, 4        # Conv1d(16, 32, kernel_size=8, stride=4)
PK2, PS2 = 2, 2      # MaxPool1d(2, 2)
C1, C2 = 16, 32


def _shapes(L):
    L1 = (L - K1) // S1 + 1          # conv1 output length
    L1p = -(-L1 // 8) * 8            # padded to a sublane multiple
    SM = L1 - PK1 + 1                # stride-1 sliding-max length
    P1 = (L1 - PK1) // PS1 + 1       # pool1 output length
    L2 = (P1 - K2) // S2 + 1         # conv2 output length
    T = (L2 - PK2) // PS2 + 1        # pool2 output length == GRU steps
    return L1, L1p, SM, P1, L2, T


# ----------------------------------------------------------------------------
# Fused Pallas kernel
# ----------------------------------------------------------------------------
def _pitch_crnn_kernel(p1_ref, w1_ref, b1_ref, sel2_ref, w2_ref, b2_ref,
                       ev_ref, od_ref, wih_ref, whh_ref, bih_ref, bhh_ref,
                       wf1_ref, bf1_ref, wf2_ref, bf2_ref,
                       o_ref, gates_ref, *, B, L1p, SM, L2, T):
    f32 = jnp.float32
    H = HIDDEN

    # ---- layer1: conv-as-GEMM for all batches at once + folded BN + ReLU ----
    y1 = jnp.dot(p1_ref[...], w1_ref[...], preferred_element_type=f32) + b1_ref[...]
    y1 = jnp.maximum(y1, 0.0)                                   # (B*L1p, C1)

    # ---- pool1 (k=8, s=4) + layer-2 im2col ----
    sel2 = sel2_ref[...]
    patches2 = []
    for b in range(B):
        y1_b = y1[b * L1p:(b + 1) * L1p, :]
        # stride-1 sliding max of window PK1: pure VPU maximum tree
        sm = y1_b[0:SM, :]
        for j in range(1, PK1):
            sm = jnp.maximum(sm, y1_b[j:j + SM, :])             # (SM, C1)
        # stride-4 down-sample fused with layer-2 patch gather (one-hot GEMM)
        g = jnp.dot(sel2, sm, preferred_element_type=f32)       # (K2*L2, C1)
        patches2.append(jnp.concatenate(
            [g[k * L2:(k + 1) * L2, :] for k in range(K2)], axis=1))  # (L2, K2*C1)
    patches2 = jnp.concatenate(patches2, axis=0)                # (B*L2, K2*C1)

    # ---- layer2: conv-as-GEMM + folded BN + ReLU ----
    y2 = jnp.dot(patches2, w2_ref[...], preferred_element_type=f32) + b2_ref[...]
    y2 = jnp.maximum(y2, 0.0)                                   # (B*L2, C2)

    # ---- pool2 (k=2, s=2) via even/odd selectors, then hoisted GRU input
    #      projection (one lane-dense GEMM for every (b, t)) ----
    ev, od = ev_ref[...], od_ref[...]
    xseq = []
    for b in range(B):
        y2_b = y2[b * L2:(b + 1) * L2, :]
        xseq.append(jnp.maximum(
            jnp.dot(ev, y2_b, preferred_element_type=f32),
            jnp.dot(od, y2_b, preferred_element_type=f32)))     # (T, C2)
    xseq = jnp.concatenate(xseq, axis=0)                        # (B*T, C2) batch-major
    gates_ref[...] = (jnp.dot(xseq, wih_ref[...], preferred_element_type=f32)
                      + bih_ref[...])                           # (B*T, 3H)

    # ---- GRU recurrence: single h @ W_hh GEMM per step ----
    whh = whh_ref[...]
    bhh = bhh_ref[...]

    def step(t, h):
        gx = jnp.concatenate(
            [gates_ref[pl.ds(b * T + t, 1), :] for b in range(B)], axis=0)  # (B, 3H)
        gh = jnp.dot(h, whh, preferred_element_type=f32) + bhh              # (B, 3H)
        r = jax.nn.sigmoid(gx[:, 0:H] + gh[:, 0:H])
        z = jax.nn.sigmoid(gx[:, H:2 * H] + gh[:, H:2 * H])
        n = jnp.tanh(gx[:, 2 * H:3 * H] + r * gh[:, 2 * H:3 * H])
        return (1.0 - z) * n + z * h

    h0 = jnp.zeros((B, H), f32)          # self.hidden is None -> zero init state
    h = lax.fori_loop(0, T, step, h0, unroll=True)

    # ---- FC head on h_T (== output[:, -1, -1]) ----
    h1 = jnp.maximum(
        jnp.dot(h, wf1_ref[...], preferred_element_type=f32) + bf1_ref[...], 0.0)
    o_ref[...] = jnp.dot(h1, wf2_ref[...], preferred_element_type=f32) + bf2_ref[...]


# ----------------------------------------------------------------------------
# Wrapper
# ----------------------------------------------------------------------------
def _build_selectors(SM, L2, T):
    # sel2[k*L2 + t, 4*(4t + k)] = 1 :  gathers pooled1[4t+k] = sliding_max[4*(4t+k)]
    sel2 = np.zeros((K2 * L2, SM), np.float32)
    for k in range(K2):
        for t in range(L2):
            sel2[k * L2 + t, PS1 * (S2 * t + k)] = 1.0
    ev = np.zeros((T, L2), np.float32)
    od = np.zeros((T, L2), np.float32)
    for p in range(T):
        ev[p, PS2 * p] = 1.0
        od[p, PS2 * p + 1] = 1.0
    return jnp.asarray(sel2), jnp.asarray(ev), jnp.asarray(od)


@jax.jit
def pitch_crnn_forward(x, p):
    """x: (B, L) pitch contours -> (B,) predicted ratings."""
    B, L = x.shape
    L1, L1p, SM, P1, L2, T = _shapes(L)

    # layer-1 im2col (Cin=1) done once in XLA; tiny, padded to sublane multiple.
    cols = [x[:, j:j + S1 * (L1 - 1) + 1:S1] for j in range(K1)]   # each (B, L1)
    p1 = jnp.stack(cols, axis=2)                                   # (B, L1, K1)
    p1 = jnp.pad(p1, ((0, 0), (0, L1p - L1), (0, 0)))
    p1_2d = p1.reshape(B * L1p, K1)

    sel2, ev, od = _build_selectors(SM, L2, T)

    kern = functools.partial(_pitch_crnn_kernel, B=B, L1p=L1p, SM=SM, L2=L2, T=T)
    out = pl.pallas_call(
        kern,
        out_shape=jax.ShapeDtypeStruct((B, 1), jnp.float32),
        in_specs=[pl.BlockSpec(memory_space=pltpu.MemorySpace.VMEM)] * 16,
        out_specs=pl.BlockSpec(memory_space=pltpu.MemorySpace.VMEM),
        scratch_shapes=[pltpu.VMEM((B * T, 3 * HIDDEN), jnp.float32)],
    )(p1_2d, p['w1s'], p['b1'], sel2, p['w2s'], p['b2'], ev, od,
      p['wih'], p['whh'], p['bih'], p['bhh'],
      p['wfc1'], p['bfc1'], p['wfc2'], p['bfc2'])
    return out[:, 0]


# ----------------------------------------------------------------------------
# Deterministic parameter initialization (shapes from PitchCRnn.__init__)
# ----------------------------------------------------------------------------
def init_params(key):
    keys = jax.random.split(key, 20)
    rnd = lambda k, s, sc=0.1: sc * jax.random.normal(k, s, jnp.float32)
    p = {}

    def fold_conv_bn(w, b, gamma, beta, rmean, rvar, kk, cin, cout):
        scale = gamma / jnp.sqrt(rvar + BN_EPS)
        shift = (b - rmean) * scale + beta
        w_mat = jnp.transpose(w, (2, 1, 0)).reshape(kk * cin, cout)   # (k*cin, cout)
        return w_mat * scale[None, :], shift.reshape(1, cout)

    # layer1: Conv1d(1,16,16) + BN(16)
    w1 = rnd(keys[0], (C1, 1, K1)); b1 = rnd(keys[1], (C1,))
    g1 = 1.0 + rnd(keys[2], (C1,)); be1 = rnd(keys[3], (C1,))
    rm1 = rnd(keys[4], (C1,)); rv1 = 1.0 + jnp.abs(rnd(keys[5], (C1,)))
    p['w1s'], p['b1'] = fold_conv_bn(w1, b1, g1, be1, rm1, rv1, K1, 1, C1)

    # layer2: Conv1d(16,32,8) + BN(32)
    w2 = rnd(keys[6], (C2, C1, K2)); b2 = rnd(keys[7], (C2,))
    g2 = 1.0 + rnd(keys[8], (C2,)); be2 = rnd(keys[9], (C2,))
    rm2 = rnd(keys[10], (C2,)); rv2 = 1.0 + jnp.abs(rnd(keys[11], (C2,)))
    p['w2s'], p['b2'] = fold_conv_bn(w2, b2, g2, be2, rm2, rv2, K2, C1, C2)

    # GRU(32, 64): concatenated gate weights, columns = [r | z | n]
    H = HIDDEN
    w_ih = rnd(keys[12], (3 * H, C2)); w_hh = rnd(keys[13], (3 * H, H))
    b_ih = rnd(keys[14], (3 * H,)); b_hh = rnd(keys[15], (3 * H,))
    p['wih'], p['whh'] = w_ih.T, w_hh.T
    p['bih'], p['bhh'] = b_ih.reshape(1, 3 * H), b_hh.reshape(1, 3 * H)

    # fc: Linear(64,16); fc2: Linear(16,1)
    wf1 = rnd(keys[16], (16, H)); bf1 = rnd(keys[17], (16,))
    wf2 = rnd(keys[18], (1, 16)); bf2 = rnd(keys[19], (1,))
    p['wfc1'], p['bfc1'] = wf1.T, bf1.reshape(1, 16)
    p['wfc2'], p['bfc2'] = wf2.T, bf2.reshape(1, 1)
    return p


# ----------------------------------------------------------------------------
# Pure-JAX reference (mirrors the original torch composition) for validation
# ----------------------------------------------------------------------------
def _maxpool1d_ref(y, k, s):
    B, L, C = y.shape
    P = (L - k) // s + 1
    cols = jnp.stack([y[:, j:j + s * (P - 1) + 1:s, :] for j in range(k)], axis=2)
    return cols.max(axis=2)


def reference_forward(x, p):
    hp = lax.Precision.HIGHEST
    B, L = x.shape
    L1 = (L - K1) // S1 + 1
    cols = [x[:, j:j + S1 * (L1 - 1) + 1:S1] for j in range(K1)]
    p1 = jnp.stack(cols, axis=2)                                   # (B, L1, 16)
    y1 = jnp.maximum(jnp.einsum('blk,kc->blc', p1, p['w1s'], precision=hp)
                     + p['b1'], 0.0)
    y1 = _maxpool1d_ref(y1, PK1, PS1)

    P1 = y1.shape[1]
    L2 = (P1 - K2) // S2 + 1
    cols2 = [y1[:, j:j + S2 * (L2 - 1) + 1:S2, :] for j in range(K2)]
    p2 = jnp.stack(cols2, axis=2).reshape(B, L2, K2 * C1)
    y2 = jnp.maximum(jnp.einsum('blk,kc->blc', p2, p['w2s'], precision=hp)
                     + p['b2'], 0.0)
    y2 = _maxpool1d_ref(y2, PK2, PS2)                              # (B, T, 32)

    T = y2.shape[1]
    H = HIDDEN
    h = jnp.zeros((B, H), jnp.float32)
    for t in range(T):
        xt = y2[:, t, :]
        gx = jnp.dot(xt, p['wih'], precision=hp) + p['bih']
        gh = jnp.dot(h, p['whh'], precision=hp) + p['bhh']
        r = jax.nn.sigmoid(gx[:, 0:H] + gh[:, 0:H])
        z = jax.nn.sigmoid(gx[:, H:2 * H] + gh[:, H:2 * H])
        n = jnp.tanh(gx[:, 2 * H:] + r * gh[:, 2 * H:])
        h = (1.0 - z) * n + z * h
    h1 = jnp.maximum(jnp.dot(h, p['wfc1'], precision=hp) + p['bfc1'], 0.0)
    out = jnp.dot(h1, p['wfc2'], precision=hp) + p['bfc2']
    return out[:, 0]


# ----------------------------------------------------------------------------
if __name__ == "__main__":
    B, L = 2, 2000   # minimum expected sequence length per the module docstring
    key = jax.random.PRNGKey(0)
    k_params, k_x = jax.random.split(key)
    params = init_params(k_params)
    x = jax.random.normal(k_x, (B, L), jnp.float32)

    out = jax.block_until_ready(pitch_crnn_forward(x, params))
    assert out.shape == (B,), out.shape

    ref = jax.block_until_ready(reference_forward(x, params))
    np.testing.assert_allclose(np.asarray(out), np.asarray(ref), rtol=2e-2, atol=2e-2)
    print("KERNEL_OK")
</pallas_src>

<mosaic_0001>
module attributes {stable_mosaic.version = 11 : i64} {
  func.func @_pitch_crnn_kernel(%arg0: memref<400x16xf32, #tpu.memory_space<vmem>>, %arg1: memref<16x16xf32, #tpu.memory_space<vmem>>, %arg2: memref<1x16xf32, #tpu.memory_space<vmem>>, %arg3: memref<88x192xf32, #tpu.memory_space<vmem>>, %arg4: memref<128x32xf32, #tpu.memory_space<vmem>>, %arg5: memref<1x32xf32, #tpu.memory_space<vmem>>, %arg6: memref<5x11xf32, #tpu.memory_space<vmem>>, %arg7: memref<5x11xf32, #tpu.memory_space<vmem>>, %arg8: memref<32x192xf32, #tpu.memory_space<vmem>>, %arg9: memref<64x192xf32, #tpu.memory_space<vmem>>, %arg10: memref<1x192xf32, #tpu.memory_space<vmem>>, %arg11: memref<1x192xf32, #tpu.memory_space<vmem>>, %arg12: memref<64x16xf32, #tpu.memory_space<vmem>>, %arg13: memref<1x16xf32, #tpu.memory_space<vmem>>, %arg14: memref<16x1xf32, #tpu.memory_space<vmem>>, %arg15: memref<1x1xf32, #tpu.memory_space<vmem>>, %arg16: memref<2x1xf32, #tpu.memory_space<vmem>>, %arg17: memref<10x192xf32, #tpu.memory_space<vmem>>) attributes {dimension_semantics = [], scalar_prefetch = 0 : i64, scratch_operands = 1 : i64, tpu.core_type = #tpu.core_type<tc>} {
    %c0 = arith.constant 0 : index
    %c0_0 = arith.constant 0 : index
    %0 = vector.load %arg0[%c0, %c0_0] : memref<400x16xf32, #tpu.memory_space<vmem>>, vector<400x16xf32>
    %c0_1 = arith.constant 0 : index
    %c0_2 = arith.constant 0 : index
    %1 = vector.load %arg1[%c0_1, %c0_2] : memref<16x16xf32, #tpu.memory_space<vmem>>, vector<16x16xf32>
    %cst = arith.constant dense<0.000000e+00> : vector<400x16xf32>
    %2 = tpu.matmul %0, %1, %cst {dimension_numbers = #tpu.dot_dimension_numbers<[1], [0], [0], [1], [0, 0, 1, 1], [], []>} : vector<400x16xf32>, vector<16x16xf32>, vector<400x16xf32> -> vector<400x16xf32>
    %c0_3 = arith.constant 0 : index
    %c0_4 = arith.constant 0 : index
    %3 = vector.load %arg2[%c0_3, %c0_4] : memref<1x16xf32, #tpu.memory_space<vmem>>, vector<1x16xf32>
    %4 = vector.broadcast %3 : vector<1x16xf32> to vector<400x16xf32>
    %5 = arith.addf %2, %4 : vector<400x16xf32>
    %cst_5 = arith.constant 0.000000e+00 : f32
    %6 = vector.broadcast %cst_5 : f32 to vector<400x16xf32>
    %7 = arith.maximumf %5, %6 : vector<400x16xf32>
    %c0_6 = arith.constant 0 : index
    %c0_7 = arith.constant 0 : index
    %8 = vector.load %arg3[%c0_6, %c0_7] : memref<88x192xf32, #tpu.memory_space<vmem>>, vector<88x192xf32>
    %9 = vector.extract_strided_slice %7 {offsets = [0, 0], sizes = [200, 16], strides = [1, 1]} : vector<400x16xf32> to vector<200x16xf32>
    %10 = vector.extract_strided_slice %9 {offsets = [0, 0], sizes = [192, 16], strides = [1, 1]} : vector<200x16xf32> to vector<192x16xf32>
    %11 = vector.extract_strided_slice %9 {offsets = [1, 0], sizes = [192, 16], strides = [1, 1]} : vector<200x16xf32> to vector<192x16xf32>
    %12 = arith.maximumf %10, %11 : vector<192x16xf32>
    %13 = vector.extract_strided_slice %9 {offsets = [2, 0], sizes = [192, 16], strides = [1, 1]} : vector<200x16xf32> to vector<192x16xf32>
    %14 = arith.maximumf %12, %13 : vector<192x16xf32>
    %15 = vector.extract_strided_slice %9 {offsets = [3, 0], sizes = [192, 16], strides = [1, 1]} : vector<200x16xf32> to vector<192x16xf32>
    %16 = arith.maximumf %14, %15 : vector<192x16xf32>
    %17 = vector.extract_strided_slice %9 {offsets = [4, 0], sizes = [192, 16], strides = [1, 1]} : vector<200x16xf32> to vector<192x16xf32>
    %18 = arith.maximumf %16, %17 : vector<192x16xf32>
    %19 = vector.extract_strided_slice %9 {offsets = [5, 0], sizes = [192, 16], strides = [1, 1]} : vector<200x16xf32> to vector<192x16xf32>
    %20 = arith.maximumf %18, %19 : vector<192x16xf32>
    %21 = vector.extract_strided_slice %9 {offsets = [6, 0], sizes = [192, 16], strides = [1, 1]} : vector<200x16xf32> to vector<192x16xf32>
    %22 = arith.maximumf %20, %21 : vector<192x16xf32>
    %23 = vector.extract_strided_slice %9 {offsets = [7, 0], sizes = [192, 16], strides = [1, 1]} : vector<200x16xf32> to vector<192x16xf32>
    %24 = arith.maximumf %22, %23 : vector<192x16xf32>
    %cst_8 = arith.constant dense<0.000000e+00> : vector<88x16xf32>
    %25 = tpu.matmul %8, %24, %cst_8 {dimension_numbers = #tpu.dot_dimension_numbers<[1], [0], [0], [1], [0, 0, 1, 1], [], []>} : vector<88x192xf32>, vector<192x16xf32>, vector<88x16xf32> -> vector<88x16xf32>
    %26 = vector.extract_strided_slice %25 {offsets = [0, 0], sizes = [11, 16], strides = [1, 1]} : vector<88x16xf32> to vector<11x16xf32>
    %27 = vector.extract_strided_slice %25 {offsets = [11, 0], sizes = [11, 16], strides = [1, 1]} : vector<88x16xf32> to vector<11x16xf32>
    %28 = vector.extract_strided_slice %25 {offsets = [22, 0], sizes = [11, 16], strides = [1, 1]} : vector<88x16xf32> to vector<11x16xf32>
    %29 = vector.extract_strided_slice %25 {offsets = [33, 0], sizes = [11, 16], strides = [1, 1]} : vector<88x16xf32> to vector<11x16xf32>
    %30 = vector.extract_strided_slice %25 {offsets = [44, 0], sizes = [11, 16], strides = [1, 1]} : vector<88x16xf32> to vector<11x16xf32>
    %31 = vector.extract_strided_slice %25 {offsets = [55, 0], sizes = [11, 16], strides = [1, 1]} : vector<88x16xf32> to vector<11x16xf32>
    %32 = vector.extract_strided_slice %25 {offsets = [66, 0], sizes = [11, 16], strides = [1, 1]} : vector<88x16xf32> to vector<11x16xf32>
    %33 = vector.extract_strided_slice %25 {offsets = [77, 0], sizes = [11, 16], strides = [1, 1]} : vector<88x16xf32> to vector<11x16xf32>
    %34 = tpu.concatenate %26, %27, %28, %29, %30, %31, %32, %33 in 1 : vector<11x16xf32>, vector<11x16xf32>, vector<11x16xf32>, vector<11x16xf32>, vector<11x16xf32>, vector<11x16xf32>, vector<11x16xf32>, vector<11x16xf32> -> vector<11x128xf32>
    %35 = vector.extract_strided_slice %7 {offsets = [200, 0], sizes = [200, 16], strides = [1, 1]} : vector<400x16xf32> to vector<200x16xf32>
    %36 = vector.extract_strided_slice %35 {offsets = [0, 0], sizes = [192, 16], strides = [1, 1]} : vector<200x16xf32> to vector<192x16xf32>
    %37 = vector.extract_strided_slice %35 {offsets = [1, 0], sizes = [192, 16], strides = [1, 1]} : vector<200x16xf32> to vector<192x16xf32>
    %38 = arith.maximumf %36, %37 : vector<192x16xf32>
    %39 = vector.extract_strided_slice %35 {offsets = [2, 0], sizes = [192, 16], strides = [1, 1]} : vector<200x16xf32> to vector<192x16xf32>
    %40 = arith.maximumf %38, %39 : vector<192x16xf32>
    %41 = vector.extract_strided_slice %35 {offsets = [3, 0], sizes = [192, 16], strides = [1, 1]} : vector<200x16xf32> to vector<192x16xf32>
    %42 = arith.maximumf %40, %41 : vector<192x16xf32>
    %43 = vector.extract_strided_slice %35 {offsets = [4, 0], sizes = [192, 16], strides = [1, 1]} : vector<200x16xf32> to vector<192x16xf32>
    %44 = arith.maximumf %42, %43 : vector<192x16xf32>
    %45 = vector.extract_strided_slice %35 {offsets = [5, 0], sizes = [192, 16], strides = [1, 1]} : vector<200x16xf32> to vector<192x16xf32>
    %46 = arith.maximumf %44, %45 : vector<192x16xf32>
    %47 = vector.extract_strided_slice %35 {offsets = [6, 0], sizes = [192, 16], strides = [1, 1]} : vector<200x16xf32> to vector<192x16xf32>
    %48 = arith.maximumf %46, %47 : vector<192x16xf32>
    %49 = vector.extract_strided_slice %35 {offsets = [7, 0], sizes = [192, 16], strides = [1, 1]} : vector<200x16xf32> to vector<192x16xf32>
    %50 = arith.maximumf %48, %49 : vector<192x16xf32>
    %cst_9 = arith.constant dense<0.000000e+00> : vector<88x16xf32>
    %51 = tpu.matmul %8, %50, %cst_9 {dimension_numbers = #tpu.dot_dimension_numbers<[1], [0], [0], [1], [0, 0, 1, 1], [], []>} : vector<88x192xf32>, vector<192x16xf32>, vector<88x16xf32> -> vector<88x16xf32>
    %52 = vector.extract_strided_slice %51 {offsets = [0, 0], sizes = [11, 16], strides = [1, 1]} : vector<88x16xf32> to vector<11x16xf32>
    %53 = vector.extract_strided_slice %51 {offsets = [11, 0], sizes = [11, 16], strides = [1, 1]} : vector<88x16xf32> to vector<11x16xf32>
    %54 = vector.extract_strided_slice %51 {offsets = [22, 0], sizes = [11, 16], strides = [1, 1]} : vector<88x16xf32> to vector<11x16xf32>
    %55 = vector.extract_strided_slice %51 {offsets = [33, 0], sizes = [11, 16], strides = [1, 1]} : vector<88x16xf32> to vector<11x16xf32>
    %56 = vector.extract_strided_slice %51 {offsets = [44, 0], sizes = [11, 16], strides = [1, 1]} : vector<88x16xf32> to vector<11x16xf32>
    %57 = vector.extract_strided_slice %51 {offsets = [55, 0], sizes = [11, 16], strides = [1, 1]} : vector<88x16xf32> to vector<11x16xf32>
    %58 = vector.extract_strided_slice %51 {offsets = [66, 0], sizes = [11, 16], strides = [1, 1]} : vector<88x16xf32> to vector<11x16xf32>
    %59 = vector.extract_strided_slice %51 {offsets = [77, 0], sizes = [11, 16], strides = [1, 1]} : vector<88x16xf32> to vector<11x16xf32>
    %60 = tpu.concatenate %52, %53, %54, %55, %56, %57, %58, %59 in 1 : vector<11x16xf32>, vector<11x16xf32>, vector<11x16xf32>, vector<11x16xf32>, vector<11x16xf32>, vector<11x16xf32>, vector<11x16xf32>, vector<11x16xf32> -> vector<11x128xf32>
    %61 = tpu.concatenate %34, %60 in 0 : vector<11x128xf32>, vector<11x128xf32> -> vector<22x128xf32>
    %c0_10 = arith.constant 0 : index
    %c0_11 = arith.constant 0 : index
    %62 = vector.load %arg4[%c0_10, %c0_11] : memref<128x32xf32, #tpu.memory_space<vmem>>, vector<128x32xf32>
    %cst_12 = arith.constant dense<0.000000e+00> : vector<22x32xf32>
    %63 = tpu.matmul %61, %62, %cst_12 {dimension_numbers = #tpu.dot_dimension_numbers<[1], [0], [0], [1], [0, 0, 1, 1], [], []>} : vector<22x128xf32>, vector<128x32xf32>, vector<22x32xf32> -> vector<22x32xf32>
    %c0_13 = arith.constant 0 : index
    %c0_14 = arith.constant 0 : index
    %64 = vector.load %arg5[%c0_13, %c0_14] : memref<1x32xf32, #tpu.memory_space<vmem>>, vector<1x32xf32>
    %65 = vector.broadcast %64 : vector<1x32xf32> to vector<22x32xf32>
    %66 = arith.addf %63, %65 : vector<22x32xf32>
    %cst_15 = arith.constant 0.000000e+00 : f32
    %67 = vector.broadcast %cst_15 : f32 to vector<22x32xf32>
    %68 = arith.maximumf %66, %67 : vector<22x32xf32>
    %c0_16 = arith.constant 0 : index
    %c0_17 = arith.constant 0 : index
    %69 = vector.load %arg6[%c0_16, %c0_17] : memref<5x11xf32, #tpu.memory_space<vmem>>, vector<5x11xf32>
    %c0_18 = arith.constant 0 : index
    %c0_19 = arith.constant 0 : index
    %70 = vector.load %arg7[%c0_18, %c0_19] : memref<5x11xf32, #tpu.memory_space<vmem>>, vector<5x11xf32>
    %71 = vector.extract_strided_slice %68 {offsets = [0, 0], sizes = [11, 32], strides = [1, 1]} : vector<22x32xf32> to vector<11x32xf32>
    %cst_20 = arith.constant dense<0.000000e+00> : vector<5x32xf32>
    %72 = tpu.matmul %69, %71, %cst_20 {dimension_numbers = #tpu.dot_dimension_numbers<[1], [0], [0], [1], [0, 0, 1, 1], [], []>} : vector<5x11xf32>, vector<11x32xf32>, vector<5x32xf32> -> vector<5x32xf32>
    %cst_21 = arith.constant dense<0.000000e+00> : vector<5x32xf32>
    %73 = tpu.matmul %70, %71, %cst_21 {dimension_numbers = #tpu.dot_dimension_numbers<[1], [0], [0], [1], [0, 0, 1, 1], [], []>} : vector<5x11xf32>, vector<11x32xf32>, vector<5x32xf32> -> vector<5x32xf32>
    %74 = arith.maximumf %72, %73 : vector<5x32xf32>
    %75 = vector.extract_strided_slice %68 {offsets = [11, 0], sizes = [11, 32], strides = [1, 1]} : vector<22x32xf32> to vector<11x32xf32>
    %cst_22 = arith.constant dense<0.000000e+00> : vector<5x32xf32>
    %76 = tpu.matmul %69, %75, %cst_22 {dimension_numbers = #tpu.dot_dimension_numbers<[1], [0], [0], [1], [0, 0, 1, 1], [], []>} : vector<5x11xf32>, vector<11x32xf32>, vector<5x32xf32> -> vector<5x32xf32>
    %cst_23 = arith.constant dense<0.000000e+00> : vector<5x32xf32>
    %77 = tpu.matmul %70, %75, %cst_23 {dimension_numbers = #tpu.dot_dimension_numbers<[1], [0], [0], [1], [0, 0, 1, 1], [], []>} : vector<5x11xf32>, vector<11x32xf32>, vector<5x32xf32> -> vector<5x32xf32>
    %78 = arith.maximumf %76, %77 : vector<5x32xf32>
    %79 = tpu.concatenate %74, %78 in 0 : vector<5x32xf32>, vector<5x32xf32> -> vector<10x32xf32>
    %c0_24 = arith.constant 0 : index
    %c0_25 = arith.constant 0 : index
    %80 = vector.load %arg8[%c0_24, %c0_25] : memref<32x192xf32, #tpu.memory_space<vmem>>, vector<32x192xf32>
    %cst_26 = arith.constant dense<0.000000e+00> : vector<10x192xf32>
    %81 = tpu.matmul %79, %80, %cst_26 {dimension_numbers = #tpu.dot_dimension_numbers<[1], [0], [0], [1], [0, 0, 1, 1], [], []>} : vector<10x32xf32>, vector<32x192xf32>, vector<10x192xf32> -> vector<10x192xf32>
    %c0_27 = arith.constant 0 : index
    %c0_28 = arith.constant 0 : index
    %82 = vector.load %arg10[%c0_27, %c0_28] : memref<1x192xf32, #tpu.memory_space<vmem>>, vector<1x192xf32>
    %83 = vector.broadcast %82 : vector<1x192xf32> to vector<10x192xf32>
    %84 = arith.addf %81, %83 : vector<10x192xf32>
    %c0_29 = arith.constant 0 : index
    %c0_30 = arith.constant 0 : index
    %85 = vector.load %arg17[%c0_29, %c0_30] : memref<10x192xf32, #tpu.memory_space<vmem>>, vector<10x192xf32>
    tpu.vector_store %arg17[%c0_29, %c0_30], %84 {strides = array<i32>} : memref<10x192xf32, #tpu.memory_space<vmem>>, vector<10x192xf32>,
    %c0_31 = arith.constant 0 : index
    %c0_32 = arith.constant 0 : index
    %86 = vector.load %arg9[%c0_31, %c0_32] : memref<64x192xf32, #tpu.memory_space<vmem>>, vector<64x192xf32>
    %c0_33 = arith.constant 0 : index
    %c0_34 = arith.constant 0 : index
    %87 = vector.load %arg11[%c0_33, %c0_34] : memref<1x192xf32, #tpu.memory_space<vmem>>, vector<1x192xf32>
    %cst_35 = arith.constant 0.000000e+00 : f32
    %88 = vector.broadcast %cst_35 : f32 to vector<2x64xf32>
    %c0_i32 = arith.constant 0 : i32
    %c0_i32_36 = arith.constant 0 : i32
    %89 = arith.addi %c0_i32_36, %c0_i32 : i32
    %90 = arith.index_cast %89 : i32 to index
    %c0_37 = arith.constant 0 : index
    %91 = vector.load %arg17[%90, %c0_37] : memref<10x192xf32, #tpu.memory_space<vmem>>, vector<1x192xf32>
    %c5_i32 = arith.constant 5 : i32
    %92 = arith.addi %c5_i32, %c0_i32 : i32
    %93 = arith.index_cast %92 : i32 to index
    %c0_38 = arith.constant 0 : index
    %94 = vector.load %arg17[%93, %c0_38] : memref<10x192xf32, #tpu.memory_space<vmem>>, vector<1x192xf32>
    %95 = tpu.concatenate %91, %94 in 0 : vector<1x192xf32>, vector<1x192xf32> -> vector<2x192xf32>
    %cst_39 = arith.constant dense<0.000000e+00> : vector<2x192xf32>
    %96 = tpu.matmul %88, %86, %cst_39 {dimension_numbers = #tpu.dot_dimension_numbers<[1], [0], [0], [1], [0, 0, 1, 1], [], []>} : vector<2x64xf32>, vector<64x192xf32>, vector<2x192xf32> -> vector<2x192xf32>
    %97 = vector.broadcast %87 : vector<1x192xf32> to vector<2x192xf32>
    %98 = arith.addf %96, %97 : vector<2x192xf32>
    %99 = vector.extract_strided_slice %95 {offsets = [0, 0], sizes = [2, 64], strides = [1, 1]} : vector<2x192xf32> to vector<2x64xf32>
    %100 = vector.extract_strided_slice %98 {offsets = [0, 0], sizes = [2, 64], strides = [1, 1]} : vector<2x192xf32> to vector<2x64xf32>
    %101 = arith.addf %99, %100 : vector<2x64xf32>
    %102 = arith.negf %101 : vector<2x64xf32>
    %103 = math.exp %102 : vector<2x64xf32>
    %cst_40 = arith.constant 1.000000e+00 : f32
    %104 = vector.broadcast %cst_40 : f32 to vector<2x64xf32>
    %105 = arith.addf %104, %103 : vector<2x64xf32>
    %106 = arith.divf %104, %105 : vector<2x64xf32>
    %107 = vector.extract_strided_slice %95 {offsets = [0, 64], sizes = [2, 64], strides = [1, 1]} : vector<2x192xf32> to vector<2x64xf32>
    %108 = vector.extract_strided_slice %98 {offsets = [0, 64], sizes = [2, 64], strides = [1, 1]} : vector<2x192xf32> to vector<2x64xf32>
    %109 = arith.addf %107, %108 : vector<2x64xf32>
    %110 = arith.negf %109 : vector<2x64xf32>
    %111 = math.exp %110 : vector<2x64xf32>
    %cst_41 = arith.constant 1.000000e+00 : f32
    %112 = vector.broadcast %cst_41 : f32 to vector<2x64xf32>
    %113 = arith.addf %112, %111 : vector<2x64xf32>
    %114 = arith.divf %112, %113 : vector<2x64xf32>
    %115 = vector.extract_strided_slice %95 {offsets = [0, 128], sizes = [2, 64], strides = [1, 1]} : vector<2x192xf32> to vector<2x64xf32>
    %116 = vector.extract_strided_slice %98 {offsets = [0, 128], sizes = [2, 64], strides = [1, 1]} : vector<2x192xf32> to vector<2x64xf32>
    %117 = arith.mulf %106, %116 : vector<2x64xf32>
    %118 = arith.addf %115, %117 : vector<2x64xf32>
    %119 = math.tanh %118 : vector<2x64xf32>
    %cst_42 = arith.constant 1.000000e+00 : f32
    %120 = vector.broadcast %cst_42 : f32 to vector<2x64xf32>
    %121 = arith.subf %120, %114 : vector<2x64xf32>
    %122 = arith.mulf %121, %119 : vector<2x64xf32>
    %123 = arith.mulf %114, %88 : vector<2x64xf32>
    %124 = arith.addf %122, %123 : vector<2x64xf32>
    %c1_i32 = arith.constant 1 : i32
    %c0_i32_43 = arith.constant 0 : i32
    %125 = arith.addi %c0_i32_43, %c1_i32 : i32
    %126 = arith.index_cast %125 : i32 to index
    %c0_44 = arith.constant 0 : index
    %127 = vector.load %arg17[%126, %c0_44] : memref<10x192xf32, #tpu.memory_space<vmem>>, vector<1x192xf32>
    %c5_i32_45 = arith.constant 5 : i32
    %128 = arith.addi %c5_i32_45, %c1_i32 : i32
    %129 = arith.index_cast %128 : i32 to index
    %c0_46 = arith.constant 0 : index
    %130 = vector.load %arg17[%129, %c0_46] : memref<10x192xf32, #tpu.memory_space<vmem>>, vector<1x192xf32>
    %131 = tpu.concatenate %127, %130 in 0 : vector<1x192xf32>, vector<1x192xf32> -> vector<2x192xf32>
    %cst_47 = arith.constant dense<0.000000e+00> : vector<2x192xf32>
    %132 = tpu.matmul %124, %86, %cst_47 {dimension_numbers = #tpu.dot_dimension_numbers<[1], [0], [0], [1], [0, 0, 1, 1], [], []>} : vector<2x64xf32>, vector<64x192xf32>, vector<2x192xf32> -> vector<2x192xf32>
    %133 = vector.broadcast %87 : vector<1x192xf32> to vector<2x192xf32>
    %134 = arith.addf %132, %133 : vector<2x192xf32>
    %135 = vector.extract_strided_slice %131 {offsets = [0, 0], sizes = [2, 64], strides = [1, 1]} : vector<2x192xf32> to vector<2x64xf32>
    %136 = vector.extract_strided_slice %134 {offsets = [0, 0], sizes = [2, 64], strides = [1, 1]} : vector<2x192xf32> to vector<2x64xf32>
    %137 = arith.addf %135, %136 : vector<2x64xf32>
    %138 = arith.negf %137 : vector<2x64xf32>
    %139 = math.exp %138 : vector<2x64xf32>
    %cst_48 = arith.constant 1.000000e+00 : f32
    %140 = vector.broadcast %cst_48 : f32 to vector<2x64xf32>
    %141 = arith.addf %140, %139 : vector<2x64xf32>
    %142 = arith.divf %140, %141 : vector<2x64xf32>
    %143 = vector.extract_strided_slice %131 {offsets = [0, 64], sizes = [2, 64], strides = [1, 1]} : vector<2x192xf32> to vector<2x64xf32>
    %144 = vector.extract_strided_slice %134 {offsets = [0, 64], sizes = [2, 64], strides = [1, 1]} : vector<2x192xf32> to vector<2x64xf32>
    %145 = arith.addf %143, %144 : vector<2x64xf32>
    %146 = arith.negf %145 : vector<2x64xf32>
    %147 = math.exp %146 : vector<2x64xf32>
    %cst_49 = arith.constant 1.000000e+00 : f32
    %148 = vector.broadcast %cst_49 : f32 to vector<2x64xf32>
    %149 = arith.addf %148, %147 : vector<2x64xf32>
    %150 = arith.divf %148, %149 : vector<2x64xf32>
    %151 = vector.extract_strided_slice %131 {offsets = [0, 128], sizes = [2, 64], strides = [1, 1]} : vector<2x192xf32> to vector<2x64xf32>
    %152 = vector.extract_strided_slice %134 {offsets = [0, 128], sizes = [2, 64], strides = [1, 1]} : vector<2x192xf32> to vector<2x64xf32>
    %153 = arith.mulf %142, %152 : vector<2x64xf32>
    %154 = arith.addf %151, %153 : vector<2x64xf32>
    %155 = math.tanh %154 : vector<2x64xf32>
    %cst_50 = arith.constant 1.000000e+00 : f32
    %156 = vector.broadcast %cst_50 : f32 to vector<2x64xf32>
    %157 = arith.subf %156, %150 : vector<2x64xf32>
    %158 = arith.mulf %157, %155 : vector<2x64xf32>
    %159 = arith.mulf %150, %124 : vector<2x64xf32>
    %160 = arith.addf %158, %159 : vector<2x64xf32>
    %c2_i32 = arith.constant 2 : i32
    %c0_i32_51 = arith.constant 0 : i32
    %161 = arith.addi %c0_i32_51, %c2_i32 : i32
    %162 = arith.index_cast %161 : i32 to index
    %c0_52 = arith.constant 0 : index
    %163 = vector.load %arg17[%162, %c0_52] : memref<10x192xf32, #tpu.memory_space<vmem>>, vector<1x192xf32>
    %c5_i32_53 = arith.constant 5 : i32
    %164 = arith.addi %c5_i32_53, %c2_i32 : i32
    %165 = arith.index_cast %164 : i32 to index
    %c0_54 = arith.constant 0 : index
    %166 = vector.load %arg17[%165, %c0_54] : memref<10x192xf32, #tpu.memory_space<vmem>>, vector<1x192xf32>
    %167 = tpu.concatenate %163, %166 in 0 : vector<1x192xf32>, vector<1x192xf32> -> vector<2x192xf32>
    %cst_55 = arith.constant dense<0.000000e+00> : vector<2x192xf32>
    %168 = tpu.matmul %160, %86, %cst_55 {dimension_numbers = #tpu.dot_dimension_numbers<[1], [0], [0], [1], [0, 0, 1, 1], [], []>} : vector<2x64xf32>, vector<64x192xf32>, vector<2x192xf32> -> vector<2x192xf32>
    %169 = vector.broadcast %87 : vector<1x192xf32> to vector<2x192xf32>
    %170 = arith.addf %168, %169 : vector<2x192xf32>
    %171 = vector.extract_strided_slice %167 {offsets = [0, 0], sizes = [2, 64], strides = [1, 1]} : vector<2x192xf32> to vector<2x64xf32>
    %172 = vector.extract_strided_slice %170 {offsets = [0, 0], sizes = [2, 64], strides = [1, 1]} : vector<2x192xf32> to vector<2x64xf32>
    %173 = arith.addf %171, %172 : vector<2x64xf32>
    %174 = arith.negf %173 : vector<2x64xf32>
    %175 = math.exp %174 : vector<2x64xf32>
    %cst_56 = arith.constant 1.000000e+00 : f32
    %176 = vector.broadcast %cst_56 : f32 to vector<2x64xf32>
    %177 = arith.addf %176, %175 : vector<2x64xf32>
    %178 = arith.divf %176, %177 : vector<2x64xf32>
    %179 = vector.extract_strided_slice %167 {offsets = [0, 64], sizes = [2, 64], strides = [1, 1]} : vector<2x192xf32> to vector<2x64xf32>
    %180 = vector.extract_strided_slice %170 {offsets = [0, 64], sizes = [2, 64], strides = [1, 1]} : vector<2x192xf32> to vector<2x64xf32>
    %181 = arith.addf %179, %180 : vector<2x64xf32>
    %182 = arith.negf %181 : vector<2x64xf32>
    %183 = math.exp %182 : vector<2x64xf32>
    %cst_57 = arith.constant 1.000000e+00 : f32
    %184 = vector.broadcast %cst_57 : f32 to vector<2x64xf32>
    %185 = arith.addf %184, %183 : vector<2x64xf32>
    %186 = arith.divf %184, %185 : vector<2x64xf32>
    %187 = vector.extract_strided_slice %167 {offsets = [0, 128], sizes = [2, 64], strides = [1, 1]} : vector<2x192xf32> to vector<2x64xf32>
    %188 = vector.extract_strided_slice %170 {offsets = [0, 128], sizes = [2, 64], strides = [1, 1]} : vector<2x192xf32> to vector<2x64xf32>
    %189 = arith.mulf %178, %188 : vector<2x64xf32>
    %190 = arith.addf %187, %189 : vector<2x64xf32>
    %191 = math.tanh %190 : vector<2x64xf32>
    %cst_58 = arith.constant 1.000000e+00 : f32
    %192 = vector.broadcast %cst_58 : f32 to vector<2x64xf32>
    %193 = arith.subf %192, %186 : vector<2x64xf32>
    %194 = arith.mulf %193, %191 : vector<2x64xf32>
    %195 = arith.mulf %186, %160 : vector<2x64xf32>
    %196 = arith.addf %194, %195 : vector<2x64xf32>
    %c3_i32 = arith.constant 3 : i32
    %c0_i32_59 = arith.constant 0 : i32
    %197 = arith.addi %c0_i32_59, %c3_i32 : i32
    %198 = arith.index_cast %197 : i32 to index
    %c0_60 = arith.constant 0 : index
    %199 = vector.load %arg17[%198, %c0_60] : memref<10x192xf32, #tpu.memory_space<vmem>>, vector<1x192xf32>
    %c5_i32_61 = arith.constant 5 : i32
    %200 = arith.addi %c5_i32_61, %c3_i32 : i32
    %201 = arith.index_cast %200 : i32 to index
    %c0_62 = arith.constant 0 : index
    %202 = vector.load %arg17[%201, %c0_62] : memref<10x192xf32, #tpu.memory_space<vmem>>, vector<1x192xf32>
    %203 = tpu.concatenate %199, %202 in 0 : vector<1x192xf32>, vector<1x192xf32> -> vector<2x192xf32>
    %cst_63 = arith.constant dense<0.000000e+00> : vector<2x192xf32>
    %204 = tpu.matmul %196, %86, %cst_63 {dimension_numbers = #tpu.dot_dimension_numbers<[1], [0], [0], [1], [0, 0, 1, 1], [], []>} : vector<2x64xf32>, vector<64x192xf32>, vector<2x192xf32> -> vector<2x192xf32>
    %205 = vector.broadcast %87 : vector<1x192xf32> to vector<2x192xf32>
    %206 = arith.addf %204, %205 : vector<2x192xf32>
    %207 = vector.extract_strided_slice %203 {offsets = [0, 0], sizes = [2, 64], strides = [1, 1]} : vector<2x192xf32> to vector<2x64xf32>
    %208 = vector.extract_strided_slice %206 {offsets = [0, 0], sizes = [2, 64], strides = [1, 1]} : vector<2x192xf32> to vector<2x64xf32>
    %209 = arith.addf %207, %208 : vector<2x64xf32>
    %210 = arith.negf %209 : vector<2x64xf32>
    %211 = math.exp %210 : vector<2x64xf32>
    %cst_64 = arith.constant 1.000000e+00 : f32
    %212 = vector.broadcast %cst_64 : f32 to vector<2x64xf32>
    %213 = arith.addf %212, %211 : vector<2x64xf32>
    %214 = arith.divf %212, %213 : vector<2x64xf32>
    %215 = vector.extract_strided_slice %203 {offsets = [0, 64], sizes = [2, 64], strides = [1, 1]} : vector<2x192xf32> to vector<2x64xf32>
    %216 = vector.extract_strided_slice %206 {offsets = [0, 64], sizes = [2, 64], strides = [1, 1]} : vector<2x192xf32> to vector<2x64xf32>
    %217 = arith.addf %215, %216 : vector<2x64xf32>
    %218 = arith.negf %217 : vector<2x64xf32>
    %219 = math.exp %218 : vector<2x64xf32>
    %cst_65 = arith.constant 1.000000e+00 : f32
    %220 = vector.broadcast %cst_65 : f32 to vector<2x64xf32>
    %221 = arith.addf %220, %219 : vector<2x64xf32>
    %222 = arith.divf %220, %221 : vector<2x64xf32>
    %223 = vector.extract_strided_slice %203 {offsets = [0, 128], sizes = [2, 64], strides = [1, 1]} : vector<2x192xf32> to vector<2x64xf32>
    %224 = vector.extract_strided_slice %206 {offsets = [0, 128], sizes = [2, 64], strides = [1, 1]} : vector<2x192xf32> to vector<2x64xf32>
    %225 = arith.mulf %214, %224 : vector<2x64xf32>
    %226 = arith.addf %223, %225 : vector<2x64xf32>
    %227 = math.tanh %226 : vector<2x64xf32>
    %cst_66 = arith.constant 1.000000e+00 : f32
    %228 = vector.broadcast %cst_66 : f32 to vector<2x64xf32>
    %229 = arith.subf %228, %222 : vector<2x64xf32>
    %230 = arith.mulf %229, %227 : vector<2x64xf32>
    %231 = arith.mulf %222, %196 : vector<2x64xf32>
    %232 = arith.addf %230, %231 : vector<2x64xf32>
    %c4_i32 = arith.constant 4 : i32
    %c0_i32_67 = arith.constant 0 : i32
    %233 = arith.addi %c0_i32_67, %c4_i32 : i32
    %234 = arith.index_cast %233 : i32 to index
    %c0_68 = arith.constant 0 : index
    %235 = vector.load %arg17[%234, %c0_68] : memref<10x192xf32, #tpu.memory_space<vmem>>, vector<1x192xf32>
    %c5_i32_69 = arith.constant 5 : i32
    %236 = arith.addi %c5_i32_69, %c4_i32 : i32
    %237 = arith.index_cast %236 : i32 to index
    %c0_70 = arith.constant 0 : index
    %238 = vector.load %arg17[%237, %c0_70] : memref<10x192xf32, #tpu.memory_space<vmem>>, vector<1x192xf32>
    %239 = tpu.concatenate %235, %238 in 0 : vector<1x192xf32>, vector<1x192xf32> -> vector<2x192xf32>
    %cst_71 = arith.constant dense<0.000000e+00> : vector<2x192xf32>
    %240 = tpu.matmul %232, %86, %cst_71 {dimension_numbers = #tpu.dot_dimension_numbers<[1], [0], [0], [1], [0, 0, 1, 1], [], []>} : vector<2x64xf32>, vector<64x192xf32>, vector<2x192xf32> -> vector<2x192xf32>
    %241 = vector.broadcast %87 : vector<1x192xf32> to vector<2x192xf32>
    %242 = arith.addf %240, %241 : vector<2x192xf32>
    %243 = vector.extract_strided_slice %239 {offsets = [0, 0], sizes = [2, 64], strides = [1, 1]} : vector<2x192xf32> to vector<2x64xf32>
    %244 = vector.extract_strided_slice %242 {offsets = [0, 0], sizes = [2, 64], strides = [1, 1]} : vector<2x192xf32> to vector<2x64xf32>
    %245 = arith.addf %243, %244 : vector<2x64xf32>
    %246 = arith.negf %245 : vector<2x64xf32>
    %247 = math.exp %246 : vector<2x64xf32>
    %cst_72 = arith.constant 1.000000e+00 : f32
    %248 = vector.broadcast %cst_72 : f32 to vector<2x64xf32>
    %249 = arith.addf %248, %247 : vector<2x64xf32>
    %250 = arith.divf %248, %249 : vector<2x64xf32>
    %251 = vector.extract_strided_slice %239 {offsets = [0, 64], sizes = [2, 64], strides = [1, 1]} : vector<2x192xf32> to vector<2x64xf32>
    %252 = vector.extract_strided_slice %242 {offsets = [0, 64], sizes = [2, 64], strides = [1, 1]} : vector<2x192xf32> to vector<2x64xf32>
    %253 = arith.addf %251, %252 : vector<2x64xf32>
    %254 = arith.negf %253 : vector<2x64xf32>
    %255 = math.exp %254 : vector<2x64xf32>
    %cst_73 = arith.constant 1.000000e+00 : f32
    %256 = vector.broadcast %cst_73 : f32 to vector<2x64xf32>
    %257 = arith.addf %256, %255 : vector<2x64xf32>
    %258 = arith.divf %256, %257 : vector<2x64xf32>
    %259 = vector.extract_strided_slice %239 {offsets = [0, 128], sizes = [2, 64], strides = [1, 1]} : vector<2x192xf32> to vector<2x64xf32>
    %260 = vector.extract_strided_slice %242 {offsets = [0, 128], sizes = [2, 64], strides = [1, 1]} : vector<2x192xf32> to vector<2x64xf32>
    %261 = arith.mulf %250, %260 : vector<2x64xf32>
    %262 = arith.addf %259, %261 : vector<2x64xf32>
    %263 = math.tanh %262 : vector<2x64xf32>
    %cst_74 = arith.constant 1.000000e+00 : f32
    %264 = vector.broadcast %cst_74 : f32 to vector<2x64xf32>
    %265 = arith.subf %264, %258 : vector<2x64xf32>
    %266 = arith.mulf %265, %263 : vector<2x64xf32>
    %267 = arith.mulf %258, %232 : vector<2x64xf32>
    %268 = arith.addf %266, %267 : vector<2x64xf32>
    %c5_i32_75 = arith.constant 5 : i32
    %c0_76 = arith.constant 0 : index
    %c0_77 = arith.constant 0 : index
    %269 = vector.load %arg12[%c0_76, %c0_77] : memref<64x16xf32, #tpu.memory_space<vmem>>, vector<64x16xf32>
    %cst_78 = arith.constant dense<0.000000e+00> : vector<2x16xf32>
    %270 = tpu.matmul %268, %269, %cst_78 {dimension_numbers = #tpu.dot_dimension_numbers<[1], [0], [0], [1], [0, 0, 1, 1], [], []>} : vector<2x64xf32>, vector<64x16xf32>, vector<2x16xf32> -> vector<2x16xf32>
    %c0_79 = arith.constant 0 : index
    %c0_80 = arith.constant 0 : index
    %271 = vector.load %arg13[%c0_79, %c0_80] : memref<1x16xf32, #tpu.memory_space<vmem>>, vector<1x16xf32>
    %272 = vector.broadcast %271 : vector<1x16xf32> to vector<2x16xf32>
    %273 = arith.addf %270, %272 : vector<2x16xf32>
    %cst_81 = arith.constant 0.000000e+00 : f32
    %274 = vector.broadcast %cst_81 : f32 to vector<2x16xf32>
    %275 = arith.maximumf %273, %274 : vector<2x16xf32>
    %c0_82 = arith.constant 0 : index
    %c0_83 = arith.constant 0 : index
    %276 = vector.load %arg14[%c0_82, %c0_83] : memref<16x1xf32, #tpu.memory_space<vmem>>, vector<16x1xf32>
    %cst_84 = arith.constant dense<0.000000e+00> : vector<2x1xf32>
    %277 = tpu.matmul %275, %276, %cst_84 {dimension_numbers = #tpu.dot_dimension_numbers<[1], [0], [0], [1], [0, 0, 1, 1], [], []>} : vector<2x16xf32>, vector<16x1xf32>, vector<2x1xf32> -> vector<2x1xf32>
    %c0_85 = arith.constant 0 : index
    %c0_86 = arith.constant 0 : index
    %278 = vector.load %arg15[%c0_85, %c0_86] : memref<1x1xf32, #tpu.memory_space<vmem>>, vector<1x1xf32>
    %279 = vector.broadcast %278 : vector<1x1xf32> to vector<2x1xf32>
    %280 = arith.addf %277, %279 : vector<2x1xf32>
    %c0_87 = arith.constant 0 : index
    %c0_88 = arith.constant 0 : index
    %281 = vector.load %arg16[%c0_87, %c0_88] : memref<2x1xf32, #tpu.memory_space<vmem>>, vector<2x1xf32>
    tpu.vector_store %arg16[%c0_87, %c0_88], %280 {strides = array<i32>} : memref<2x1xf32, #tpu.memory_space<vmem>>, vector<2x1xf32>,
    return
  }
}

</mosaic_0001>

<bundles_post_ra>
// kernel: pitch_crnn_forward.1
= control target key start
LH: loop header
LB: loop body
LE: loop exit
PB: predicated region body
PF: predicated region fallthrough
CT: control target
= control target key end

     0   :  { %vm114_vm0 = vcmask 130048   ;;  %v6738_v53 = vmov 0.0|0.0   ;;  %vm677_vm1 = vcmask 1046528   ;;  %vm775_vm2 = vcmask 1045504   ;;  %s4564_s22 = smov 16   ;;  %s4566_s26 = smov 48   ;;  %s6720_s1 = inlined_call_operand.vmem [shape: f32[16,16], index: 1, kind: input, shape index: {}]   ;;  %s6721_s0 = inlined_call_operand.vmem [shape: f32[400,16], index: 0, kind: input, shape index: {}]   ;;  %s6722_s2 = inlined_call_operand.vmem [shape: f32[1,16], index: 2, kind: input, shape index: {}]   ;;  %s6723_s3 = inlined_call_operand.vmem [shape: f32[88,192], index: 3, kind: input, shape index: {}]   ;;  %s6724_s4 = inlined_call_operand.vmem [shape: f32[128,32], index: 4, kind: input, shape index: {}]   ;;  %s6725_s9 = inlined_call_operand.vmem [shape: f32[64,192], index: 9, kind: input, shape index: {}]   ;;  %s6726_s5 = inlined_call_operand.vmem [shape: f32[1,32], index: 5, kind: input, shape index: {}]   ;;  %s6727_s6 = inlined_call_operand.vmem [shape: f32[5,11], index: 6, kind: input, shape index: {}]   ;;  %s6728_s7 = inlined_call_operand.vmem [shape: f32[5,11], index: 7, kind: input, shape index: {}]   ;;  %s6729_s8 = inlined_call_operand.vmem [shape: f32[32,192], index: 8, kind: input, shape index: {}]   ;;  %s6730_s10 = inlined_call_operand.vmem [shape: f32[1,192], index: 10, kind: input, shape index: {}]   ;;  %s6731_s11 = inlined_call_operand.vmem [shape: f32[1,192], index: 11, kind: input, shape index: {}]   ;;  %s6732_s12 = inlined_call_operand.vmem [shape: f32[64,16], index: 12, kind: input, shape index: {}]   ;;  %s6733_s14 = inlined_call_operand.vmem [shape: f32[16,1], index: 14, kind: input, shape index: {}]   ;;  %s6734_s15 = inlined_call_operand.<no memory space> [shape: f32[1,1], index: 15, kind: input, shape index: {}]   ;;  %s6735_s13 = inlined_call_operand.vmem [shape: f32[1,16], index: 13, kind: input, shape index: {}]   ;;  %s6736_s16 = inlined_call_operand.vmem [shape: f32[2,1], index: 16, kind: output, shape index: {}]  }
   0x1   :  { %6740 = sst [smem:[#allocation4_spill]] %s6720_s1  ;;  %v55_v2 = vld [vmem:[%s6721_s0] sm:$0xff]  ;;  %v56_v4 = vld [vmem:[%s6721_s0 + $0x8] sm:$0xff]  ;;  %v57_v5 = vld [vmem:[%s6721_s0 + $0x10] sm:$0xff]  ;;  %4238 = vmatprep.subr.bf16.mxu1 %v6738_v53  ;;  %vm873_vm3 = vcmask 1044480   ;;  %vm971_vm4 = vcmask 1043456  }
   0x2   :  { %s6741_s23 = sld [smem:[#allocation4_spill]]  ;;  %4064 = vmatprep.mubr.msk.f32.mxu0 %vm114_vm0, %v55_v2  ;;  %v58_v6 = vld [vmem:[%s6721_s0 + $0x18] sm:$0xff]  ;;  %v59_v7 = vld [vmem:[%s6721_s0 + $0x20] sm:$0xff]  ;;  %v60_v8 = vld [vmem:[%s6721_s0 + $0x28] sm:$0xff]  ;;  %vm1069_vm5 = vcmask 1042432   ;;  %vm1167_vm6 = vcmask 1041408  }
   0x3   :  { %v61_v9 = vld [vmem:[%s6721_s0 + $0x30] sm:$0xff]  ;;  %v62_v10 = vld [vmem:[%s6721_s0 + $0x38] sm:$0xff]  ;;  %v63_v11 = vld [vmem:[%s6721_s0 + $0x40] sm:$0xff]  ;;  %vm1265_vm7 = vcmask 1040384   ;;  %vm1363_vm8 = vcmask 523264   ;;  %s4567_s27 = smov 64  }
   0x4   :  { %v64_v12 = vld [vmem:[%s6721_s0 + $0x48] sm:$0xff]  ;;  %v65_v13 = vld [vmem:[%s6721_s0 + $0x50] sm:$0xff]  ;;  %v66_v14 = vld [vmem:[%s6721_s0 + $0x58] sm:$0xff]  ;;  %vm4569_vm9 = vmmov 0   ;;  %s4572_s17 = smov 96   ;;  %vm1596_vm10 = vcmask 261120  }
   0x5   :  { %v67_v15 = vld [vmem:[%s6721_s0 + $0x60] sm:$0xff]  ;;  %v68_v16 = vld [vmem:[%s6721_s0 + $0x68] sm:$0xff]  ;;  %v69_v17 = vld [vmem:[%s6721_s0 + $0x70] sm:$0xff]  ;;  %vm1599_vm11 = vcmask 392192   ;;  %vm1604_vm12 = vcmask 654336   ;;  %vm1607_vm13 = vcmask 785408  }
   0x6   :  { %v70_v18 = vld [vmem:[%s6721_s0 + $0x78] sm:$0xff]  ;;  %v71_v19 = vld [vmem:[%s6721_s0 + $0x80] sm:$0xff]  ;;  %v72_v20 = vld [vmem:[%s6721_s0 + $0x88] sm:$0xff]  ;;  %vm1610_vm14 = vcmask 916480   ;;  %vm4573_vm15 = vmmov 1  }
   0x7   :  { %v73_v21 = vld [vmem:[%s6721_s0 + $0x90] sm:$0xff]  ;;  %v74_v22 = vld [vmem:[%s6721_s0 + $0x98] sm:$0xff]  ;;  %v75_v23 = vld [vmem:[%s6721_s0 + $0xa0] sm:$0xff] }
   0x8   :  { %v105_v0 = vld [vmem:[%s6741_s23] sm:$0xff]  ;;  %v106_v1 = vld [vmem:[%s6741_s23 + $0x8] sm:$0xff]  ;;  %v77_v25 = vld [vmem:[%s6721_s0 + $0xb0] sm:$0xff] }
   0x9   :  { %v4234_v3 = vpack.c.bf16 %v106_v1, %v105_v0  ;;  %v76_v24 = vld [vmem:[%s6721_s0 + $0xa8] sm:$0xff]  ;;  %v78_v26 = vld [vmem:[%s6721_s0 + $0xb8] sm:$0xff]  ;;  %v79_v27 = vld [vmem:[%s6721_s0 + $0xc0] sm:$0xff] }
   0xa   :  { %v80_v28 = vld [vmem:[%s6721_s0 + $0xc8] sm:$0xff]  ;;  %v81_v29 = vld [vmem:[%s6721_s0 + $0xd0] sm:$0xff]  ;;  %v82_v30 = vld [vmem:[%s6721_s0 + $0xd8] sm:$0xff] }
   0xb   :  { %4235 = vmatprep.subr.bf16.mxu0 %v4234_v3  ;;  %v83_v31 = vld [vmem:[%s6721_s0 + $0xe0] sm:$0xff]  ;;  %v84_v32 = vld [vmem:[%s6721_s0 + $0xe8] sm:$0xff]  ;;  %v85_v33 = vld [vmem:[%s6721_s0 + $0xf0] sm:$0xff] }
   0xc   :  { %4237 = vmatpush3.bf16.msra.mxu0 %v4234_v3  ;;  %v86_v34 = vld [vmem:[%s6721_s0 + $0xf8] sm:$0xff]  ;;  %v87_v35 = vld [vmem:[%s6721_s0 + $0x100] sm:$0xff]  ;;  %v88_v36 = vld [vmem:[%s6721_s0 + $0x108] sm:$0xff] }
   0xd   :  { %v89_v37 = vld [vmem:[%s6721_s0 + $0x110] sm:$0xff]  ;;  %v90_v38 = vld [vmem:[%s6721_s0 + $0x118] sm:$0xff]  ;;  %v91_v39 = vld [vmem:[%s6721_s0 + $0x120] sm:$0xff]  ;;  %4310 = vmatprep.subr.bf16.mxu0 %v6738_v53 }
   0xe   :  { %v92_v40 = vld [vmem:[%s6721_s0 + $0x128] sm:$0xff]  ;;  %v93_v41 = vld [vmem:[%s6721_s0 + $0x130] sm:$0xff]  ;;  %v94_v42 = vld [vmem:[%s6721_s0 + $0x138] sm:$0xff] }
   0xf   :  { %4065 = vmatmul.mubr.msk.f32.vlgmr.msra.gmra.mrb[0].mxu0 %vm114_vm0, %v56_v4  ;;  %v95_v43 = vld [vmem:[%s6721_s0 + $0x140] sm:$0xff]  ;;  %v96_v44 = vld [vmem:[%s6721_s0 + $0x148] sm:$0xff]  ;;  %v97_v45 = vld [vmem:[%s6721_s0 + $0x150] sm:$0xff] }
  0x10   :  { %4067 = vmatprep.mubr.msk.f32.mxu0 %vm114_vm0, %v57_v5  ;;  %v98_v46 = vld [vmem:[%s6721_s0 + $0x158] sm:$0xff]  ;;  %v99_v47 = vld [vmem:[%s6721_s0 + $0x160] sm:$0xff]  ;;  %v100_v48 = vld [vmem:[%s6721_s0 + $0x168] sm:$0xff] }
  0x11   :  { %v101_v49 = vld [vmem:[%s6721_s0 + $0x170] sm:$0xff]  ;;  %v102_v50 = vld [vmem:[%s6721_s0 + $0x178] sm:$0xff]  ;;  %v103_v51 = vld [vmem:[%s6721_s0 + $0x180] sm:$0xff] }
  0x12   :  { %v104_v52 = vld [vmem:[%s6721_s0 + $0x188] sm:$0xff]  ;;  %v4870_v54 = vld [vmem:[%s6722_s2] ss:$0 sm:$0xff]  ;;  %s4565_s0 = smov 32  }
  0x13   :  { %4068 = vmatmul.mubr.msk.f32.gmra.mrb[2].mxu0 %vm114_vm0, %v58_v6 }
  0x14   :  { %4070 = vmatprep.mubr.msk.f32.mxu0 %vm114_vm0, %v59_v7 }
  0x17   :  { %4071 = vmatmul.mubr.msk.f32.gmra.mrb[4].mxu0 %vm114_vm0, %v60_v8 }
  0x18   :  { %4073 = vmatprep.mubr.msk.f32.mxu0 %vm114_vm0, %v61_v9 }
  0x1b   :  { %4074 = vmatmul.mubr.msk.f32.gmra.mrb[6].mxu0 %vm114_vm0, %v62_v10 }
  0x1c   :  { %4076 = vmatprep.mubr.msk.f32.mxu0 %vm114_vm0, %v63_v11 }
  0x1f   :  { %4077 = vmatmul.mubr.msk.f32.gmra.mrb[8].mxu0 %vm114_vm0, %v64_v12 }
  0x20   :  { %4079 = vmatprep.mubr.msk.f32.mxu0 %vm114_vm0, %v65_v13 }
  0x23   :  { %4080 = vmatmul.mubr.msk.f32.gmra.mrb[10].mxu0 %vm114_vm0, %v66_v14 }
  0x24   :  { %4082 = vmatprep.mubr.msk.f32.mxu0 %vm114_vm0, %v67_v15 }
  0x27   :  { %4083 = vmatmul.mubr.msk.f32.gmra.mrb[12].mxu0 %vm114_vm0, %v68_v16 }
  0x28   :  { %4085 = vmatprep.mubr.msk.f32.mxu0 %vm114_vm0, %v69_v17 }
  0x2b   :  { %4086 = vmatmul.mubr.msk.f32.gmra.mrb[14].mxu0 %vm114_vm0, %v70_v18 }
  0x2c   :  { %4088 = vmatprep.mubr.msk.f32.mxu0 %vm114_vm0, %v71_v19 }
  0x2f   :  { %4089 = vmatmul.mubr.msk.f32.gmra.mrb[16].mxu0 %vm114_vm0, %v72_v20 }
  0x30   :  { %4091 = vmatprep.mubr.msk.f32.mxu0 %vm114_vm0, %v73_v21 }
  0x33   :  { %4092 = vmatmul.mubr.msk.f32.gmra.mrb[18].mxu0 %vm114_vm0, %v74_v22 }
  0x34   :  { %4094 = vmatprep.mubr.msk.f32.mxu0 %vm114_vm0, %v75_v23 }
  0x37   :  { %4095 = vmatmul.mubr.msk.f32.gmra.mrb[20].mxu0 %vm114_vm0, %v76_v24 }
  0x38   :  { %4097 = vmatprep.mubr.msk.f32.mxu0 %vm114_vm0, %v77_v25 }
  0x3b   :  { %4098 = vmatmul.mubr.msk.f32.gmra.mrb[22].mxu0 %vm114_vm0, %v78_v26 }
  0x3c   :  { %4100 = vmatprep.mubr.msk.f32.mxu0 %vm114_vm0, %v79_v27 }
  0x3f   :  { %4101 = vmatmul.mubr.msk.f32.gmra.mrb[24].mxu0 %vm114_vm0, %v80_v28 }
  0x40   :  { %4103 = vmatprep.mubr.msk.f32.mxu0 %vm114_vm0, %v81_v29 }
  0x43   :  { %4104 = vmatmul.mubr.msk.f32.gmra.mrb[26].mxu0 %vm114_vm0, %v82_v30 }
  0x44   :  { %4106 = vmatprep.mubr.msk.f32.mxu0 %vm114_vm0, %v83_v31 }
  0x47   :  { %4107 = vmatmul.mubr.msk.f32.gmra.mrb[28].mxu0 %vm114_vm0, %v84_v32 }
  0x48   :  { %4109 = vmatprep.mubr.msk.f32.mxu0 %vm114_vm0, %v85_v33 }
  0x4b   :  { %4110 = vmatmul.mubr.msk.f32.gmra.mrb[30].mxu0 %vm114_vm0, %v86_v34 }
  0x4c   :  { %4112 = vmatprep.mubr.msk.f32.mxu0 %vm114_vm0, %v87_v35 }
  0x4f   :  { %4113 = vmatmul.mubr.msk.f32.gmra.mrb[32].mxu0 %vm114_vm0, %v88_v36 }
  0x50   :  { %4115 = vmatprep.mubr.msk.f32.mxu0 %vm114_vm0, %v89_v37 }
  0x53   :  { %4116 = vmatmul.mubr.msk.f32.gmra.mrb[34].mxu0 %vm114_vm0, %v90_v38 }
  0x54   :  { %4118 = vmatprep.mubr.msk.f32.mxu0 %vm114_vm0, %v91_v39 }
  0x57   :  { %4119 = vmatmul.mubr.msk.f32.gmra.mrb[36].mxu0 %vm114_vm0, %v92_v40 }
  0x58   :  { %4121 = vmatprep.mubr.msk.f32.mxu0 %vm114_vm0, %v93_v41 }
  0x5b   :  { %4122 = vmatmul.mubr.msk.f32.gmra.mrb[38].mxu0 %vm114_vm0, %v94_v42 }
  0x5c   :  { %4124 = vmatprep.mubr.msk.f32.mxu0 %vm114_vm0, %v95_v43 }
  0x5f   :  { %4125 = vmatmul.mubr.msk.f32.gmra.mrb[40].mxu0 %vm114_vm0, %v96_v44 }
  0x60   :  { %4127 = vmatprep.mubr.msk.f32.mxu0 %vm114_vm0, %v97_v45 }
  0x63   :  { %4128 = vmatmul.mubr.msk.f32.gmra.mrb[42].mxu0 %vm114_vm0, %v98_v46 }
  0x64   :  { %4130 = vmatprep.mubr.msk.f32.mxu0 %vm114_vm0, %v99_v47 }
  0x67   :  { %4131 = vmatmul.mubr.msk.f32.gmra.mrb[44].mxu0 %vm114_vm0, %v100_v48 }
  0x68   :  { %4133 = vmatprep.mubr.msk.f32.mxu0 %vm114_vm0, %v101_v49 }
  0x6b   :  { %4134 = vmatmul.mubr.msk.f32.gmra.mrb[46].mxu0 %vm114_vm0, %v102_v50 }
  0x6c   :  { %4136 = vmatprep.mubr.msk.f32.mxu0 %vm114_vm0, %v103_v51 }
  0x6f   :  { %4137 = vmatmul.mubr.msk.f32.gmra.mrb[48].mxu0 %vm114_vm0, %v104_v52 }
  0xe2   :  { %v4066_v55 = vpop.f32.mrb[0].mxu0 }
  0xe3   :  { %v337_v56 = vadd.f32 %v4066_v55, %v4870_v54  ;;  %v331_v57 = vpop.f32.mrb[1].mxu0 }
  0xe4   :  { %v332_v58 = vadd.f32 %v4870_v54, %v331_v57 }
  0xe5   :  { %v4874_v59 = vmax.f32 %v337_v56, 0.0 }
  0xe6   :  { %v4876_v60 = vmax.f32 %v332_v58, 0.0  ;;  %v4069_v61 = vpop.f32.mrb[2].mxu0 }
  0xe7   :  { %v347_v62 = vadd.f32 %v4069_v61, %v4870_v54  ;;  %v341_v63 = vpop.f32.mrb[3].mxu0  ;;  %v679_v0 = vrot.slane %v4874_v59, 1  ;;  %v777_v1 = vrot.slane %v4874_v59, 2  ;;  %v875_v2 = vrot.slane %v4874_v59, 3 }
  0xe8   :  { %v342_v3 = vadd.f32 %v4870_v54, %v341_v63  ;;  %v678_v4 = vrot.slane %v4876_v60, 1  ;;  %v776_v5 = vrot.slane %v4876_v60, 2  ;;  %v874_v6 = vrot.slane %v4876_v60, 3 }
  0xe9   :  { %v4886_v7 = vmax.f32 %v347_v62, 0.0  ;;  %v972_v8 = vrot.slane %v4876_v60, 4  ;;  %v973_v9 = vrot.slane %v4874_v59, 4  ;;  %v1070_v10 = vrot.slane %v4876_v60, 5 }
  0xea   :  { %v4891_v11 = vmax.f32 %v342_v3, 0.0  ;;  %v4072_v12 = vpop.f32.mrb[4].mxu0  ;;  %v680_v13 = vsel %vm677_vm1, %v678_v4, %v679_v0  ;;  %v778_v14 = vsel %vm775_vm2, %v776_v5, %v777_v1  ;;  %v876_v15 = vsel %vm873_vm3, %v874_v6, %v875_v2 }
  0xeb   :  { %v357_v16 = vadd.f32 %v4072_v12, %v4870_v54  ;;  %v351_v17 = vpop.f32.mrb[5].mxu0  ;;  %v751_v18 = vmax.f32 %v4876_v60, %v680_v13  ;;  %v974_v19 = vsel %vm971_vm4, %v972_v8, %v973_v9  ;;  %v1071_v20 = vrot.slane %v4874_v59, 5 }
  0xec   :  { %v352_v21 = vadd.f32 %v4870_v54, %v351_v17  ;;  %v681_v22 = vrot.slane %v4891_v11, 1  ;;  %v779_v23 = vrot.slane %v4891_v11, 2  ;;  %v877_v24 = vrot.slane %v4891_v11, 3 }
  0xed   :  { %v4904_v25 = vmax.f32 %v357_v16, 0.0  ;;  %v849_v26 = vmax.f32 %v751_v18, %v778_v14  ;;  %v975_v27 = vrot.slane %v4891_v11, 4  ;;  %v1072_v28 = vsel %vm1069_vm5, %v1070_v10, %v1071_v20 }
  0xee   :  { %v4908_v29 = vmax.f32 %v352_v21, 0.0  ;;  %v4075_v30 = vpop.f32.mrb[6].mxu0  ;;  %v682_v31 = vsel %vm677_vm1, %v679_v0, %v681_v22  ;;  %v780_v32 = vsel %vm775_vm2, %v777_v1, %v779_v23  ;;  %v878_v33 = vsel %vm873_vm3, %v875_v2, %v877_v24 }
  0xef   :  { %v367_v34 = vadd.f32 %v4075_v30, %v4870_v54  ;;  %v361_v35 = vpop.f32.mrb[7].mxu0  ;;  %v752_v36 = vmax.f32 %v4874_v59, %v682_v31  ;;  %v947_v37 = vmax.f32 %v849_v26, %v876_v15  ;;  %v976_v38 = vsel %vm971_vm4, %v973_v9, %v975_v27 }
  0xf0   :  { %v362_v39 = vadd.f32 %v4870_v54, %v361_v35  ;;  %v1073_v40 = vrot.slane %v4891_v11, 5  ;;  %v1168_v41 = vrot.slane %v4876_v60, 6  ;;  %v1169_v42 = vrot.slane %v4874_v59, 6 }
  0xf1   :  { %v4926_v43 = vmax.f32 %v367_v34, 0.0  ;;  %v850_v44 = vmax.f32 %v752_v36, %v780_v32  ;;  %v1045_v45 = vmax.f32 %v947_v37, %v974_v19  ;;  %v1171_v46 = vrot.slane %v4891_v11, 6 }
  0xf2   :  { %v4929_v47 = vmax.f32 %v362_v39, 0.0  ;;  %v4078_v48 = vpop.f32.mrb[8].mxu0  ;;  %v1074_v49 = vsel %vm1069_vm5, %v1071_v20, %v1073_v40  ;;  %v1170_v50 = vsel %vm1167_vm6, %v1168_v41, %v1169_v42  ;;  %v1266_v51 = vrot.slane %v4876_v60, 7 }
  0xf3   :  { %v377_v52 = vadd.f32 %v4078_v48, %v4870_v54  ;;  %v371_v55 = vpop.f32.mrb[9].mxu0  ;;  %v948_v56 = vmax.f32 %v850_v44, %v878_v33  ;;  %v1143_v57 = vmax.f32 %v1045_v45, %v1072_v28  ;;  %v1172_v58 = vsel %vm1167_vm6, %v1169_v42, %v1171_v46 }
  0xf4   :  { %v372_v61 = vadd.f32 %v4870_v54, %v371_v55  ;;  %v1267_v62 = vrot.slane %v4874_v59, 7  ;;  %v1269_v63 = vrot.slane %v4891_v11, 7  ;;  %v683_v0 = vrot.slane %v4886_v7, 1 }
  0xf5   :  { %v4944_v1 = vmax.f32 %v377_v52, 0.0  ;;  %v1046_v60 = vmax.f32 %v948_v56, %v976_v38  ;;  %v1241_v2 = vmax.f32 %v1143_v57, %v1170_v50  ;;  %v685_v3 = vrot.slane %v4908_v29, 1 }
  0xf6   :  { %v4947_v4 = vmax.f32 %v372_v61, 0.0  ;;  %v4081_v5 = vpop.f32.mrb[10].mxu0  ;;  %v1268_v6 = vsel %vm1265_vm7, %v1266_v51, %v1267_v62  ;;  %v1270_v8 = vsel %vm1265_vm7, %v1267_v62, %v1269_v63  ;;  %v684_v59 = vsel %vm677_vm1, %v681_v22, %v683_v0 }
  0xf7   :  { %v387_v9 = vadd.f32 %v4081_v5, %v4870_v54  ;;  %v381_v10 = vpop.f32.mrb[11].mxu0  ;;  %v1144_v12 = vmax.f32 %v1046_v60, %v1074_v49  ;;  %v1339_v13 = vmax.f32 %v1241_v2, %v1268_v6  ;;  %v686_v14 = vsel %vm677_vm1, %v683_v0, %v685_v3 }
  0xf8   :  { %v382_v15 = vadd.f32 %v4870_v54, %v381_v10  ;;  %v753_v16 = vmax.f32 %v4891_v11, %v684_v59  ;;  %v754_v17 = vmax.f32 %v4886_v7, %v686_v14  ;;  %v781_v18 = vrot.slane %v4886_v7, 2 }
  0xf9   :  { %v4962_v19 = vmax.f32 %v387_v9, 0.0  ;;  %v1242_v20 = vmax.f32 %v1144_v12, %v1172_v58  ;;  %v783_v21 = vrot.slane %v4908_v29, 2  ;;  %v879_v22 = vrot.slane %v4886_v7, 3 }
  0xfa   :  { %v4966_v26 = vmax.f32 %v382_v15, 0.0  ;;  %v4084_v28 = vpop.f32.mrb[12].mxu0  ;;  %v782_v30 = vsel %vm775_vm2, %v779_v23, %v781_v18  ;;  %v881_v31 = vrot.slane %v4908_v29, 3  ;;  %v977_v32 = vrot.slane %v4886_v7, 4 }
  0xfb   :  { %v397_v33 = vadd.f32 %v4084_v28, %v4870_v54  ;;  %v391_v34 = vpop.f32.mrb[13].mxu0  ;;  %v1340_v35 = vmax.f32 %v1242_v20, %v1270_v8  ;;  %v784_v36 = vsel %vm775_vm2, %v781_v18, %v783_v21  ;;  %v851_v37 = vmax.f32 %v753_v16, %v782_v30 }
  0xfc   :  { %v392_v38 = vadd.f32 %v4870_v54, %v391_v34  ;;  %v852_v39 = vmax.f32 %v754_v17, %v784_v36  ;;  %v880_v23 = vsel %vm873_vm3, %v877_v24, %v879_v22  ;;  %v882_v41 = vsel %vm873_vm3, %v879_v22, %v881_v31 }
  0xfd   :  { %v4984_v42 = vmax.f32 %v397_v33, 0.0  ;;  %v4239_v44 = vpack.c.bf16 %v1340_v35, %v1339_v13  ;;  %v949_v45 = vmax.f32 %v851_v37, %v880_v23  ;;  %v978_v48 = vsel %vm971_vm4, %v975_v27, %v977_v32 }
  0xfe   :  { %v4989_v49 = vmax.f32 %v392_v38, 0.0  ;;  %v4087_v50 = vpop.f32.mrb[14].mxu0  ;;  %v950_v51 = vmax.f32 %v852_v39, %v882_v41  ;;  %v979_v52 = vrot.slane %v4908_v29, 4  ;;  %v1075_v24 = vrot.slane %v4886_v7, 5 }
  0xff   :  { %v407_v55 = vadd.f32 %v4087_v50, %v4870_v54  ;;  %v401_v56 = vpop.f32.mrb[15].mxu0  ;;  %4240 = vmatpush1.bf16.msra.mxu1 %v4239_v44  ;;  %v1047_v57 = vmax.f32 %v949_v45, %v978_v48  ;;  %v1077_v58 = vrot.slane %v4908_v29, 5  ;;  %v1173_v61 = vrot.slane %v4886_v7, 6 }
 0x100   :  { %v402_v62 = vadd.f32 %v4870_v54, %v401_v56  ;;  %4241 = vmatprep.subr.bf16.mxu1 %v6738_v53  ;;  %v980_v27 = vsel %vm971_vm4, %v977_v32, %v979_v52  ;;  %v1076_v0 = vsel %vm1069_vm5, %v1073_v40, %v1075_v24  ;;  %v1175_v60 = vrot.slane %v4908_v29, 6 }
 0x101   :  { %v5005_v2 = vmax.f32 %v407_v55, 0.0  ;;  %v1048_v5 = vmax.f32 %v950_v51, %v980_v27  ;;  %v1078_v6 = vsel %vm1069_vm5, %v1075_v24, %v1077_v58  ;;  %v1145_v8 = vmax.f32 %v1047_v57, %v1076_v0 }
 0x102   :  { %v5010_v59 = vmax.f32 %v402_v62, 0.0  ;;  %v4090_v9 = vpop.f32.mrb[16].mxu0  ;;  %v1174_v10 = vsel %vm1167_vm6, %v1171_v46, %v1173_v61  ;;  %v1176_v40 = vsel %vm1167_vm6, %v1173_v61, %v1175_v60  ;;  %v1271_v12 = vrot.slane %v4886_v7, 7 }
 0x103   :  { %v417_v13 = vadd.f32 %v4090_v9, %v4870_v54  ;;  %v411_v14 = vpop.f32.mrb[17].mxu0  ;;  %v1146_v15 = vmax.f32 %v1048_v5, %v1078_v6  ;;  %v1243_v16 = vmax.f32 %v1145_v8, %v1174_v10  ;;  %v1273_v17 = vrot.slane %v4908_v29, 7 }
 0x104   :  { %v412_v18 = vadd.f32 %v4870_v54, %v411_v14  ;;  %v1272_v20 = vsel %vm1265_vm7, %v1269_v63, %v1271_v12  ;;  %v687_v46 = vrot.slane %v4904_v25, 1  ;;  %v689_v22 = vrot.slane %v4929_v47, 1 }
 0x105   :  { %v5027_v28 = vmax.f32 %v417_v13, 0.0  ;;  %v1244_v7 = vmax.f32 %v1146_v15, %v1176_v40  ;;  %v1274_v30 = vsel %vm1265_vm7, %v1271_v12, %v1273_v17  ;;  %v1341_v32 = vmax.f32 %v1243_v16, %v1272_v20 }
 0x106   :  { %v5030_v33 = vmax.f32 %v412_v18, 0.0  ;;  %v4093_v34 = vpop.f32.mrb[18].mxu0  ;;  %v688_v35 = vsel %vm677_vm1, %v685_v3, %v687_v46  ;;  %v690_v11 = vsel %vm677_vm1, %v687_v46, %v689_v22  ;;  %v785_v63 = vrot.slane %v4904_v25, 2 }
 0x107   :  { %v1342_v36 = vmax.f32 %v1244_v7, %v1274_v30  ;;  %v427_v37 = vadd.f32 %v4093_v34, %v4870_v54  ;;  %v421_v38 = vpop.f32.mrb[19].mxu0  ;;  %v755_v39 = vmax.f32 %v4908_v29, %v688_v35  ;;  %v756_v23 = vmax.f32 %v4904_v25, %v690_v11 }
 0x108   :  { %v422_v41 = vadd.f32 %v4870_v54, %v421_v38  ;;  %v786_v3 = vsel %vm775_vm2, %v783_v21, %v785_v63  ;;  %v787_v44 = vrot.slane %v4929_v47, 2  ;;  %v883_v45 = vrot.slane %v4904_v25, 3 }
 0x109   :  { %v4242_v48 = vpack.c.bf16 %v1342_v36, %v1341_v32  ;;  %v5048_v50 = vmax.f32 %v427_v37, 0.0  ;;  %v853_v51 = vmax.f32 %v755_v39, %v786_v3  ;;  %v885_v24 = vrot.slane %v4929_v47, 3 }
 0x10a   :  { %v5051_v55 = vmax.f32 %v422_v41, 0.0  ;;  %v788_v56 = vsel %vm775_vm2, %v785_v63, %v787_v44  ;;  %v884_v57 = vsel %vm873_vm3, %v881_v31, %v883_v45  ;;  %v981_v21 = vrot.slane %v4904_v25, 4  ;;  %v4096_v61 = vpop.f32.mrb[20].mxu0 }
 0x10b   :  { %4243 = vmatpush1.bf16.msra.mxu1 %v4242_v48  ;;  %v854_v62 = vmax.f32 %v756_v23, %v788_v56  ;;  %v886_v27 = vsel %vm873_vm3, %v883_v45, %v885_v24  ;;  %v951_v0 = vmax.f32 %v853_v51, %v884_v57  ;;  %v983_v5 = vrot.slane %v4929_v47, 4  ;;  %v431_v6 = vpop.f32.mrb[21].mxu0 }
 0x10c   :  { %4244 = vmatprep.subr.bf16.mxu1 %v6738_v53  ;;  %v982_v8 = vsel %vm971_vm4, %v979_v52, %v981_v21  ;;  %v1079_v9 = vrot.slane %v4904_v25, 5  ;;  %v1081_v31 = vrot.slane %v4929_v47, 5  ;;  %v1177_v10 = vrot.slane %v4904_v25, 6 }
 0x10d   :  { %v952_v40 = vmax.f32 %v854_v62, %v886_v27  ;;  %v984_v12 = vsel %vm971_vm4, %v981_v21, %v983_v5  ;;  %v1049_v13 = vmax.f32 %v951_v0, %v982_v8  ;;  %v1179_v14 = vrot.slane %v4929_v47, 6 }
 0x10e   :  { %v1080_v15 = vsel %vm1069_vm5, %v1077_v58, %v1079_v9  ;;  %v1082_v16 = vsel %vm1069_vm5, %v1079_v9, %v1081_v31  ;;  %v1178_v52 = vsel %vm1167_vm6, %v1175_v60, %v1177_v10  ;;  %v1275_v18 = vrot.slane %v4904_v25, 7  ;;  %v4099_v20 = vpop.f32.mrb[22].mxu0 }
 0x10f   :  { %v1050_v46 = vmax.f32 %v952_v40, %v984_v12  ;;  %v1147_v7 = vmax.f32 %v1049_v13, %v1080_v15  ;;  %v1180_v30 = vsel %vm1167_vm6, %v1177_v10, %v1179_v14  ;;  %v1277_v32 = vrot.slane %v4929_v47, 7  ;;  %v441_v34 = vpop.f32.mrb[23].mxu0 }
 0x110   :  { %v1276_v58 = vsel %vm1265_vm7, %v1273_v17, %v1275_v18  ;;  %v437_v35 = vadd.f32 %v4096_v61, %v4870_v54  ;;  %v432_v29 = vadd.f32 %v4870_v54, %v431_v6  ;;  %v691_v60 = vrot.slane %v4926_v43, 1 }
 0x111   :  { %v1148_v11 = vmax.f32 %v1050_v46, %v1082_v16  ;;  %v1245_v25 = vmax.f32 %v1147_v7, %v1178_v52  ;;  %v1278_v63 = vsel %vm1265_vm7, %v1275_v18, %v1277_v32  ;;  %v693_v36 = vrot.slane %v4947_v4, 1 }
 0x112   :  { %v5087_v37 = vmax.f32 %v437_v35, 0.0  ;;  %v5089_v38 = vmax.f32 %v432_v29, 0.0  ;;  %v692_v17 = vsel %vm677_vm1, %v689_v22, %v691_v60  ;;  %v789_v39 = vrot.slane %v4926_v43, 2  ;;  %v5095_v23 = vpop.f32.mrb[24].mxu0 }
 0x113   :  { %v1246_v41 = vmax.f32 %v1148_v11, %v1180_v30  ;;  %v1343_v3 = vmax.f32 %v1245_v25, %v1276_v58  ;;  %v694_v45 = vsel %vm677_vm1, %v691_v60, %v693_v36  ;;  %v757_v48 = vmax.f32 %v4929_v47, %v692_v17  ;;  %v5101_v51 = vpop.f32.mrb[25].mxu0 }
 0x114   :  { %v758_v56 = vmax.f32 %v4926_v43, %v694_v45  ;;  %v790_v57 = vsel %vm775_vm2, %v787_v44, %v789_v39  ;;  %v791_v22 = vrot.slane %v4947_v4, 2  ;;  %v887_v21 = vrot.slane %v4926_v43, 3 }
 0x115   :  { %v1344_v61 = vmax.f32 %v1246_v41, %v1278_v63  ;;  %v855_v62 = vmax.f32 %v757_v48, %v790_v57  ;;  %v889_v27 = vrot.slane %v4947_v4, 3  ;;  %v985_v0 = vrot.slane %v4926_v43, 4 }
 0x116   :  { %v792_v6 = vsel %vm775_vm2, %v789_v39, %v791_v22  ;;  %v888_v8 = vsel %vm873_vm3, %v885_v24, %v887_v21  ;;  %v987_v9 = vrot.slane %v4947_v4, 4  ;;  %v1083_v10 = vrot.slane %v4926_v43, 5  ;;  %v5113_v40 = vpop.f32.mrb[26].mxu0 }
 0x117   :  { %v4245_v44 = vpack.c.bf16 %v1344_v61, %v1343_v3  ;;  %v856_v12 = vmax.f32 %v758_v56, %v792_v6  ;;  %v890_v13 = vsel %vm873_vm3, %v887_v21, %v889_v27  ;;  %v953_v15 = vmax.f32 %v855_v62, %v888_v8  ;;  %v5116_v16 = vpop.f32.mrb[27].mxu0 }
 0x118   :  { %v986_v52 = vsel %vm971_vm4, %v983_v5, %v985_v0  ;;  %v988_v18 = vsel %vm971_vm4, %v985_v0, %v987_v9  ;;  %v1084_v46 = vsel %vm1069_vm5, %v1081_v31, %v1083_v10  ;;  %v1085_v24 = vrot.slane %v4947_v4, 5 }
 0x119   :  { %4246 = vmatpush1.bf16.msra.mxu1 %v4245_v44  ;;  %v954_v7 = vmax.f32 %v856_v12, %v890_v13  ;;  %v1051_v30 = vmax.f32 %v953_v15, %v986_v52  ;;  %v1181_v58 = vrot.slane %v4926_v43, 6  ;;  %v1183_v35 = vrot.slane %v4947_v4, 6 }
 0x11a   :  { %4247 = vmatprep.subr.bf16.mxu1 %v6738_v53  ;;  %v1086_v29 = vsel %vm1069_vm5, %v1083_v10, %v1085_v24  ;;  %v1279_v60 = vrot.slane %v4926_v43, 7  ;;  %v1281_v5 = vrot.slane %v4947_v4, 7  ;;  %v447_v11 = vadd.f32 %v4099_v20, %v4870_v54  ;;  %v5129_v31 = vpop.f32.mrb[28].mxu0 }
 0x11b   :  { %v1052_v25 = vmax.f32 %v954_v7, %v988_v18  ;;  %v1149_v63 = vmax.f32 %v1051_v30, %v1084_v46  ;;  %v1182_v17 = vsel %vm1167_vm6, %v1179_v14, %v1181_v58  ;;  %v1184_v39 = vsel %vm1167_vm6, %v1181_v58, %v1183_v35  ;;  %v5137_v41 = vpop.f32.mrb[29].mxu0 }
 0x11c   :  { %v1280_v43 = vsel %vm1265_vm7, %v1277_v32, %v1279_v60  ;;  %v1282_v3 = vsel %vm1265_vm7, %v1279_v60, %v1281_v5  ;;  %v5141_v45 = vmax.f32 %v447_v11, 0.0  ;;  %v442_v20 = vadd.f32 %v4870_v54, %v441_v34 }
 0x11d   :  { %v1150_v48 = vmax.f32 %v1052_v25, %v1086_v29  ;;  %v1247_v56 = vmax.f32 %v1149_v63, %v1182_v17  ;;  %v695_v47 = vrot.slane %v4944_v1, 1  ;;  %v697_v14 = vrot.slane %v4966_v26, 1 }
 0x11e   :  { %v5146_v57 = vmax.f32 %v442_v20, 0.0  ;;  %v793_v21 = vrot.slane %v4944_v1, 2  ;;  %v795_v61 = vrot.slane %v4966_v26, 2  ;;  %v891_v32 = vrot.slane %v4944_v1, 3  ;;  %v5151_v62 = vpop.f32.mrb[30].mxu0 }
 0x11f   :  { %v1248_v0 = vmax.f32 %v1150_v48, %v1184_v39  ;;  %v1345_v6 = vmax.f32 %v1247_v56, %v1280_v43  ;;  %v696_v34 = vsel %vm677_vm1, %v693_v36, %v695_v47  ;;  %v698_v8 = vsel %vm677_vm1, %v695_v47, %v697_v14  ;;  %v5159_v10 = vpop.f32.mrb[31].mxu0 }
 0x120   :  { %v759_v44 = vmax.f32 %v4947_v4, %v696_v34  ;;  %v760_v12 = vmax.f32 %v4944_v1, %v698_v8  ;;  %v794_v13 = vsel %vm775_vm2, %v791_v22, %v793_v21  ;;  %v796_v15 = vsel %vm775_vm2, %v793_v21, %v795_v61 }
 0x121   :  { %v1346_v52 = vmax.f32 %v1248_v0, %v1282_v3  ;;  %v892_v18 = vsel %vm873_vm3, %v889_v27, %v891_v32  ;;  %v893_v46 = vrot.slane %v4966_v26, 3  ;;  %v989_v36 = vrot.slane %v4944_v1, 4 }
 0x122   :  { %v857_v7 = vmax.f32 %v759_v44, %v794_v13  ;;  %v858_v30 = vmax.f32 %v760_v12, %v796_v15  ;;  %v991_v58 = vrot.slane %v4966_v26, 4  ;;  %v1087_v29 = vrot.slane %v4944_v1, 5  ;;  %v5170_v60 = vpop.f32.mrb[32].mxu0 }
 0x123   :  { %v4248_v11 = vpack.c.bf16 %v1346_v52, %v1345_v6  ;;  %v894_v22 = vsel %vm873_vm3, %v891_v32, %v893_v46  ;;  %v990_v25 = vsel %vm971_vm4, %v987_v9, %v989_v36  ;;  %v1089_v63 = vrot.slane %v4966_v26, 5  ;;  %v5175_v27 = vpop.f32.mrb[33].mxu0 }
 0x124   :  { %v955_v17 = vmax.f32 %v857_v7, %v892_v18  ;;  %v956_v39 = vmax.f32 %v858_v30, %v894_v22  ;;  %v992_v43 = vsel %vm971_vm4, %v989_v36, %v991_v58  ;;  %v1088_v3 = vsel %vm1069_vm5, %v1085_v24, %v1087_v29 }
 0x125   :  { %4249 = vmatpush1.bf16.msra.mxu1 %v4248_v11  ;;  %v1090_v20 = vsel %vm1069_vm5, %v1087_v29, %v1089_v63  ;;  %v1185_v48 = vrot.slane %v4944_v1, 6  ;;  %v1187_v56 = vrot.slane %v4966_v26, 6  ;;  %v1283_v9 = vrot.slane %v4944_v1, 7 }
 0x126   :  { %4250 = vmatprep.subr.bf16.mxu1 %v6738_v53  ;;  %v1053_v47 = vmax.f32 %v955_v17, %v990_v25  ;;  %v1054_v21 = vmax.f32 %v956_v39, %v992_v43  ;;  %v1285_v32 = vrot.slane %v4966_v26, 7  ;;  %v457_v24 = vadd.f32 %v5095_v23, %v4870_v54  ;;  %v5189_v0 = vpop.f32.mrb[34].mxu0 }
 0x127   :  { %v1186_v6 = vsel %vm1167_vm6, %v1183_v35, %v1185_v48  ;;  %v1188_v34 = vsel %vm1167_vm6, %v1185_v48, %v1187_v56  ;;  %v1284_v8 = vsel %vm1265_vm7, %v1281_v5, %v1283_v9  ;;  %v452_v1 = vadd.f32 %v4870_v54, %v5101_v51  ;;  %v5198_v44 = vpop.f32.mrb[35].mxu0 }
 0x128   :  { %v1151_v12 = vmax.f32 %v1053_v47, %v1088_v3  ;;  %v1152_v13 = vmax.f32 %v1054_v21, %v1090_v20  ;;  %v1286_v15 = vsel %vm1265_vm7, %v1283_v9, %v1285_v32  ;;  %v5201_v23 = vmax.f32 %v457_v24, 0.0 }
 0x129   :  { %v5203_v52 = vmax.f32 %v452_v1, 0.0  ;;  %v699_v4 = vrot.slane %v4962_v19, 1  ;;  %v701_v35 = vrot.slane %v4989_v49, 1  ;;  %v797_v18 = vrot.slane %v4962_v19, 2 }
 0x12a   :  { %v1249_v5 = vmax.f32 %v1151_v12, %v1186_v6  ;;  %v1250_v36 = vmax.f32 %v1152_v13, %v1188_v34  ;;  %v799_v51 = vrot.slane %v4989_v49, 2  ;;  %v895_v7 = vrot.slane %v4962_v19, 3  ;;  %v5210_v30 = vpop.f32.mrb[36].mxu0 }
 0x12b   :  { %v700_v29 = vsel %vm677_vm1, %v697_v14, %v699_v4  ;;  %v702_v11 = vsel %vm677_vm1, %v699_v4, %v701_v35  ;;  %v798_v22 = vsel %vm775_vm2, %v795_v61, %v797_v18  ;;  %v897_v25 = vrot.slane %v4989_v49, 3  ;;  %v5218_v17 = vpop.f32.mrb[37].mxu0 }
 0x12c   :  { %v1347_v39 = vmax.f32 %v1249_v5, %v1284_v8  ;;  %v1348_v43 = vmax.f32 %v1250_v36, %v1286_v15  ;;  %v761_v3 = vmax.f32 %v4966_v26, %v700_v29  ;;  %v762_v20 = vmax.f32 %v4962_v19, %v702_v11 }
 0x12d   :  { %v800_v48 = vsel %vm775_vm2, %v797_v18, %v799_v51  ;;  %v896_v9 = vsel %vm873_vm3, %v893_v46, %v895_v7  ;;  %v898_v14 = vsel %vm873_vm3, %v895_v7, %v897_v25  ;;  %v993_v61 = vrot.slane %v4962_v19, 4 }
 0x12e   :  { %v4251_v47 = vpack.c.bf16 %v1348_v43, %v1347_v39  ;;  %v859_v21 = vmax.f32 %v761_v3, %v798_v22  ;;  %v860_v24 = vmax.f32 %v762_v20, %v800_v48  ;;  %v995_v6 = vrot.slane %v4989_v49, 4  ;;  %v5229_v34 = vpop.f32.mrb[38].mxu0 }
 0x12f   :  { %v994_v8 = vsel %vm971_vm4, %v991_v58, %v993_v61  ;;  %v1091_v1 = vrot.slane %v4962_v19, 5  ;;  %v1093_v12 = vrot.slane %v4989_v49, 5  ;;  %v1189_v46 = vrot.slane %v4962_v19, 6  ;;  %v5235_v13 = vpop.f32.mrb[39].mxu0 }
 0x130   :  { %4252 = vmatpush1.bf16.msra.mxu1 %v4251_v47  ;;  %v957_v15 = vmax.f32 %v859_v21, %v896_v9  ;;  %v958_v4 = vmax.f32 %v860_v24, %v898_v14  ;;  %v996_v18 = vsel %vm971_vm4, %v993_v61, %v995_v6  ;;  %v1191_v5 = vrot.slane %v4989_v49, 6 }
 0x131   :  { %4253 = vmatprep.subr.bf16.mxu1 %v6738_v53  ;;  %v1092_v58 = vsel %vm1069_vm5, %v1089_v63, %v1091_v1  ;;  %v1094_v36 = vsel %vm1069_vm5, %v1091_v1, %v1093_v12  ;;  %v1190_v7 = vsel %vm1167_vm6, %v1187_v56, %v1189_v46  ;;  %v1287_v29 = vrot.slane %v4962_v19, 7 }
 0x132   :  { %v1055_v11 = vmax.f32 %v957_v15, %v994_v8  ;;  %v1056_v22 = vmax.f32 %v958_v4, %v996_v18  ;;  %v1192_v39 = vsel %vm1167_vm6, %v1189_v46, %v1191_v5  ;;  %v1289_v43 = vrot.slane %v4989_v49, 7  ;;  %v5252_v3 = vpop.f32.mrb[40].mxu0 }
 0x133   :  { %v1288_v26 = vsel %vm1265_vm7, %v1285_v32, %v1287_v29  ;;  %v467_v63 = vadd.f32 %v5113_v40, %v4870_v54  ;;  %v462_v56 = vadd.f32 %v4870_v54, %v5116_v16  ;;  %v703_v19 = vrot.slane %v4984_v42, 1  ;;  %v5260_v20 = vpop.f32.mrb[41].mxu0 }
 0x134   :  { %v1153_v48 = vmax.f32 %v1055_v11, %v1092_v58  ;;  %v1154_v9 = vmax.f32 %v1056_v22, %v1094_v36  ;;  %v1290_v14 = vsel %vm1265_vm7, %v1287_v29, %v1289_v43  ;;  %v705_v61 = vrot.slane %v5010_v59, 1 }
 0x135   :  { %v5264_v47 = vmax.f32 %v467_v63, 0.0  ;;  %v5266_v21 = vmax.f32 %v462_v56, 0.0  ;;  %v704_v32 = vsel %vm677_vm1, %v701_v35, %v703_v19  ;;  %v801_v40 = vrot.slane %v4984_v42, 2 }
 0x136   :  { %v1251_v24 = vmax.f32 %v1153_v48, %v1190_v7  ;;  %v1252_v16 = vmax.f32 %v1154_v9, %v1192_v39  ;;  %v706_v8 = vsel %vm677_vm1, %v703_v19, %v705_v61  ;;  %v763_v1 = vmax.f32 %v4989_v49, %v704_v32  ;;  %v5274_v46 = vpop.f32.mrb[42].mxu0 }
 0x137   :  { %v764_v15 = vmax.f32 %v4984_v42, %v706_v8  ;;  %v802_v4 = vsel %vm775_vm2, %v799_v51, %v801_v40  ;;  %v803_v18 = vrot.slane %v5010_v59, 2  ;;  %v899_v35 = vrot.slane %v4984_v42, 3  ;;  %v5280_v58 = vpop.f32.mrb[43].mxu0 }
 0x138   :  { %v1349_v36 = vmax.f32 %v1251_v24, %v1288_v26  ;;  %v1350_v7 = vmax.f32 %v1252_v16, %v1290_v14  ;;  %v861_v29 = vmax.f32 %v763_v1, %v802_v4  ;;  %v901_v11 = vrot.slane %v5010_v59, 3 }
 0x139   :  { %v804_v22 = vsel %vm775_vm2, %v801_v40, %v803_v18  ;;  %v900_v39 = vsel %vm873_vm3, %v897_v25, %v899_v35  ;;  %v997_v63 = vrot.slane %v4984_v42, 4  ;;  %v999_v51 = vrot.slane %v5010_v59, 4 }
 0x13a   :  { %v4254_v56 = vpack.c.bf16 %v1350_v7, %v1349_v36  ;;  %v862_v19 = vmax.f32 %v764_v15, %v804_v22  ;;  %v902_v26 = vsel %vm873_vm3, %v899_v35, %v901_v11  ;;  %v959_v48 = vmax.f32 %v861_v29, %v900_v39  ;;  %v5292_v9 = vpop.f32.mrb[44].mxu0 }
 0x13b   :  { %v998_v14 = vsel %vm971_vm4, %v995_v6, %v997_v63  ;;  %v1000_v32 = vsel %vm971_vm4, %v997_v63, %v999_v51  ;;  %v1095_v40 = vrot.slane %v4984_v42, 5  ;;  %v1097_v25 = vrot.slane %v5010_v59, 5  ;;  %v5298_v24 = vpop.f32.mrb[45].mxu0 }
 0x13c   :  { %4255 = vmatpush1.bf16.msra.mxu1 %v4254_v56  ;;  %v960_v16 = vmax.f32 %v862_v19, %v902_v26  ;;  %v1057_v8 = vmax.f32 %v959_v48, %v998_v14  ;;  %v1193_v1 = vrot.slane %v4984_v42, 6  ;;  %v1195_v15 = vrot.slane %v5010_v59, 6 }
 0x13d   :  { %4256 = vmatprep.subr.bf16.mxu1 %v6738_v53  ;;  %v1096_v6 = vsel %vm1069_vm5, %v1093_v12, %v1095_v40  ;;  %v1098_v4 = vsel %vm1069_vm5, %v1095_v40, %v1097_v25  ;;  %v1291_v35 = vrot.slane %v4984_v42, 7  ;;  %v1293_v36 = vrot.slane %v5010_v59, 7 }
 0x13e   :  { %v1058_v7 = vmax.f32 %v960_v16, %v1000_v32  ;;  %v1155_v29 = vmax.f32 %v1057_v8, %v1096_v6  ;;  %v1194_v22 = vsel %vm1167_vm6, %v1191_v5, %v1193_v1  ;;  %v1196_v39 = vsel %vm1167_vm6, %v1193_v1, %v1195_v15  ;;  %v5313_v63 = vpop.f32.mrb[46].mxu0 }
 0x13f   :  { %v1292_v56 = vsel %vm1265_vm7, %v1289_v43, %v1291_v35  ;;  %v1294_v12 = vsel %vm1265_vm7, %v1291_v35, %v1293_v36  ;;  %v477_v19 = vadd.f32 %v5129_v31, %v4870_v54  ;;  %v472_v42 = vadd.f32 %v4870_v54, %v5137_v41  ;;  %v5321_v26 = vpop.f32.mrb[47].mxu0 }
 0x140   :  { %v1156_v48 = vmax.f32 %v1058_v7, %v1098_v4  ;;  %v1253_v49 = vmax.f32 %v1155_v29, %v1194_v22  ;;  %v707_v5 = vrot.slane %v5005_v2, 1  ;;  %v709_v14 = vrot.slane %v5030_v33, 1 }
 0x141   :  { %v5325_v32 = vmax.f32 %v477_v19, 0.0  ;;  %v5327_v40 = vmax.f32 %v472_v42, 0.0  ;;  %v805_v43 = vrot.slane %v5005_v2, 2  ;;  %v807_v16 = vrot.slane %v5030_v33, 2 }
 0x142   :  { %v1254_v31 = vmax.f32 %v1156_v48, %v1196_v39  ;;  %v1351_v8 = vmax.f32 %v1253_v49, %v1292_v56  ;;  %v708_v41 = vsel %vm677_vm1, %v705_v61, %v707_v5  ;;  %v710_v1 = vsel %vm677_vm1, %v707_v5, %v709_v14  ;;  %v5335_v6 = vpop.f32.mrb[48].mxu0 }
 0x143   :  { %v765_v4 = vmax.f32 %v5010_v59, %v708_v41  ;;  %v766_v35 = vmax.f32 %v5005_v2, %v710_v1  ;;  %v806_v7 = vsel %vm775_vm2, %v803_v18, %v805_v43  ;;  %v808_v29 = vsel %vm775_vm2, %v805_v43, %v807_v16  ;;  %v5341_v22 = vpop.f32.mrb[49].mxu0 }
 0x144   :  { %v1352_v39 = vmax.f32 %v1254_v31, %v1294_v12  ;;  %v903_v56 = vrot.slane %v5005_v2, 3  ;;  %v905_v19 = vrot.slane %v5030_v33, 3  ;;  %v1001_v61 = vrot.slane %v5005_v2, 4 }
 0x145   :  { %v863_v42 = vmax.f32 %v765_v4, %v806_v7  ;;  %v864_v48 = vmax.f32 %v766_v35, %v808_v29  ;;  %v1003_v49 = vrot.slane %v5030_v33, 4  ;;  %v1099_v5 = vrot.slane %v5005_v2, 5 }
 0x146   :  { %v4257_v41 = vpack.c.bf16 %v1352_v39, %v1351_v8  ;;  %v904_v18 = vsel %vm873_vm3, %v901_v11, %v903_v56  ;;  %v906_v43 = vsel %vm873_vm3, %v903_v56, %v905_v19  ;;  %v1002_v12 = vsel %vm971_vm4, %v999_v51, %v1001_v61 }
 0x147   :  { %v961_v31 = vmax.f32 %v863_v42, %v904_v18  ;;  %v962_v1 = vmax.f32 %v864_v48, %v906_v43  ;;  %v1004_v53 = vsel %vm971_vm4, %v1001_v61, %v1003_v49  ;;  %v1100_v4 = vsel %vm1069_vm5, %v1097_v25, %v1099_v5 }
 0x148   :  { %4258 = vmatpush1.bf16.msra.mxu1 %v4257_v41  ;;  %v1101_v35 = vrot.slane %v5030_v33, 5  ;;  %v1197_v7 = vrot.slane %v5005_v2, 6  ;;  %v1199_v8 = vrot.slane %v5030_v33, 6  ;;  %v1295_v59 = vrot.slane %v5005_v2, 7 }
 0x149   :  { %v6742_v11 = vmov 0.0|0.0   ;;  %v1059_v29 = vmax.f32 %v961_v31, %v1002_v12  ;;  %v1060_v39 = vmax.f32 %v962_v1, %v1004_v53  ;;  %v1297_v51 = vrot.slane %v5030_v33, 7 }
 0x14a   :  { %4259 = vmatprep.subr.bf16.mxu1 %v6742_v11  ;;  %v487_v56 = vadd.f32 %v5151_v62, %v4870_v54  ;;  %v1102_v25 = vsel %vm1069_vm5, %v1099_v5, %v1101_v35  ;;  %v1198_v61 = vsel %vm1167_vm6, %v1195_v15, %v1197_v7  ;;  %v1200_v42 = vsel %vm1167_vm6, %v1197_v7, %v1199_v8 }
 0x14b   :  { %v1296_v48 = vsel %vm1265_vm7, %v1293_v36, %v1295_v59  ;;  %v1157_v41 = vmax.f32 %v1059_v29, %v1100_v4  ;;  %v1158_v18 = vmax.f32 %v1060_v39, %v1102_v25  ;;  %v1298_v2 = vsel %vm1265_vm7, %v1295_v59, %v1297_v51 }
 0x14c   :  { %v5368_v43 = vmax.f32 %v487_v56, 0.0  ;;  %v482_v53 = vadd.f32 %v4870_v54, %v5159_v10  ;;  %v711_v12 = vrot.slane %v5027_v28, 1  ;;  %v713_v62 = vrot.slane %v5051_v55, 1 }
 0x14d   :  { %v809_v5 = vrot.slane %v5027_v28, 2  ;;  %v1255_v15 = vmax.f32 %v1157_v41, %v1198_v61  ;;  %v1256_v31 = vmax.f32 %v1158_v18, %v1200_v42  ;;  %v811_v1 = vrot.slane %v5051_v55, 2 }
 0x14e   :  { %v907_v36 = vrot.slane %v5027_v28, 3  ;;  %v5377_v4 = vmax.f32 %v482_v53, 0.0  ;;  %v712_v7 = vsel %vm677_vm1, %v709_v14, %v711_v12  ;;  %v714_v59 = vsel %vm677_vm1, %v711_v12, %v713_v62 }
 0x14f   :  { %v810_v54 = vsel %vm775_vm2, %v807_v16, %v809_v5  ;;  %v1353_v10 = vmax.f32 %v1255_v15, %v1296_v48  ;;  %v1354_v29 = vmax.f32 %v1256_v31, %v1298_v2  ;;  %v767_v39 = vmax.f32 %v5030_v33, %v712_v7 }
 0x150   :  { %v768_v56 = vmax.f32 %v5027_v28, %v714_v59  ;;  %v812_v25 = vsel %vm775_vm2, %v809_v5, %v811_v1  ;;  %v908_v61 = vsel %vm873_vm3, %v905_v19, %v907_v36  ;;  %v909_v42 = vrot.slane %v5051_v55, 3 }
 0x151   :  { %v1005_v41 = vrot.slane %v5027_v28, 4  ;;  %v4260_v18 = vpack.c.bf16 %v1354_v29, %v1353_v10  ;;  %v865_v14 = vmax.f32 %v767_v39, %v810_v54  ;;  %v1007_v12 = vrot.slane %v5051_v55, 4 }
 0x152   :  { %v866_v53 = vmax.f32 %v768_v56, %v812_v25  ;;  %v910_v16 = vsel %vm873_vm3, %v907_v36, %v909_v42  ;;  %v1103_v33 = vrot.slane %v5027_v28, 5  ;;  %v1105_v2 = vrot.slane %v5051_v55, 5 }
 0x153   :  { %v1006_v48 = vsel %vm971_vm4, %v1003_v49, %v1005_v41  ;;  %4261 = vmatpush1.bf16.msra.mxu1 %v4260_v18  ;;  %v963_v5 = vmax.f32 %v865_v14, %v908_v61  ;;  %v1008_v15 = vsel %vm971_vm4, %v1005_v41, %v1007_v12  ;;  %v1201_v31 = vrot.slane %v5027_v28, 6 }
 0x154   :  { %v964_v19 = vmax.f32 %v866_v53, %v910_v16  ;;  %4262 = vmatprep.subr.bf16.mxu1 %v6742_v11  ;;  %v1104_v7 = vsel %vm1069_vm5, %v1101_v35, %v1103_v33  ;;  %v1106_v59 = vsel %vm1069_vm5, %v1103_v33, %v1105_v2  ;;  %v1203_v36 = vrot.slane %v5051_v55, 6  ;;  %v5407_v35 = vld [vmem:[%s6722_s2] ss:$0 sm:$0xff] }
 0x155   :  { %v1299_v49 = vrot.slane %v5027_v28, 7  ;;  %v1061_v54 = vmax.f32 %v963_v5, %v1006_v48  ;;  %v1202_v29 = vsel %vm1167_vm6, %v1199_v8, %v1201_v31  ;;  %v1301_v39 = vrot.slane %v5051_v55, 7 }
 0x156   :  { %v1062_v10 = vmax.f32 %v964_v19, %v1008_v15  ;;  %v1204_v56 = vsel %vm1167_vm6, %v1201_v31, %v1203_v36  ;;  %v497_v61 = vadd.f32 %v5407_v35, %v5170_v60  ;;  %v492_v28 = vadd.f32 %v5407_v35, %v5175_v27 }
 0x157   :  { %v1300_v25 = vsel %vm1265_vm7, %v1297_v51, %v1299_v49  ;;  %v1159_v41 = vmax.f32 %v1061_v54, %v1104_v7  ;;  %v1302_v8 = vsel %vm1265_vm7, %v1299_v49, %v1301_v39  ;;  %v715_v14 = vrot.slane %v5048_v50, 1 }
 0x158   :  { %v1160_v18 = vmax.f32 %v1062_v10, %v1106_v59  ;;  %v5415_v53 = vmax.f32 %v497_v61, 0.0  ;;  %v5417_v51 = vmax.f32 %v492_v28, 0.0  ;;  %v717_v16 = vrot.slane %v5089_v38, 1 }
 0x159   :  { %v813_v48 = vrot.slane %v5048_v50, 2  ;;  %v1257_v33 = vmax.f32 %v1159_v41, %v1202_v29  ;;  %v716_v60 = vsel %vm677_vm1, %v713_v62, %v715_v14  ;;  %v815_v27 = vrot.slane %v5089_v38, 2 }
 0x15a   :  { %v1258_v5 = vmax.f32 %v1160_v18, %v1204_v56  ;;  %v718_v19 = vsel %vm677_vm1, %v715_v14, %v717_v16  ;;  %v769_v15 = vmax.f32 %v5051_v55, %v716_v60  ;;  %v911_v7 = vrot.slane %v5048_v50, 3 }
 0x15b   :  { %v814_v31 = vsel %vm775_vm2, %v811_v1, %v813_v48  ;;  %v1355_v59 = vmax.f32 %v1257_v33, %v1300_v25  ;;  %v770_v54 = vmax.f32 %v5048_v50, %v718_v19  ;;  %v816_v10 = vsel %vm775_vm2, %v813_v48, %v815_v27 }
 0x15c   :  { %v1356_v49 = vmax.f32 %v1258_v5, %v1302_v8  ;;  %v867_v29 = vmax.f32 %v769_v15, %v814_v31  ;;  %v912_v56 = vsel %vm873_vm3, %v909_v42, %v911_v7  ;;  %v913_v62 = vrot.slane %v5089_v38, 3 }
 0x15d   :  { %v1009_v61 = vrot.slane %v5048_v50, 4  ;;  %v868_v41 = vmax.f32 %v770_v54, %v816_v10  ;;  %v1011_v55 = vrot.slane %v5089_v38, 4  ;;  %v1107_v1 = vrot.slane %v5048_v50, 5 }
 0x15e   :  { %v4263_v28 = vpack.c.bf16 %v1356_v49, %v1355_v59  ;;  %v914_v25 = vsel %vm873_vm3, %v911_v7, %v913_v62  ;;  %v965_v18 = vmax.f32 %v867_v29, %v912_v56  ;;  %v1109_v14 = vrot.slane %v5089_v38, 5 }
 0x15f   :  { %v1010_v8 = vsel %vm971_vm4, %v1007_v12, %v1009_v61  ;;  %v966_v48 = vmax.f32 %v868_v41, %v914_v25  ;;  %v1012_v42 = vsel %vm971_vm4, %v1009_v61, %v1011_v55  ;;  %v1108_v33 = vsel %vm1069_vm5, %v1105_v2, %v1107_v1 }
 0x160   :  { %4264 = vmatpush1.bf16.msra.mxu1 %v4263_v28  ;;  %v1205_v5 = vrot.slane %v5048_v50, 6  ;;  %v1063_v60 = vmax.f32 %v965_v18, %v1010_v8  ;;  %v1110_v19 = vsel %vm1069_vm5, %v1107_v1, %v1109_v14  ;;  %v1207_v15 = vrot.slane %v5089_v38, 6 }
 0x161   :  { %4265 = vmatprep.subr.bf16.mxu1 %v6742_v11  ;;  %v1303_v31 = vrot.slane %v5048_v50, 7  ;;  %v1064_v12 = vmax.f32 %v966_v48, %v1012_v42  ;;  %v1305_v59 = vrot.slane %v5089_v38, 7  ;;  %v507_v49 = vadd.f32 %v5407_v35, %v5189_v0 }
 0x162   :  { %v1206_v7 = vsel %vm1167_vm6, %v1203_v36, %v1205_v5  ;;  %v1161_v2 = vmax.f32 %v1063_v60, %v1108_v33  ;;  %v1208_v54 = vsel %vm1167_vm6, %v1205_v5, %v1207_v15  ;;  %v502_v29 = vadd.f32 %v5407_v35, %v5198_v44 }
 0x163   :  { %v1304_v10 = vsel %vm1265_vm7, %v1301_v39, %v1303_v31  ;;  %v1162_v56 = vmax.f32 %v1064_v12, %v1110_v19  ;;  %v1306_v61 = vsel %vm1265_vm7, %v1303_v31, %v1305_v59  ;;  %v5453_v50 = vmax.f32 %v507_v49, 0.0 }
 0x164   :  { %v719_v36 = vrot.slane %v5087_v37, 1  ;;  %v1259_v28 = vmax.f32 %v1161_v2, %v1206_v7  ;;  %v5456_v41 = vmax.f32 %v502_v29, 0.0  ;;  %v721_v0 = vrot.slane %v5146_v57, 1 }
 0x165   :  { %v817_v1 = vrot.slane %v5087_v37, 2  ;;  %v1260_v25 = vmax.f32 %v1162_v56, %v1208_v54  ;;  %v819_v18 = vrot.slane %v5146_v57, 2  ;;  %v915_v44 = vrot.slane %v5087_v37, 3 }
 0x166   :  { %v720_v39 = vsel %vm677_vm1, %v717_v16, %v719_v36  ;;  %v1357_v8 = vmax.f32 %v1259_v28, %v1304_v10  ;;  %v722_v48 = vsel %vm677_vm1, %v719_v36, %v721_v0  ;;  %v917_v16 = vrot.slane %v5146_v57, 3 }
 0x167   :  { %v771_v42 = vmax.f32 %v5089_v38, %v720_v39  ;;  %v818_v33 = vsel %vm775_vm2, %v815_v27, %v817_v1  ;;  %v1358_v5 = vmax.f32 %v1260_v25, %v1306_v61  ;;  %v772_v60 = vmax.f32 %v5087_v37, %v722_v48 }
 0x168   :  { %v820_v19 = vsel %vm775_vm2, %v817_v1, %v819_v18  ;;  %v916_v31 = vsel %vm873_vm3, %v913_v62, %v915_v44  ;;  %v1013_v7 = vrot.slane %v5087_v37, 4  ;;  %v1015_v49 = vrot.slane %v5146_v57, 4 }
 0x169   :  { %v869_v12 = vmax.f32 %v771_v42, %v818_v33  ;;  %v4266_v2 = vpack.c.bf16 %v1358_v5, %v1357_v8  ;;  %v870_v54 = vmax.f32 %v772_v60, %v820_v19  ;;  %v1111_v38 = vrot.slane %v5087_v37, 5 }
 0x16a   :  { %v1113_v27 = vrot.slane %v5146_v57, 5  ;;  %v918_v10 = vsel %vm873_vm3, %v915_v44, %v917_v16  ;;  %v1014_v56 = vsel %vm971_vm4, %v1011_v55, %v1013_v7  ;;  %v1016_v62 = vsel %vm971_vm4, %v1013_v7, %v1015_v49 }
 0x16b   :  { %v967_v29 = vmax.f32 %v869_v12, %v916_v31  ;;  %4267 = vmatpush1.bf16.msra.mxu1 %v4266_v2  ;;  %v968_v61 = vmax.f32 %v870_v54, %v918_v10  ;;  %v1112_v36 = vsel %vm1069_vm5, %v1109_v14, %v1111_v38  ;;  %v1209_v1 = vrot.slane %v5087_v37, 6 }
 0x16c   :  { %v1114_v28 = vsel %vm1069_vm5, %v1111_v38, %v1113_v27  ;;  %4268 = vmatprep.subr.bf16.mxu1 %v6742_v11  ;;  %v1211_v39 = vrot.slane %v5146_v57, 6  ;;  %v1307_v44 = vrot.slane %v5087_v37, 7  ;;  %v1309_v8 = vrot.slane %v5146_v57, 7 }
 0x16d   :  { %v1065_v25 = vmax.f32 %v967_v29, %v1014_v56  ;;  %v1066_v55 = vmax.f32 %v968_v61, %v1016_v62  ;;  %v1210_v48 = vsel %vm1167_vm6, %v1207_v15, %v1209_v1  ;;  %v517_v42 = vadd.f32 %v5407_v35, %v5210_v30 }
 0x16e   :  { %v512_v14 = vadd.f32 %v5407_v35, %v5218_v17  ;;  %v1212_v5 = vsel %vm1167_vm6, %v1209_v1, %v1211_v39  ;;  %v1308_v60 = vsel %vm1265_vm7, %v1305_v59, %v1307_v44  ;;  %v1310_v19 = vsel %vm1265_vm7, %v1307_v44, %v1309_v8 }
 0x16f   :  { %v1163_v33 = vmax.f32 %v1065_v25, %v1112_v36  ;;  %v1164_v31 = vmax.f32 %v1066_v55, %v1114_v28  ;;  %v5492_v37 = vmax.f32 %v517_v42, 0.0  ;;  %v723_v15 = vrot.slane %v5141_v45, 1 }
 0x170   :  { %v5494_v12 = vmax.f32 %v512_v14, 0.0  ;;  %v725_v30 = vrot.slane %v5203_v52, 1  ;;  %v821_v2 = vrot.slane %v5141_v45, 2  ;;  %v823_v17 = vrot.slane %v5203_v52, 2 }
 0x171   :  { %v1261_v7 = vmax.f32 %v1163_v33, %v1210_v48  ;;  %v1262_v54 = vmax.f32 %v1164_v31, %v1212_v5  ;;  %v724_v38 = vsel %vm677_vm1, %v721_v0, %v723_v15  ;;  %v919_v59 = vrot.slane %v5141_v45, 3 }
 0x172   :  { %v921_v10 = vrot.slane %v5203_v52, 3  ;;  %v726_v56 = vsel %vm677_vm1, %v723_v15, %v725_v30  ;;  %v773_v62 = vmax.f32 %v5146_v57, %v724_v38  ;;  %v822_v61 = vsel %vm775_vm2, %v819_v18, %v821_v2  ;;  %v5523_v30 = vld [vmem:[%s6723_s3 + $0x8] sm:$0xff] }
 0x173   :  { %v1359_v29 = vmax.f32 %v1261_v7, %v1308_v60  ;;  %v1360_v36 = vmax.f32 %v1262_v54, %v1310_v19  ;;  %v774_v28 = vmax.f32 %v5141_v45, %v726_v56  ;;  %v824_v1 = vsel %vm775_vm2, %v821_v2, %v823_v17  ;;  %3919 = vmatprep.mubr.msk.f32.mxu1 %vm1363_vm8, %v5523_v30 }
 0x174   :  { %v920_v25 = vsel %vm873_vm3, %v917_v16, %v919_v59  ;;  %v871_v44 = vmax.f32 %v773_v62, %v822_v61  ;;  %v922_v0 = vsel %vm873_vm3, %v919_v59, %v921_v10  ;;  %v1017_v55 = vrot.slane %v5141_v45, 4 }
 0x175   :  { %v1019_v48 = vrot.slane %v5203_v52, 4  ;;  %v4269_v42 = vpack.c.bf16 %v1360_v36, %v1359_v29  ;;  %v872_v14 = vmax.f32 %v774_v28, %v824_v1  ;;  %v1115_v57 = vrot.slane %v5141_v45, 5 }
 0x176   :  { %v1117_v18 = vrot.slane %v5203_v52, 5  ;;  %v969_v33 = vmax.f32 %v871_v44, %v920_v25  ;;  %v1018_v5 = vsel %vm971_vm4, %v1015_v49, %v1017_v55  ;;  %v1213_v16 = vrot.slane %v5141_v45, 6 }
 0x177   :  { %v1020_v60 = vsel %vm971_vm4, %v1017_v55, %v1019_v48  ;;  %4270 = vmatpush1.bf16.msra.mxu1 %v4269_v42  ;;  %v970_v19 = vmax.f32 %v872_v14, %v922_v0  ;;  %v1116_v31 = vsel %vm1069_vm5, %v1113_v27, %v1115_v57  ;;  %v1215_v7 = vrot.slane %v5203_v52, 6 }
 0x178   :  { %v1118_v15 = vsel %vm1069_vm5, %v1115_v57, %v1117_v18  ;;  %4271 = vmatprep.subr.bf16.mxu1 %v6742_v11  ;;  %v1067_v49 = vmax.f32 %v969_v33, %v1018_v5  ;;  %v1214_v2 = vsel %vm1167_vm6, %v1211_v39, %v1213_v16  ;;  %v1311_v17 = vrot.slane %v5141_v45, 7 }
 0x179   :  { %v1313_v54 = vrot.slane %v5203_v52, 7  ;;  %v1068_v38 = vmax.f32 %v970_v19, %v1020_v60  ;;  %v1216_v27 = vsel %vm1167_vm6, %v1213_v16, %v1215_v7  ;;  %v527_v59 = vadd.f32 %v5407_v35, %v5229_v34 }
 0x17a   :  { %v1165_v10 = vmax.f32 %v1067_v49, %v1116_v31  ;;  %v1312_v29 = vsel %vm1265_vm7, %v1309_v8, %v1311_v17  ;;  %v522_v45 = vadd.f32 %v5407_v35, %v5235_v13  ;;  %v1638_v62 = vrot.slane %v5201_v23, 1 }
 0x17b   :  { %v1314_v56 = vsel %vm1265_vm7, %v1311_v17, %v1313_v54  ;;  %v1166_v39 = vmax.f32 %v1068_v38, %v1118_v15  ;;  %v5538_v52 = vmax.f32 %v527_v59, 0.0  ;;  %v1639_v61 = vrot.slane %v5266_v21, 1 }
 0x17c   :  { %v1263_v36 = vmax.f32 %v1165_v10, %v1214_v2  ;;  %v5542_v34 = vmax.f32 %v522_v45, 0.0  ;;  %v1641_v8 = vrot.slane %v5264_v47, 1  ;;  %v1735_v28 = vrot.slane %v5201_v23, 2 }
 0x17d   :  { %v1264_v1 = vmax.f32 %v1166_v39, %v1216_v27  ;;  %v1640_v25 = vsel %vm677_vm1, %v1638_v62, %v1639_v61  ;;  %v1736_v44 = vrot.slane %v5266_v21, 2  ;;  %v1738_v13 = vrot.slane %v5264_v47, 2  ;;  %v630_v27 = vld [vmem:[%s6723_s3] sm:$0xff] }
 0x17e   :  { %v1361_v0 = vmax.f32 %v1263_v36, %v1312_v29  ;;  %v1642_v55 = vsel %vm677_vm1, %v1639_v61, %v1641_v8  ;;  %v1711_v48 = vmax.f32 %v5201_v23, %v1640_v25  ;;  %v1832_v42 = vrot.slane %v5201_v23, 3  ;;  %v633_v36 = vld [vmem:[%s6723_s3 + $0x18] sm:$0xff] }
 0x17f   :  { %v1362_v14 = vmax.f32 %v1264_v1, %v1314_v56  ;;  %v1712_v57 = vmax.f32 %v5266_v21, %v1642_v55  ;;  %v1737_v18 = vsel %vm775_vm2, %v1735_v28, %v1736_v44  ;;  %v1739_v33 = vsel %vm775_vm2, %v1736_v44, %v1738_v13 }
 0x180   :  { %v1808_v5 = vmax.f32 %v1711_v48, %v1737_v18  ;;  %v1833_v60 = vrot.slane %v5266_v21, 3  ;;  %v1835_v16 = vrot.slane %v5264_v47, 3  ;;  %v1929_v19 = vrot.slane %v5201_v23, 4 }
 0x181   :  { %v4272_v31 = vpack.c.bf16 %v1362_v14, %v1361_v0  ;;  %v1809_v15 = vmax.f32 %v1712_v57, %v1739_v33  ;;  %v1930_v7 = vrot.slane %v5266_v21, 4  ;;  %v1932_v49 = vrot.slane %v5264_v47, 4  ;;  %v632_v33 = vld [vmem:[%s6723_s3 + $0x10] sm:$0xff] }
 0x182   :  { %v1834_v2 = vsel %vm873_vm3, %v1832_v42, %v1833_v60  ;;  %v1836_v17 = vsel %vm873_vm3, %v1833_v60, %v1835_v16  ;;  %v2026_v54 = vrot.slane %v5201_v23, 5  ;;  %v2027_v38 = vrot.slane %v5266_v21, 5 }
 0x183   :  { %4273 = vmatpush1.bf16.msra.mxu1 %v4272_v31  ;;  %v1905_v59 = vmax.f32 %v1808_v5, %v1834_v2  ;;  %v1906_v10 = vmax.f32 %v1809_v15, %v1836_v17  ;;  %v1931_v29 = vsel %vm971_vm4, %v1929_v19, %v1930_v7  ;;  %v1933_v56 = vsel %vm971_vm4, %v1930_v7, %v1932_v49  ;;  %v635_v31 = vld [vmem:[%s6723_s3 + $0x28] sm:$0xff] }
 0x184   :  { %4274 = vmatprep.subr.bf16.mxu1 %v6742_v11  ;;  %v2028_v45 = vsel %vm1069_vm5, %v2026_v54, %v2027_v38  ;;  %v2029_v39 = vrot.slane %v5264_v47, 5  ;;  %v2123_v62 = vrot.slane %v5201_v23, 6  ;;  %v2124_v61 = vrot.slane %v5266_v21, 6 }
 0x185   :  { %v2002_v28 = vmax.f32 %v1905_v59, %v1931_v29  ;;  %v2003_v1 = vmax.f32 %v1906_v10, %v1933_v56  ;;  %v2126_v25 = vrot.slane %v5264_v47, 6  ;;  %v2220_v44 = vrot.slane %v5201_v23, 7  ;;  %v634_v56 = vld [vmem:[%s6723_s3 + $0x20] sm:$0xff] }
 0x186   :  { %1462 = vmatmul.mubr.f32.vlgmr.msra.gmra.mrb[0].mxu1 %v630_v27  ;;  %v2030_v0 = vsel %vm1069_vm5, %v2027_v38, %v2029_v39  ;;  %v2125_v55 = vsel %vm1167_vm6, %v2123_v62, %v2124_v61  ;;  %v2221_v48 = vrot.slane %v5266_v21, 7  ;;  %v2223_v42 = vrot.slane %v5264_v47, 7 }
 0x187   :  { %v2099_v14 = vmax.f32 %v2002_v28, %v2028_v45  ;;  %v2100_v57 = vmax.f32 %v2003_v1, %v2030_v0  ;;  %v2127_v18 = vsel %vm1167_vm6, %v2124_v61, %v2126_v25  ;;  %3920 = vmatprep.mubr.msk.f32.mxu1 %vm1363_vm8, %v633_v36  ;;  %v537_v23 = vadd.f32 %v5407_v35, %v5252_v3  ;;  %v637_v36 = vld [vmem:[%s6723_s3 + $0x38] sm:$0xff] }
 0x188   :  { %v2222_v5 = vsel %vm1265_vm7, %v2220_v44, %v2221_v48  ;;  %v2224_v21 = vsel %vm1265_vm7, %v2221_v48, %v2223_v42  ;;  %v532_v60 = vadd.f32 %v5407_v35, %v5260_v20  ;;  %v1643_v19 = vrot.slane %v5327_v40, 1 }
 0x189   :  { %v2196_v3 = vmax.f32 %v2099_v14, %v2125_v55  ;;  %v2197_v15 = vmax.f32 %v2100_v57, %v2127_v18  ;;  %v5612_v7 = vmax.f32 %v537_v23, 0.0  ;;  %v1645_v2 = vrot.slane %v5325_v32, 1 }
 0x18a   :  { %1467 = vmatmul.mubr.f32.gmra.mrb[2].mxu1 %v632_v33  ;;  %v5615_v17 = vmax.f32 %v532_v60, 0.0  ;;  %v1644_v54 = vsel %vm677_vm1, %v1641_v8, %v1643_v19  ;;  %v1740_v20 = vrot.slane %v5327_v40, 2  ;;  %v1742_v38 = vrot.slane %v5325_v32, 2 }
 0x18b   :  { %v2293_v27 = vmax.f32 %v2196_v3, %v2222_v5  ;;  %v2294_v59 = vmax.f32 %v2197_v15, %v2224_v21  ;;  %v1646_v10 = vsel %vm677_vm1, %v1643_v19, %v1645_v2  ;;  %v1713_v29 = vmax.f32 %v5264_v47, %v1644_v54  ;;  %3921 = vmatprep.mubr.msk.f32.mxu1 %vm1363_vm8, %v635_v31  ;;  %v639_v19 = vld [vmem:[%s6723_s3 + $0x48] sm:$0xff] }
 0x18c   :  { %v1714_v8 = vmax.f32 %v5327_v40, %v1646_v10  ;;  %v1741_v45 = vsel %vm775_vm2, %v1738_v13, %v1740_v20  ;;  %v1743_v62 = vsel %vm775_vm2, %v1740_v20, %v1742_v38  ;;  %v1837_v61 = vrot.slane %v5327_v40, 3 }
 0x18d   :  { %v4275_v28 = vpack.c.bf16 %v2294_v59, %v2293_v27  ;;  %v1810_v1 = vmax.f32 %v1713_v29, %v1741_v45  ;;  %v1839_v44 = vrot.slane %v5325_v32, 3  ;;  %v1934_v0 = vrot.slane %v5327_v40, 4 }
 0x18e   :  { %v1811_v55 = vmax.f32 %v1714_v8, %v1743_v62  ;;  %v1838_v13 = vsel %vm873_vm3, %v1835_v16, %v1837_v61  ;;  %v1936_v48 = vrot.slane %v5325_v32, 4  ;;  %v2031_v14 = vrot.slane %v5327_v40, 5  ;;  %1472 = vmatmul.mubr.f32.gmra.mrb[4].mxu1 %v634_v56  ;;  %v636_v16 = vld [vmem:[%s6723_s3 + $0x30] sm:$0xff] }
 0x18f   :  { %4276 = vmatpush1.bf16.msra.mxu1 %v4275_v28  ;;  %v1840_v57 = vsel %vm873_vm3, %v1837_v61, %v1839_v44  ;;  %v1907_v18 = vmax.f32 %v1810_v1, %v1838_v13  ;;  %v1935_v23 = vsel %vm971_vm4, %v1932_v49, %v1934_v0  ;;  %v2033_v33 = vrot.slane %v5325_v32, 5  ;;  %3922 = vmatprep.mubr.msk.f32.mxu1 %vm1363_vm8, %v637_v36 }
 0x190   :  { %4277 = vmatprep.subr.bf16.mxu1 %v6742_v11  ;;  %v1908_v5 = vmax.f32 %v1811_v55, %v1840_v57  ;;  %v1937_v21 = vsel %vm971_vm4, %v1934_v0, %v1936_v48  ;;  %v2032_v60 = vsel %vm1069_vm5, %v2029_v39, %v2031_v14  ;;  %v2128_v49 = vrot.slane %v5327_v40, 6 }
 0x191   :  { %v2004_v31 = vmax.f32 %v1907_v18, %v1935_v23  ;;  %v2034_v3 = vsel %vm1069_vm5, %v2031_v14, %v2033_v33  ;;  %v2130_v15 = vrot.slane %v5325_v32, 6  ;;  %v2225_v54 = vrot.slane %v5327_v40, 7 }
 0x192   :  { %v2005_v20 = vmax.f32 %v1908_v5, %v1937_v21  ;;  %v2129_v39 = vsel %vm1167_vm6, %v2126_v25, %v2128_v49  ;;  %v2227_v27 = vrot.slane %v5325_v32, 7  ;;  %v547_v59 = vadd.f32 %v5407_v35, %v5274_v46  ;;  %1477 = vmatmul.mubr.f32.gmra.mrb[6].mxu1 %v636_v16  ;;  %v5691_v25 = vld [vmem:[%s6723_s3 + $0x40] sm:$0xff] }
 0x193   :  { %v2101_v10 = vmax.f32 %v2004_v31, %v2032_v60  ;;  %v2131_v29 = vsel %vm1167_vm6, %v2128_v49, %v2130_v15  ;;  %v2226_v40 = vsel %vm1265_vm7, %v2223_v42, %v2225_v54  ;;  %v542_v56 = vadd.f32 %v5407_v35, %v5280_v58  ;;  %3923 = vmatprep.mubr.msk.f32.mxu1 %vm1363_vm8, %v639_v19  ;;  %v5702_v58 = vld [vmem:[%s6723_s3 + $0x58] sm:$0xff] }
 0x194   :  { %v2102_v46 = vmax.f32 %v2005_v20, %v2034_v3  ;;  %v2228_v8 = vsel %vm1265_vm7, %v2225_v54, %v2227_v27  ;;  %v5696_v45 = vmax.f32 %v547_v59, 0.0  ;;  %v1647_v47 = vrot.slane %v5377_v4, 1 }
 0x195   :  { %v2198_v42 = vmax.f32 %v2101_v10, %v2129_v39  ;;  %v5704_v62 = vmax.f32 %v542_v56, 0.0  ;;  %v1649_v61 = vrot.slane %v5368_v43, 1  ;;  %v1744_v36 = vrot.slane %v5377_v4, 2 }
 0x196   :  { %v2199_v28 = vmax.f32 %v2102_v46, %v2131_v29  ;;  %v1648_v1 = vsel %vm677_vm1, %v1645_v2, %v1647_v47  ;;  %v1746_v0 = vrot.slane %v5368_v43, 2  ;;  %v1841_v55 = vrot.slane %v5377_v4, 3  ;;  %1482 = vmatmul.mubr.f32.gmra.mrb[8].mxu1 %v5691_v25  ;;  %v5726_v2 = vld [vmem:[%s6723_s3 + $0x50] sm:$0xff] }
 0x197   :  { %v2295_v13 = vmax.f32 %v2198_v42, %v2226_v40  ;;  %v1650_v14 = vsel %vm677_vm1, %v1647_v47, %v1649_v61  ;;  %v1715_v57 = vmax.f32 %v5325_v32, %v1648_v1  ;;  %v1745_v18 = vsel %vm775_vm2, %v1742_v38, %v1744_v36  ;;  %3924 = vmatprep.mubr.msk.f32.mxu1 %vm1363_vm8, %v5702_v58  ;;  %v5736_v38 = vld [vmem:[%s6723_s3 + $0x68] sm:$0xff]  ;;  %v5756_v40 = vld [vmem:[%s6723_s3 + $0x60] sm:$0xff]  ;;  %v5768_v47 = vld [vmem:[%s6723_s3 + $0x78] sm:$0xff] }
 0x198   :  { %v2296_v23 = vmax.f32 %v2199_v28, %v2228_v8  ;;  %v1716_v16 = vmax.f32 %v5377_v4, %v1650_v14  ;;  %v1747_v5 = vsel %vm775_vm2, %v1744_v36, %v1746_v0  ;;  %v1842_v21 = vsel %vm873_vm3, %v1839_v44, %v1841_v55 }
 0x199   :  { %v1812_v60 = vmax.f32 %v1715_v57, %v1745_v18  ;;  %v1843_v49 = vrot.slane %v5368_v43, 3  ;;  %v1938_v19 = vrot.slane %v5377_v4, 4  ;;  %v1940_v31 = vrot.slane %v5368_v43, 4 }
 0x19a   :  { %v4278_v3 = vpack.c.bf16 %v2296_v23, %v2295_v13  ;;  %v1813_v54 = vmax.f32 %v1716_v16, %v1747_v5  ;;  %v2035_v20 = vrot.slane %v5377_v4, 5  ;;  %v2037_v39 = vrot.slane %v5368_v43, 5  ;;  %1487 = vmatmul.mubr.f32.gmra.mrb[10].mxu1 %v5726_v2 }
 0x19b   :  { %v1844_v44 = vsel %vm873_vm3, %v1841_v55, %v1843_v49  ;;  %v1909_v59 = vmax.f32 %v1812_v60, %v1842_v21  ;;  %v1939_v10 = vsel %vm971_vm4, %v1936_v48, %v1938_v19  ;;  %v1941_v29 = vsel %vm971_vm4, %v1938_v19, %v1940_v31  ;;  %3925 = vmatprep.mubr.msk.f32.mxu1 %vm1363_vm8, %v5736_v38 }
 0x19c   :  { %4279 = vmatpush1.bf16.msra.mxu1 %v4278_v3  ;;  %v1910_v56 = vmax.f32 %v1813_v54, %v1844_v44  ;;  %v2036_v46 = vsel %vm1069_vm5, %v2033_v33, %v2035_v20  ;;  %v2038_v48 = vsel %vm1069_vm5, %v2035_v20, %v2037_v39  ;;  %v2132_v8 = vrot.slane %v5377_v4, 6 }
 0x19d   :  { %4280 = vmatprep.subr.bf16.mxu1 %v6742_v11  ;;  %v2006_v42 = vmax.f32 %v1909_v59, %v1939_v10  ;;  %v2134_v36 = vrot.slane %v5368_v43, 6  ;;  %v2229_v28 = vrot.slane %v5377_v4, 7  ;;  %v2231_v33 = vrot.slane %v5368_v43, 7 }
 0x19e   :  { %v2007_v1 = vmax.f32 %v1910_v56, %v1941_v29  ;;  %v2133_v55 = vsel %vm1167_vm6, %v2130_v15, %v2132_v8  ;;  %v557_v13 = vadd.f32 %v5407_v35, %v5292_v9  ;;  %v552_v14 = vadd.f32 %v5407_v35, %v5298_v24  ;;  %1492 = vmatmul.mubr.f32.gmra.mrb[12].mxu1 %v5756_v40  ;;  %v5796_v9 = vld [vmem:[%s6723_s3 + $0x70] sm:$0xff] }
 0x19f   :  { %v2103_v57 = vmax.f32 %v2006_v42, %v2036_v46  ;;  %v2135_v4 = vsel %vm1167_vm6, %v2132_v8, %v2134_v36  ;;  %v2230_v18 = vsel %vm1265_vm7, %v2227_v27, %v2229_v28  ;;  %v2232_v15 = vsel %vm1265_vm7, %v2229_v28, %v2231_v33  ;;  %3926 = vmatprep.mubr.msk.f32.mxu1 %vm1363_vm8, %v5768_v47  ;;  %v5806_v27 = vld [vmem:[%s6723_s3 + $0x88] sm:$0xff] }
 0x1a0   :  { %v2104_v24 = vmax.f32 %v2007_v1, %v2038_v48  ;;  %v5798_v23 = vmax.f32 %v557_v13, 0.0  ;;  %v5800_v16 = vmax.f32 %v552_v14, 0.0  ;;  %v1651_v32 = vrot.slane %v5417_v51, 1 }
 0x1a1   :  { %v2200_v5 = vmax.f32 %v2103_v57, %v2133_v55  ;;  %v1653_v21 = vrot.slane %v5415_v53, 1  ;;  %v1748_v60 = vrot.slane %v5417_v51, 2  ;;  %v1750_v19 = vrot.slane %v5415_v53, 2 }
 0x1a2   :  { %v2201_v3 = vmax.f32 %v2104_v24, %v2135_v4  ;;  %v1652_v54 = vsel %vm677_vm1, %v1649_v61, %v1651_v32  ;;  %v1845_v20 = vrot.slane %v5417_v51, 3  ;;  %v1847_v44 = vrot.slane %v5415_v53, 3  ;;  %1497 = vmatmul.mubr.f32.gmra.mrb[14].mxu1 %v5796_v9  ;;  %v5827_v61 = vld [vmem:[%s6723_s3 + $0x80] sm:$0xff] }
 0x1a3   :  { %v2297_v59 = vmax.f32 %v2200_v5, %v2230_v18  ;;  %v1654_v10 = vsel %vm677_vm1, %v1651_v32, %v1653_v21  ;;  %v1717_v29 = vmax.f32 %v5368_v43, %v1652_v54  ;;  %v1749_v56 = vsel %vm775_vm2, %v1746_v0, %v1748_v60  ;;  %3927 = vmatprep.mubr.msk.f32.mxu1 %vm1363_vm8, %v5806_v27  ;;  %v5837_v0 = vld [vmem:[%s6723_s3 + $0x98] sm:$0xff]  ;;  %v5859_v5 = vld [vmem:[%s6723_s3 + $0x90] sm:$0xff] }
 0x1a4   :  { %v2298_v46 = vmax.f32 %v2201_v3, %v2232_v15  ;;  %v1718_v48 = vmax.f32 %v5417_v51, %v1654_v10  ;;  %v1751_v8 = vsel %vm775_vm2, %v1748_v60, %v1750_v19  ;;  %v1846_v42 = vsel %vm873_vm3, %v1843_v49, %v1845_v20 }
 0x1a5   :  { %v1814_v28 = vmax.f32 %v1717_v29, %v1749_v56  ;;  %v1848_v1 = vsel %vm873_vm3, %v1845_v20, %v1847_v44  ;;  %v1942_v55 = vrot.slane %v5417_v51, 4  ;;  %v1944_v13 = vrot.slane %v5415_v53, 4  ;;  %v5871_v20 = vld [vmem:[%s6723_s3 + $0xa8] sm:$0xff] }
 0x1a6   :  { %v4281_v14 = vpack.c.bf16 %v2298_v46, %v2297_v59  ;;  %v1815_v57 = vmax.f32 %v1718_v48, %v1751_v8  ;;  %v2039_v4 = vrot.slane %v5417_v51, 5  ;;  %v2041_v49 = vrot.slane %v5415_v53, 5  ;;  %1502 = vmatmul.mubr.f32.gmra.mrb[16].mxu1 %v5827_v61 }
 0x1a7   :  { %v1911_v18 = vmax.f32 %v1814_v28, %v1846_v42  ;;  %v1943_v15 = vsel %vm971_vm4, %v1940_v31, %v1942_v55  ;;  %v1945_v24 = vsel %vm971_vm4, %v1942_v55, %v1944_v13  ;;  %v2136_v32 = vrot.slane %v5417_v51, 6  ;;  %3928 = vmatprep.mubr.msk.f32.mxu1 %vm1363_vm8, %v5837_v0 }
 0x1a8   :  { %4282 = vmatpush1.bf16.msra.mxu1 %v4281_v14  ;;  %v1912_v60 = vmax.f32 %v1815_v57, %v1848_v1  ;;  %v2040_v31 = vsel %vm1069_vm5, %v2037_v39, %v2039_v4  ;;  %v2042_v3 = vsel %vm1069_vm5, %v2039_v4, %v2041_v49  ;;  %v2138_v54 = vrot.slane %v5415_v53, 6 }
 0x1a9   :  { %4283 = vmatprep.subr.bf16.mxu1 %v6742_v11  ;;  %v2008_v59 = vmax.f32 %v1911_v18, %v1943_v15  ;;  %v2137_v10 = vsel %vm1167_vm6, %v2134_v36, %v2136_v32  ;;  %v2233_v39 = vrot.slane %v5417_v51, 7  ;;  %v2235_v29 = vrot.slane %v5415_v53, 7 }
 0x1aa   :  { %v2009_v56 = vmax.f32 %v1912_v60, %v1945_v24  ;;  %v2139_v46 = vsel %vm1167_vm6, %v2136_v32, %v2138_v54  ;;  %v567_v48 = vadd.f32 %v5407_v35, %v5313_v63  ;;  %v562_v8 = vadd.f32 %v5407_v35, %v5321_v26  ;;  %1507 = vmatmul.mubr.f32.gmra.mrb[18].mxu1 %v5859_v5  ;;  %v5897_v63 = vld [vmem:[%s6723_s3 + $0xa0] sm:$0xff] }
 0x1ab   :  { %v2105_v42 = vmax.f32 %v2008_v59, %v2040_v31  ;;  %v2234_v51 = vsel %vm1265_vm7, %v2231_v33, %v2233_v39  ;;  %v2236_v36 = vsel %vm1265_vm7, %v2233_v39, %v2235_v29  ;;  %v1655_v28 = vrot.slane %v5456_v41, 1  ;;  %3929 = vmatprep.mubr.msk.f32.mxu1 %vm1363_vm8, %v5871_v20 }
 0x1ac   :  { %v2106_v26 = vmax.f32 %v2009_v56, %v2042_v3  ;;  %v5899_v1 = vmax.f32 %v567_v48, 0.0  ;;  %v5901_v55 = vmax.f32 %v562_v8, 0.0  ;;  %v1657_v43 = vrot.slane %v5453_v50, 1 }
 0x1ad   :  { %v2202_v33 = vmax.f32 %v2105_v42, %v2137_v10  ;;  %v1656_v14 = vsel %vm677_vm1, %v1653_v21, %v1655_v28  ;;  %v1752_v57 = vrot.slane %v5456_v41, 2  ;;  %v1754_v4 = vrot.slane %v5453_v50, 2 }
 0x1ae   :  { %v2203_v18 = vmax.f32 %v2106_v26, %v2139_v46  ;;  %v1658_v15 = vsel %vm677_vm1, %v1655_v28, %v1657_v43  ;;  %v1719_v24 = vmax.f32 %v5415_v53, %v1656_v14  ;;  %v1849_v32 = vrot.slane %v5456_v41, 3  ;;  %1512 = vmatmul.mubr.f32.gmra.mrb[20].mxu1 %v5897_v63 }
 0x1af   :  { %v2299_v60 = vmax.f32 %v2202_v33, %v2234_v51  ;;  %v1720_v31 = vmax.f32 %v5456_v41, %v1658_v15  ;;  %v1753_v21 = vsel %vm775_vm2, %v1750_v19, %v1752_v57  ;;  %v1755_v3 = vsel %vm775_vm2, %v1752_v57, %v1754_v4  ;;  %3930 = vmatprep.mubr.msk.f32.mxu1 %vm1363_vm8, %v5523_v30 }
 0x1b0   :  { %v2300_v59 = vmax.f32 %v2203_v18, %v2236_v36  ;;  %v1816_v10 = vmax.f32 %v1719_v24, %v1753_v21  ;;  %v1850_v39 = vsel %vm873_vm3, %v1847_v44, %v1849_v32  ;;  %v1851_v56 = vrot.slane %v5453_v50, 3 }
 0x1b1   :  { %v1817_v46 = vmax.f32 %v1720_v31, %v1755_v3  ;;  %v1946_v48 = vrot.slane %v5456_v41, 4  ;;  %v1948_v8 = vrot.slane %v5453_v50, 4  ;;  %v2043_v19 = vrot.slane %v5456_v41, 5 }
 0x1b2   :  { %v4284_v42 = vpack.c.bf16 %v2300_v59, %v2299_v60  ;;  %v1852_v51 = vsel %vm873_vm3, %v1849_v32, %v1851_v56  ;;  %v1913_v28 = vmax.f32 %v1816_v10, %v1850_v39  ;;  %v2045_v30 = vrot.slane %v5453_v50, 5 }
 0x1b3   :  { %v1914_v36 = vmax.f32 %v1817_v46, %v1852_v51  ;;  %v1947_v44 = vsel %vm971_vm4, %v1944_v13, %v1946_v48  ;;  %v1949_v26 = vsel %vm971_vm4, %v1946_v48, %v1948_v8  ;;  %v2044_v33 = vsel %vm1069_vm5, %v2041_v49, %v2043_v19 }
 0x1b4   :  { %4285 = vmatpush1.bf16.msra.mxu1 %v4284_v42  ;;  %v2010_v14 = vmax.f32 %v1913_v28, %v1947_v44  ;;  %v2046_v57 = vsel %vm1069_vm5, %v2043_v19, %v2045_v30  ;;  %v2140_v18 = vrot.slane %v5456_v41, 6  ;;  %v2142_v15 = vrot.slane %v5453_v50, 6 }
 0x1b5   :  { %4286 = vmatprep.subr.bf16.mxu1 %v6742_v11  ;;  %v2011_v24 = vmax.f32 %v1914_v36, %v1949_v26  ;;  %v2237_v32 = vrot.slane %v5456_v41, 7  ;;  %v2239_v13 = vrot.slane %v5453_v50, 7  ;;  %v577_v60 = vadd.f32 %v5407_v35, %v5335_v6 }
 0x1b6   :  { %v2107_v31 = vmax.f32 %v2010_v14, %v2044_v33  ;;  %v2141_v49 = vsel %vm1167_vm6, %v2138_v54, %v2140_v18  ;;  %v2143_v21 = vsel %vm1167_vm6, %v2140_v18, %v2142_v15  ;;  %v572_v3 = vadd.f32 %v5407_v35, %v5341_v22 }
 0x1b7   :  { %v2108_v59 = vmax.f32 %v2011_v24, %v2046_v57  ;;  %v2238_v10 = vsel %vm1265_vm7, %v2235_v29, %v2237_v32  ;;  %v2240_v41 = vsel %vm1265_vm7, %v2237_v32, %v2239_v13  ;;  %v5950_v39 = vmax.f32 %v577_v60, 0.0 }
 0x1b8   :  { %v2204_v46 = vmax.f32 %v2107_v31, %v2141_v49  ;;  %v5952_v48 = vmax.f32 %v572_v3, 0.0  ;;  %v1659_v6 = vrot.slane %v5494_v12, 1  ;;  %v1661_v53 = vrot.slane %v5492_v37, 1 }
 0x1b9   :  { %v2205_v54 = vmax.f32 %v2108_v59, %v2143_v21  ;;  %v1685_v19 = vrot.slane %v5950_v39, 1  ;;  %v1756_v42 = vrot.slane %v5494_v12, 2  ;;  %v1758_v22 = vrot.slane %v5492_v37, 2 }
 0x1ba   :  { %v2301_v35 = vmax.f32 %v2204_v46, %v2238_v10  ;;  %v1660_v29 = vsel %vm677_vm1, %v1657_v43, %v1659_v6  ;;  %v1662_v51 = vsel %vm677_vm1, %v1659_v6, %v1661_v53  ;;  %v1853_v28 = vrot.slane %v5494_v12, 3 }
 0x1bb   :  { %v2302_v36 = vmax.f32 %v2205_v54, %v2240_v41  ;;  %v1721_v44 = vmax.f32 %v5453_v50, %v1660_v29  ;;  %v1722_v26 = vmax.f32 %v5494_v12, %v1662_v51  ;;  %v1757_v33 = vsel %vm775_vm2, %v1754_v4, %v1756_v42 }
 0x1bc   :  { %v1759_v14 = vsel %vm775_vm2, %v1756_v42, %v1758_v22  ;;  %v1854_v57 = vsel %vm873_vm3, %v1851_v56, %v1853_v28  ;;  %v1855_v18 = vrot.slane %v5492_v37, 3  ;;  %v1950_v24 = vrot.slane %v5494_v12, 4 }
 0x1bd   :  { %v4287_v43 = vpack.c.bf16 %v2302_v36, %v2301_v35  ;;  %v1818_v32 = vmax.f32 %v1721_v44, %v1757_v33  ;;  %v1819_v60 = vmax.f32 %v1722_v26, %v1759_v14  ;;  %v1952_v31 = vrot.slane %v5492_v37, 4 }
 0x1be   :  { %v1856_v49 = vsel %vm873_vm3, %v1853_v28, %v1855_v18  ;;  %v1951_v50 = vsel %vm971_vm4, %v1948_v8, %v1950_v24  ;;  %v2047_v21 = vrot.slane %v5494_v12, 5  ;;  %v2049_v4 = vrot.slane %v5492_v37, 5 }
 0x1bf   :  { %4288 = vmatpush1.bf16.msra.mxu1 %v4287_v43  ;;  %v1915_v3 = vmax.f32 %v1818_v32, %v1854_v57  ;;  %v1916_v56 = vmax.f32 %v1819_v60, %v1856_v49  ;;  %v1953_v59 = vsel %vm971_vm4, %v1950_v24, %v1952_v31  ;;  %v2144_v10 = vrot.slane %v5494_v12, 6 }
 0x1c0   :  { %4289 = vmatprep.subr.bf16.mxu1 %v6742_v11  ;;  %v2048_v41 = vsel %vm1069_vm5, %v2045_v30, %v2047_v21  ;;  %v2050_v46 = vsel %vm1069_vm5, %v2047_v21, %v2049_v4  ;;  %v2146_v6 = vrot.slane %v5492_v37, 6  ;;  %v2241_v8 = vrot.slane %v5494_v12, 7 }
 0x1c1   :  { %v2012_v54 = vmax.f32 %v1915_v3, %v1951_v50  ;;  %v2013_v42 = vmax.f32 %v1916_v56, %v1953_v59  ;;  %v2145_v35 = vsel %vm1167_vm6, %v2142_v15, %v2144_v10  ;;  %v2243_v29 = vrot.slane %v5492_v37, 7 }
 0x1c2   :  { %v2147_v51 = vsel %vm1167_vm6, %v2144_v10, %v2146_v6  ;;  %v2242_v28 = vsel %vm1265_vm7, %v2239_v13, %v2241_v8  ;;  %v1663_v36 = vrot.slane %v5542_v34, 1  ;;  %v1665_v30 = vrot.slane %v5538_v52, 1 }
 0x1c3   :  { %v2109_v44 = vmax.f32 %v2012_v54, %v2048_v41  ;;  %v2110_v26 = vmax.f32 %v2013_v42, %v2050_v46  ;;  %v2244_v33 = vsel %vm1265_vm7, %v2241_v8, %v2243_v29  ;;  %v1760_v12 = vrot.slane %v5542_v34, 2 }
 0x1c4   :  { %v1664_v14 = vsel %vm677_vm1, %v1661_v53, %v1663_v36  ;;  %v1666_v15 = vsel %vm677_vm1, %v1663_v36, %v1665_v30  ;;  %v1762_v57 = vrot.slane %v5538_v52, 2  ;;  %v1857_v24 = vrot.slane %v5542_v34, 3 }
 0x1c5   :  { %v2206_v43 = vmax.f32 %v2109_v44, %v2145_v35  ;;  %v2207_v13 = vmax.f32 %v2110_v26, %v2147_v51  ;;  %v1723_v32 = vmax.f32 %v5492_v37, %v1664_v14  ;;  %v1724_v60 = vmax.f32 %v5542_v34, %v1666_v15 }
 0x1c6   :  { %v1761_v49 = vsel %vm775_vm2, %v1758_v22, %v1760_v12  ;;  %v1763_v50 = vsel %vm775_vm2, %v1760_v12, %v1762_v57  ;;  %v1858_v21 = vsel %vm873_vm3, %v1855_v18, %v1857_v24  ;;  %v1859_v53 = vrot.slane %v5538_v52, 3 }
 0x1c7   :  { %v2303_v3 = vmax.f32 %v2206_v43, %v2242_v28  ;;  %v2304_v56 = vmax.f32 %v2207_v13, %v2244_v33  ;;  %v1820_v59 = vmax.f32 %v1723_v32, %v1761_v49  ;;  %v1821_v10 = vmax.f32 %v1724_v60, %v1763_v50 }
 0x1c8   :  { %v1860_v41 = vsel %vm873_vm3, %v1857_v24, %v1859_v53  ;;  %v1954_v46 = vrot.slane %v5542_v34, 4  ;;  %v1956_v37 = vrot.slane %v5538_v52, 4  ;;  %v2051_v8 = vrot.slane %v5542_v34, 5 }
 0x1c9   :  { %v4290_v54 = vpack.c.bf16 %v2304_v56, %v2303_v3  ;;  %v1917_v22 = vmax.f32 %v1820_v59, %v1858_v21  ;;  %v1918_v42 = vmax.f32 %v1821_v10, %v1860_v41  ;;  %v2053_v35 = vrot.slane %v5538_v52, 5 }
 0x1ca   :  { %v1955_v18 = vsel %vm971_vm4, %v1952_v31, %v1954_v46  ;;  %v1957_v51 = vsel %vm971_vm4, %v1954_v46, %v1956_v37  ;;  %v2052_v28 = vsel %vm1069_vm5, %v2049_v4, %v2051_v8  ;;  %v2148_v36 = vrot.slane %v5542_v34, 6 }
 0x1cb   :  { %4291 = vmatpush1.bf16.msra.mxu1 %v4290_v54  ;;  %v2014_v44 = vmax.f32 %v1917_v22, %v1955_v18  ;;  %v2015_v26 = vmax.f32 %v1918_v42, %v1957_v51  ;;  %v2054_v33 = vsel %vm1069_vm5, %v2051_v8, %v2053_v35  ;;  %v2150_v12 = vrot.slane %v5538_v52, 6 }
 0x1cc   :  { %4292 = vmatprep.subr.bf16.mxu1 %v6742_v11  ;;  %v2149_v14 = vsel %vm1167_vm6, %v2146_v6, %v2148_v36  ;;  %v2245_v15 = vrot.slane %v5542_v34, 7  ;;  %v2247_v31 = vrot.slane %v5538_v52, 7  ;;  %v1667_v24 = vrot.slane %v5615_v17, 1 }
 0x1cd   :  { %v2111_v4 = vmax.f32 %v2014_v44, %v2052_v28  ;;  %v2112_v43 = vmax.f32 %v2015_v26, %v2054_v33  ;;  %v2151_v13 = vsel %vm1167_vm6, %v2148_v36, %v2150_v12  ;;  %v1669_v32 = vrot.slane %v5612_v7, 1 }
 0x1ce   :  { %v2246_v60 = vsel %vm1265_vm7, %v2243_v29, %v2245_v15  ;;  %v2248_v49 = vsel %vm1265_vm7, %v2245_v15, %v2247_v31  ;;  %v1668_v50 = vsel %vm677_vm1, %v1665_v30, %v1667_v24  ;;  %v1764_v6 = vrot.slane %v5615_v17, 2 }
 0x1cf   :  { %v2208_v21 = vmax.f32 %v2111_v4, %v2149_v14  ;;  %v2209_v34 = vmax.f32 %v2112_v43, %v2151_v13  ;;  %v1670_v3 = vsel %vm677_vm1, %v1667_v24, %v1669_v32  ;;  %v1725_v56 = vmax.f32 %v5538_v52, %v1668_v50 }
 0x1d0   :  { %v1726_v59 = vmax.f32 %v5615_v17, %v1670_v3  ;;  %v1765_v10 = vsel %vm775_vm2, %v1762_v57, %v1764_v6  ;;  %v1766_v41 = vrot.slane %v5612_v7, 2  ;;  %v1861_v29 = vrot.slane %v5615_v17, 3 }
 0x1d1   :  { %v2305_v46 = vmax.f32 %v2208_v21, %v2246_v60  ;;  %v2306_v8 = vmax.f32 %v2209_v34, %v2248_v49  ;;  %v1822_v54 = vmax.f32 %v1725_v56, %v1765_v10  ;;  %v1863_v30 = vrot.slane %v5612_v7, 3 }
 0x1d2   :  { %v1767_v22 = vsel %vm775_vm2, %v1764_v6, %v1766_v41  ;;  %v1862_v42 = vsel %vm873_vm3, %v1859_v53, %v1861_v29  ;;  %v1958_v18 = vrot.slane %v5615_v17, 4  ;;  %v1960_v52 = vrot.slane %v5612_v7, 4 }
 0x1d3   :  { %v4293_v51 = vpack.c.bf16 %v2306_v8, %v2305_v46  ;;  %v1823_v28 = vmax.f32 %v1726_v59, %v1767_v22  ;;  %v1864_v57 = vsel %vm873_vm3, %v1861_v29, %v1863_v30  ;;  %v1919_v36 = vmax.f32 %v1822_v54, %v1862_v42 }
 0x1d4   :  { %v1959_v44 = vsel %vm971_vm4, %v1956_v37, %v1958_v18  ;;  %v1961_v26 = vsel %vm971_vm4, %v1958_v18, %v1960_v52  ;;  %v2055_v33 = vrot.slane %v5615_v17, 5  ;;  %v2057_v14 = vrot.slane %v5612_v7, 5 }
 0x1d5   :  { %4294 = vmatpush1.bf16.msra.mxu1 %v4293_v51  ;;  %v1920_v15 = vmax.f32 %v1823_v28, %v1864_v57  ;;  %v2016_v53 = vmax.f32 %v1919_v36, %v1959_v44  ;;  %v2152_v24 = vrot.slane %v5615_v17, 6  ;;  %v2154_v4 = vrot.slane %v5612_v7, 6 }
 0x1d6   :  { %4295 = vmatprep.subr.bf16.mxu1 %v6742_v11  ;;  %v2056_v43 = vsel %vm1069_vm5, %v2053_v35, %v2055_v33  ;;  %v2058_v13 = vsel %vm1069_vm5, %v2055_v33, %v2057_v14  ;;  %v2249_v37 = vrot.slane %v5615_v17, 7  ;;  %v2251_v60 = vrot.slane %v5612_v7, 7 }
 0x1d7   :  { %v2017_v49 = vmax.f32 %v1920_v15, %v1961_v26  ;;  %v2113_v50 = vmax.f32 %v2016_v53, %v2056_v43  ;;  %v2153_v6 = vsel %vm1167_vm6, %v2150_v12, %v2152_v24  ;;  %v2155_v21 = vsel %vm1167_vm6, %v2152_v24, %v2154_v4 }
 0x1d8   :  { %v2250_v34 = vsel %vm1265_vm7, %v2247_v31, %v2249_v37  ;;  %v2252_v3 = vsel %vm1265_vm7, %v2249_v37, %v2251_v60  ;;  %v1671_v56 = vrot.slane %v5704_v62, 1  ;;  %v1673_v35 = vrot.slane %v5696_v45, 1 }
 0x1d9   :  { %v2114_v59 = vmax.f32 %v2017_v49, %v2058_v13  ;;  %v2210_v10 = vmax.f32 %v2113_v50, %v2153_v6  ;;  %v1768_v17 = vrot.slane %v5704_v62, 2  ;;  %v1770_v29 = vrot.slane %v5696_v45, 2 }
 0x1da   :  { %v1672_v46 = vsel %vm677_vm1, %v1669_v32, %v1671_v56  ;;  %v1674_v12 = vsel %vm677_vm1, %v1671_v56, %v1673_v35  ;;  %v1865_v8 = vrot.slane %v5704_v62, 3  ;;  %v1867_v31 = vrot.slane %v5696_v45, 3 }
 0x1db   :  { %v2211_v54 = vmax.f32 %v2114_v59, %v2155_v21  ;;  %v2307_v22 = vmax.f32 %v2210_v10, %v2250_v34  ;;  %v1727_v42 = vmax.f32 %v5612_v7, %v1672_v46  ;;  %v1728_v18 = vmax.f32 %v5704_v62, %v1674_v12 }
 0x1dc   :  { %v1769_v51 = vsel %vm775_vm2, %v1766_v41, %v1768_v17  ;;  %v1771_v28 = vsel %vm775_vm2, %v1768_v17, %v1770_v29  ;;  %v1866_v57 = vsel %vm873_vm3, %v1863_v30, %v1865_v8  ;;  %v1868_v32 = vsel %vm873_vm3, %v1865_v8, %v1867_v31 }
 0x1dd   :  { %v2308_v36 = vmax.f32 %v2211_v54, %v2252_v3  ;;  %v1824_v44 = vmax.f32 %v1727_v42, %v1769_v51  ;;  %v1825_v26 = vmax.f32 %v1728_v18, %v1771_v28  ;;  %v1962_v33 = vrot.slane %v5704_v62, 4 }
 0x1de   :  { %v1964_v15 = vrot.slane %v5696_v45, 4  ;;  %v2059_v53 = vrot.slane %v5704_v62, 5  ;;  %v2061_v7 = vrot.slane %v5696_v45, 5  ;;  %v2156_v24 = vrot.slane %v5704_v62, 6 }
 0x1df   :  { %v4296_v41 = vpack.c.bf16 %v2308_v36, %v2307_v22  ;;  %v1921_v43 = vmax.f32 %v1824_v44, %v1866_v57  ;;  %v1922_v13 = vmax.f32 %v1825_v26, %v1868_v32  ;;  %v1963_v30 = vsel %vm971_vm4, %v1960_v52, %v1962_v33 }
 0x1e0   :  { %v1965_v37 = vsel %vm971_vm4, %v1962_v33, %v1964_v15  ;;  %v2060_v49 = vsel %vm1069_vm5, %v2057_v14, %v2059_v53  ;;  %v2062_v50 = vsel %vm1069_vm5, %v2059_v53, %v2061_v7  ;;  %v2157_v6 = vsel %vm1167_vm6, %v2154_v4, %v2156_v24 }
 0x1e1   :  { %4297 = vmatpush1.bf16.msra.mxu1 %v4296_v41  ;;  %v2018_v21 = vmax.f32 %v1921_v43, %v1963_v30  ;;  %v2019_v34 = vmax.f32 %v1922_v13, %v1965_v37  ;;  %v2158_v3 = vrot.slane %v5696_v45, 6  ;;  %v2253_v56 = vrot.slane %v5704_v62, 7 }
 0x1e2   :  { %4298 = vmatprep.subr.bf16.mxu1 %v6742_v11  ;;  %v2255_v59 = vrot.slane %v5696_v45, 7  ;;  %v1675_v52 = vrot.slane %v5800_v16, 1  ;;  %v1677_v10 = vrot.slane %v5798_v23, 1  ;;  %v1772_v14 = vrot.slane %v5800_v16, 2 }
 0x1e3   :  { %v2115_v17 = vmax.f32 %v2018_v21, %v2060_v49  ;;  %v2116_v46 = vmax.f32 %v2019_v34, %v2062_v50  ;;  %v2159_v4 = vsel %vm1167_vm6, %v2156_v24, %v2158_v3  ;;  %v2254_v12 = vsel %vm1265_vm7, %v2251_v60, %v2253_v56 }
 0x1e4   :  { %v2256_v8 = vsel %vm1265_vm7, %v2253_v56, %v2255_v59  ;;  %v1676_v62 = vsel %vm677_vm1, %v1673_v35, %v1675_v52  ;;  %v1678_v54 = vsel %vm677_vm1, %v1675_v52, %v1677_v10  ;;  %v1773_v22 = vsel %vm775_vm2, %v1770_v29, %v1772_v14 }
 0x1e5   :  { %v2212_v42 = vmax.f32 %v2115_v17, %v2157_v6  ;;  %v2213_v18 = vmax.f32 %v2116_v46, %v2159_v4  ;;  %v1729_v51 = vmax.f32 %v5696_v45, %v1676_v62  ;;  %v1730_v28 = vmax.f32 %v5800_v16, %v1678_v54 }
 0x1e6   :  { %v1774_v57 = vrot.slane %v5798_v23, 2  ;;  %v1869_v32 = vrot.slane %v5800_v16, 3  ;;  %v1871_v60 = vrot.slane %v5798_v23, 3  ;;  %v1966_v36 = vrot.slane %v5800_v16, 4 }
 0x1e7   :  { %v2309_v44 = vmax.f32 %v2212_v42, %v2254_v12  ;;  %v2310_v35 = vmax.f32 %v2213_v18, %v2256_v8  ;;  %v1826_v26 = vmax.f32 %v1729_v51, %v1773_v22  ;;  %v1968_v33 = vrot.slane %v5798_v23, 4 }
 0x1e8   :  { %v1775_v29 = vsel %vm775_vm2, %v1772_v14, %v1774_v57  ;;  %v1870_v53 = vsel %vm873_vm3, %v1867_v31, %v1869_v32  ;;  %v1872_v45 = vsel %vm873_vm3, %v1869_v32, %v1871_v60  ;;  %v1967_v24 = vsel %vm971_vm4, %v1964_v15, %v1966_v36 }
 0x1e9   :  { %v4299_v41 = vpack.c.bf16 %v2310_v35, %v2309_v44  ;;  %v1827_v43 = vmax.f32 %v1730_v28, %v1775_v29  ;;  %v1923_v13 = vmax.f32 %v1826_v26, %v1870_v53  ;;  %v1969_v30 = vsel %vm971_vm4, %v1966_v36, %v1968_v33 }
 0x1ea   :  { %v2063_v37 = vrot.slane %v5800_v16, 5  ;;  %v2065_v49 = vrot.slane %v5798_v23, 5  ;;  %v2160_v50 = vrot.slane %v5800_v16, 6  ;;  %v2162_v6 = vrot.slane %v5798_v23, 6 }
 0x1eb   :  { %4300 = vmatpush1.bf16.msra.mxu1 %v4299_v41  ;;  %v1924_v21 = vmax.f32 %v1827_v43, %v1872_v45  ;;  %v2020_v31 = vmax.f32 %v1923_v13, %v1967_v24  ;;  %v2257_v34 = vrot.slane %v5800_v16, 7  ;;  %v2259_v15 = vrot.slane %v5798_v23, 7 }
 0x1ec   :  { %4301 = vmatprep.subr.bf16.mxu1 %v6742_v11  ;;  %v2064_v56 = vsel %vm1069_vm5, %v2061_v7, %v2063_v37  ;;  %v2066_v52 = vsel %vm1069_vm5, %v2063_v37, %v2065_v49  ;;  %v2161_v14 = vsel %vm1167_vm6, %v2158_v3, %v2160_v50  ;;  %v2163_v17 = vsel %vm1167_vm6, %v2160_v50, %v2162_v6 }
 0x1ed   :  { %v2021_v46 = vmax.f32 %v1924_v21, %v1969_v30  ;;  %v2117_v4 = vmax.f32 %v2020_v31, %v2064_v56  ;;  %v2258_v12 = vsel %vm1265_vm7, %v2255_v59, %v2257_v34  ;;  %v2260_v8 = vsel %vm1265_vm7, %v2257_v34, %v2259_v15 }
 0x1ee   :  { %v1679_v16 = vrot.slane %v5901_v55, 1  ;;  %v1681_v62 = vrot.slane %v5899_v1, 1  ;;  %v1776_v54 = vrot.slane %v5901_v55, 2  ;;  %v1778_v7 = vrot.slane %v5899_v1, 2 }
 0x1ef   :  { %v2118_v22 = vmax.f32 %v2021_v46, %v2066_v52  ;;  %v2214_v42 = vmax.f32 %v2117_v4, %v2161_v14  ;;  %v1873_v3 = vrot.slane %v5901_v55, 3  ;;  %v1875_v18 = vrot.slane %v5899_v1, 3 }
 0x1f0   :  { %v1680_v51 = vsel %vm677_vm1, %v1677_v10, %v1679_v16  ;;  %v1682_v59 = vsel %vm677_vm1, %v1679_v16, %v1681_v62  ;;  %v1777_v28 = vsel %vm775_vm2, %v1774_v57, %v1776_v54  ;;  %v1779_v32 = vsel %vm775_vm2, %v1776_v54, %v1778_v7 }
 0x1f1   :  { %v2215_v36 = vmax.f32 %v2118_v22, %v2163_v17  ;;  %v2311_v44 = vmax.f32 %v2214_v42, %v2258_v12  ;;  %v1731_v35 = vmax.f32 %v5798_v23, %v1680_v51  ;;  %v1732_v26 = vmax.f32 %v5901_v55, %v1682_v59 }
 0x1f2   :  { %v1874_v29 = vsel %vm873_vm3, %v1871_v60, %v1873_v3  ;;  %v1876_v53 = vsel %vm873_vm3, %v1873_v3, %v1875_v18  ;;  %v1970_v45 = vrot.slane %v5901_v55, 4  ;;  %v1972_v10 = vrot.slane %v5899_v1, 4 }
 0x1f3   :  { %v2312_v24 = vmax.f32 %v2215_v36, %v2260_v8  ;;  %v1828_v41 = vmax.f32 %v1731_v35, %v1777_v28  ;;  %v1829_v43 = vmax.f32 %v1732_v26, %v1779_v32  ;;  %v2067_v57 = vrot.slane %v5901_v55, 5 }
 0x1f4   :  { %v1971_v13 = vsel %vm971_vm4, %v1968_v33, %v1970_v45  ;;  %v1973_v30 = vsel %vm971_vm4, %v1970_v45, %v1972_v10  ;;  %v2069_v23 = vrot.slane %v5899_v1, 5  ;;  %v2164_v37 = vrot.slane %v5901_v55, 6 }
 0x1f5   :  { %v4302_v60 = vpack.c.bf16 %v2312_v24, %v2311_v44  ;;  %v1925_v50 = vmax.f32 %v1828_v41, %v1874_v29  ;;  %v1926_v21 = vmax.f32 %v1829_v43, %v1876_v53  ;;  %v2068_v31 = vsel %vm1069_vm5, %v2065_v49, %v2067_v57 }
 0x1f6   :  { %v2070_v34 = vsel %vm1069_vm5, %v2067_v57, %v2069_v23  ;;  %v2165_v56 = vsel %vm1167_vm6, %v2162_v6, %v2164_v37  ;;  %v2166_v52 = vrot.slane %v5899_v1, 6  ;;  %v2261_v14 = vrot.slane %v5901_v55, 7 }
 0x1f7   :  { %4303 = vmatpush1.bf16.msra.mxu1 %v4302_v60  ;;  %v2022_v33 = vmax.f32 %v1925_v50, %v1971_v13  ;;  %v2023_v17 = vmax.f32 %v1926_v21, %v1973_v30  ;;  %v2263_v46 = vrot.slane %v5899_v1, 7  ;;  %v1683_v4 = vrot.slane %v5952_v48, 1 }
 0x1f8   :  { %4304 = vmatprep.subr.bf16.mxu1 %v6742_v11  ;;  %v2167_v12 = vsel %vm1167_vm6, %v2164_v37, %v2166_v52  ;;  %v2262_v49 = vsel %vm1265_vm7, %v2259_v15, %v2261_v14  ;;  %v1780_v8 = vrot.slane %v5952_v48, 2  ;;  %v1782_v6 = vrot.slane %v5950_v39, 2 }
 0x1f9   :  { %v2119_v16 = vmax.f32 %v2022_v33, %v2068_v31  ;;  %v2120_v54 = vmax.f32 %v2023_v17, %v2070_v34  ;;  %v2264_v55 = vsel %vm1265_vm7, %v2261_v14, %v2263_v46  ;;  %v1684_v22 = vsel %vm677_vm1, %v1681_v62, %v1683_v4 }
 0x1fa   :  { %v1686_v42 = vsel %vm677_vm1, %v1683_v4, %v1685_v19  ;;  %v1733_v3 = vmax.f32 %v5899_v1, %v1684_v22  ;;  %v1781_v51 = vsel %vm775_vm2, %v1778_v7, %v1780_v8  ;;  %v1783_v15 = vsel %vm775_vm2, %v1780_v8, %v1782_v6  ;;  %v4561_v22 = vld [vmem:[%s6723_s3 + $0x30] sm:$0xff] }
 0x1fb   :  { %v2216_v59 = vmax.f32 %v2119_v16, %v2165_v56  ;;  %v2217_v28 = vmax.f32 %v2120_v54, %v2167_v12  ;;  %v1734_v32 = vmax.f32 %v5952_v48, %v1686_v42  ;;  %v1877_v36 = vrot.slane %v5952_v48, 3  ;;  %v4558_v16 = vld [vmem:[%s6723_s3 + $0x28] sm:$0xff]  ;;  %v4559_v54 = vld [vmem:[%s6723_s3 + $0x20] sm:$0xff] }
 0x1fc   :  { %v1830_v44 = vmax.f32 %v1733_v3, %v1781_v51  ;;  %v1879_v35 = vrot.slane %v5950_v39, 3  ;;  %v1974_v62 = vrot.slane %v5952_v48, 4  ;;  %v1976_v26 = vrot.slane %v5950_v39, 4  ;;  %v4562_v42 = vld [vmem:[%s6723_s3 + $0x48] sm:$0xff] }
 0x1fd   :  { %v2313_v19 = vmax.f32 %v2216_v59, %v2262_v49  ;;  %v2314_v29 = vmax.f32 %v2217_v28, %v2264_v55  ;;  %v1831_v1 = vmax.f32 %v1734_v32, %v1783_v15  ;;  %v1878_v7 = vsel %vm873_vm3, %v1875_v18, %v1877_v36  ;;  %v4560_v55 = vld [vmem:[%s6723_s3 + $0x38] sm:$0xff] }
 0x1fe   :  { %v1880_v53 = vsel %vm873_vm3, %v1877_v36, %v1879_v35  ;;  %v1927_v45 = vmax.f32 %v1830_v44, %v1878_v7  ;;  %v1975_v24 = vsel %vm971_vm4, %v1972_v10, %v1974_v62  ;;  %v1977_v41 = vsel %vm971_vm4, %v1974_v62, %v1976_v26 }
 0x1ff   :  { %v4305_v43 = vpack.c.bf16 %v2314_v29, %v2313_v19  ;;  %v1928_v57 = vmax.f32 %v1831_v1, %v1880_v53  ;;  %v2071_v13 = vrot.slane %v5952_v48, 5  ;;  %v2073_v30 = vrot.slane %v5950_v39, 5 }
 0x200   :  { %v2024_v37 = vmax.f32 %v1927_v45, %v1975_v24  ;;  %v2168_v60 = vrot.slane %v5952_v48, 6  ;;  %v2170_v50 = vrot.slane %v5950_v39, 6  ;;  %v2265_v18 = vrot.slane %v5952_v48, 7 }
 0x201   :  { %4306 = vmatpush1.bf16.msra.mxu1 %v4305_v43  ;;  %v2025_v21 = vmax.f32 %v1928_v57, %v1977_v41  ;;  %v2072_v31 = vsel %vm1069_vm5, %v2069_v23, %v2071_v13  ;;  %v2074_v10 = vsel %vm1069_vm5, %v2071_v13, %v2073_v30  ;;  %v2267_v34 = vrot.slane %v5950_v39, 7  ;;  %v4555_v39 = vld [vmem:[%s6723_s3] sm:$0xff] }
 0x202   :  { %4307 = vmatprep.subr.bf16.mxu1 %v6742_v11  ;;  %v2121_v56 = vmax.f32 %v2024_v37, %v2072_v31  ;;  %v2169_v14 = vsel %vm1167_vm6, %v2166_v52, %v2168_v60  ;;  %v2171_v33 = vsel %vm1167_vm6, %v2168_v60, %v2170_v50  ;;  %v2266_v17 = vsel %vm1265_vm7, %v2263_v46, %v2265_v18  ;;  %v4556_v52 = vld [vmem:[%s6723_s3 + $0x18] sm:$0xff]  ;;  %v4557_v46 = vld [vmem:[%s6723_s3 + $0x10] sm:$0xff]  ;;  %s4568_s3 = smov 80  }
 0x203   :  { %v2122_v4 = vmax.f32 %v2025_v21, %v2074_v10  ;;  %v2268_v48 = vsel %vm1265_vm7, %v2265_v18, %v2267_v34 }
 0x204   :  { %v2218_v12 = vmax.f32 %v2121_v56, %v2169_v14 }
 0x205   :  { %v2219_v49 = vmax.f32 %v2122_v4, %v2171_v33  ;;  %v2537_v4 = vld [vmem:[%s6724_s4 + $0x8] sm:$0xff] }
 0x206   :  { %v2315_v8 = vmax.f32 %v2218_v12, %v2266_v17  ;;  %v2536_v17 = vld [vmem:[%s6724_s4] sm:$0xff] }
 0x207   :  { %v2316_v23 = vmax.f32 %v2219_v49, %v2268_v48  ;;  %v2538_v48 = vld [vmem:[%s6724_s4 + $0x10] sm:$0xff]  ;;  %v4311_v12 = vpack.c.bf16 %v2537_v4, %v2536_v17  ;;  %v2539_v49 = vld [vmem:[%s6724_s4 + $0x18] sm:$0xff] }
 0x209   :  { %v4308_v6 = vpack.c.bf16 %v2316_v23, %v2315_v8  ;;  %4312 = vmatpush3.bf16.msra.mxu0 %v4311_v12  ;;  %v4314_v8 = vpack.c.bf16 %v2539_v49, %v2538_v48  ;;  %v2540_v23 = vld [vmem:[%s6724_s4 + $0x20] sm:$0xff] }
 0x20a   :  { %4313 = vmatprep.subr.bf16.mxu0 %v6742_v11 }
 0x20b   :  { %4309 = vmatpush1.bf16.msra.mxu1 %v4308_v6  ;;  %v2541_v6 = vld [vmem:[%s6724_s4 + $0x28] sm:$0xff] }
 0x20d   :  { %4315 = vmatpush3.bf16.msra.mxu0 %v4314_v8 }
 0x20e   :  { %2382 = vmatmul.mubr.f32.vlgmr.msra.gmra.mrb[22].mxu1 %v4555_v39  ;;  %v4317_v39 = vpack.c.bf16 %v2541_v6, %v2540_v23  ;;  %4316 = vmatprep.subr.bf16.mxu0 %v6742_v11 }
 0x20f   :  { %3931 = vmatprep.mubr.msk.f32.mxu1 %vm1363_vm8, %v4556_v52  ;;  %v2542_v52 = vld [vmem:[%s6724_s4 + $0x30] sm:$0xff] }
 0x211   :  { %4318 = vmatpush3.bf16.msra.mxu0 %v4317_v39 }
 0x212   :  { %2387 = vmatmul.mubr.f32.gmra.mrb[24].mxu1 %v4557_v46  ;;  %v2543_v46 = vld [vmem:[%s6724_s4 + $0x38] sm:$0xff]  ;;  %4319 = vmatprep.subr.bf16.mxu0 %v6742_v11 }
 0x213   :  { %3932 = vmatprep.mubr.msk.f32.mxu1 %vm1363_vm8, %v4558_v16  ;;  %v4320_v16 = vpack.c.bf16 %v2543_v46, %v2542_v52 }
 0x215   :  { %4321 = vmatpush3.bf16.msra.mxu0 %v4320_v16 }
 0x216   :  { %2392 = vmatmul.mubr.f32.gmra.mrb[26].mxu1 %v4559_v54  ;;  %v2544_v54 = vld [vmem:[%s6724_s4 + $0x40] sm:$0xff]  ;;  %4322 = vmatprep.subr.bf16.mxu0 %v6742_v11 }
 0x217   :  { %3933 = vmatprep.mubr.msk.f32.mxu1 %vm1363_vm8, %v4560_v55  ;;  %v2545_v55 = vld [vmem:[%s6724_s4 + $0x48] sm:$0xff] }
 0x21a   :  { %2397 = vmatmul.mubr.f32.gmra.mrb[28].mxu1 %v4561_v22  ;;  %v4323_v22 = vpack.c.bf16 %v2545_v55, %v2544_v54 }
 0x21b   :  { %3934 = vmatprep.mubr.msk.f32.mxu1 %vm1363_vm8, %v4562_v42 }
 0x21c   :  { %4324 = vmatpush3.bf16.msra.mxu0 %v4323_v22 }
 0x21d   :  { %4325 = vmatprep.subr.bf16.mxu0 %v6742_v11 }
 0x21e   :  { %2402 = vmatmul.mubr.f32.gmra.mrb[30].mxu1 %v5691_v25 }
 0x21f   :  { %3935 = vmatprep.mubr.msk.f32.mxu1 %vm1363_vm8, %v5702_v58 }
 0x222   :  { %2407 = vmatmul.mubr.f32.gmra.mrb[32].mxu1 %v5726_v2 }
 0x223   :  { %3936 = vmatprep.mubr.msk.f32.mxu1 %vm1363_vm8, %v5736_v38 }
 0x226   :  { %2412 = vmatmul.mubr.f32.gmra.mrb[34].mxu1 %v5756_v40 }
 0x227   :  { %3937 = vmatprep.mubr.msk.f32.mxu1 %vm1363_vm8, %v5768_v47 }
 0x22a   :  { %2417 = vmatmul.mubr.f32.gmra.mrb[36].mxu1 %v5796_v9 }
 0x22b   :  { %3938 = vmatprep.mubr.msk.f32.mxu1 %vm1363_vm8, %v5806_v27 }
 0x22e   :  { %2422 = vmatmul.mubr.f32.gmra.mrb[38].mxu1 %v5827_v61 }
 0x22f   :  { %3939 = vmatprep.mubr.msk.f32.mxu1 %vm1363_vm8, %v5837_v0 }
 0x232   :  { %2427 = vmatmul.mubr.f32.gmra.mrb[40].mxu1 %v5859_v5 }
 0x233   :  { %3940 = vmatprep.mubr.msk.f32.mxu1 %vm1363_vm8, %v5871_v20 }
 0x236   :  { %2432 = vmatmul.mubr.f32.gmra.mrb[42].mxu1 %v5897_v63 }
 0x259   :  { %v6220_v25 = vpop.f32.mrb[0].mxu1 }
 0x25a   :  { %v1465_v58 = vpop.f32.mrb[1].mxu1 }
 0x25d   :  { %v6222_v2 = vpop.f32.mrb[2].mxu1 }
 0x25e   :  { %v1470_v38 = vpop.f32.mrb[3].mxu1  ;;  %v1519_v40 = vrot.slane %v6222_v2, 3 }
 0x261   :  { %v6225_v47 = vpop.f32.mrb[4].mxu1 }
 0x262   :  { %v1520_v9 = vrot.slane %v6225_v47, 3  ;;  %v1475_v27 = vpop.f32.mrb[5].mxu1  ;;  %v1530_v61 = vrot.slane %v6225_v47, 6 }
 0x263   :  { %v2546_v27 = vld [vmem:[%s6724_s4 + $0x50] sm:$0xff] }
 0x264   :  { %v6232_v0 = vsel %vm873_vm3, %v1519_v40, %v1520_v9 }
 0x265   :  { %v1478_v5 = vpop.f32.mrb[6].mxu1 }
 0x266   :  { %v1531_v20 = vrot.slane %v1478_v5, 6  ;;  %v1480_v63 = vpop.f32.mrb[7].mxu1 }
 0x268   :  { %v6235_v3 = vsel %vm1167_vm6, %v1530_v61, %v1531_v20  ;;  %v2547_v61 = vld [vmem:[%s6724_s4 + $0x58] sm:$0xff] }
 0x269   :  { %v1483_v51 = vpop.f32.mrb[8].mxu1 }
 0x26a   :  { %v1533_v15 = vrot.slane %v1483_v51, 6  ;;  %v1485_v59 = vpop.f32.mrb[9].mxu1  ;;  %v1542_v28 = vrot.slane %v1483_v51, 1 }
 0x26c   :  { %v6238_v32 = vsel %vm1167_vm6, %v1531_v20, %v1533_v15  ;;  %v4326_v20 = vpack.c.bf16 %v2547_v61, %v2546_v27  ;;  %v4570_v27 = vmov 0.0  }
 0x26d   :  { %v6240_v36 = vpop.f32.mrb[10].mxu1  ;;  %4171 = vmatprep.mubr.msk.f32.mxu0 %vm4569_vm9, %v4570_v27  ;;  %3176 = vmatprep.mubr.f32.mxu1 %v4570_v27 }
 0x26e   :  { %v1543_v44 = vrot.slane %v6240_v36, 1  ;;  %v1490_v35 = vpop.f32.mrb[11].mxu1  ;;  %v1552_v62 = vrot.slane %v6240_v36, 4  ;;  %4327 = vmatpush3.bf16.msra.mxu0 %v4326_v20 }
 0x26f   :  { %4328 = vmatprep.subr.bf16.mxu0 %v6742_v11 }
 0x270   :  { %v6247_v26 = vsel %vm677_vm1, %v1542_v28, %v1543_v44 }
 0x271   :  { %v6249_v19 = vpop.f32.mrb[12].mxu1 }
 0x272   :  { %v1553_v29 = vrot.slane %v6249_v19, 4  ;;  %v1495_v1 = vpop.f32.mrb[13].mxu1  ;;  %v1563_v7 = vrot.slane %v6249_v19, 7 }
 0x274   :  { %v6256_v53 = vsel %vm971_vm4, %v1552_v62, %v1553_v29 }
 0x275   :  { %v1498_v45 = vpop.f32.mrb[14].mxu1 }
 0x276   :  { %v1564_v24 = vrot.slane %v1498_v45, 7  ;;  %v1500_v41 = vpop.f32.mrb[15].mxu1 }
 0x278   :  { %v6259_v43 = vsel %vm1265_vm7, %v1563_v7, %v1564_v24 }
 0x279   :  { %v1503_v57 = vpop.f32.mrb[16].mxu1 }
 0x27a   :  { %v1566_v13 = vrot.slane %v1503_v57, 7  ;;  %v1505_v30 = vpop.f32.mrb[17].mxu1  ;;  %v1575_v37 = vrot.slane %v1503_v57, 2 }
 0x27c   :  { %v6262_v60 = vsel %vm1265_vm7, %v1564_v24, %v1566_v13 }
 0x27d   :  { %v6264_v50 = vpop.f32.mrb[18].mxu1 }
 0x27e   :  { %v1576_v18 = vrot.slane %v6264_v50, 2  ;;  %v1510_v21 = vpop.f32.mrb[19].mxu1  ;;  %v1585_v31 = vrot.slane %v6264_v50, 5 }
 0x27f   :  { %v2549_v21 = vld [vmem:[%s6724_s4 + $0x68] sm:$0xff] }
 0x280   :  { %v6271_v10 = vsel %vm775_vm2, %v1575_v37, %v1576_v18  ;;  %v2548_v37 = vld [vmem:[%s6724_s4 + $0x60] sm:$0xff] }
 0x281   :  { %v6273_v34 = vpop.f32.mrb[20].mxu1  ;;  %v4329_v17 = vpack.c.bf16 %v2549_v21, %v2548_v37 }
 0x282   :  { %v1586_v56 = vrot.slane %v6273_v34, 5  ;;  %v1515_v14 = vpop.f32.mrb[21].mxu1 }
 0x283   :  { %4330 = vmatpush3.bf16.msra.mxu0 %v4329_v17 }
 0x284   :  { %v6279_v33 = vsel %vm1069_vm5, %v1585_v31, %v1586_v56  ;;  %4331 = vmatprep.subr.bf16.mxu0 %v6742_v11 }
 0x2e1   :  { %v6316_v42 = vpop.f32.mrb[22].mxu1 }
 0x2e2   :  { %v2385_v58 = vpop.f32.mrb[23].mxu1 }
 0x2e5   :  { %v6318_v38 = vpop.f32.mrb[24].mxu1 }
 0x2e6   :  { %v2390_v40 = vpop.f32.mrb[25].mxu1  ;;  %v2439_v63 = vrot.slane %v6318_v38, 3 }
 0x2e9   :  { %v2393_v5 = vpop.f32.mrb[26].mxu1 }
 0x2ea   :  { %v2440_v51 = vrot.slane %v2393_v5, 3  ;;  %v2395_v15 = vpop.f32.mrb[27].mxu1  ;;  %v2450_v1 = vrot.slane %v2393_v5, 6 }
 0x2ec   :  { %v4464_v59 = vpack.i.bf16 %v2440_v51, %v1520_v9  ;;  %v2441_v28 = vsel %vm873_vm3, %v2439_v63, %v2440_v51 }
 0x2ed   :  { %v2398_v35 = vpop.f32.mrb[28].mxu1  ;;  %v4469_v62 = vpack.i.bf16 %v2441_v28, %v6232_v0 }
 0x2ee   :  { %v2451_v7 = vrot.slane %v2398_v35, 6  ;;  %4465 = vrot.lane.b32.xlu1 %v4464_v59, %s4564_s22  ;;  %v2400_v45 = vpop.f32.mrb[29].mxu1 }
 0x2ef   :  { %4470 = vrot.lane.b32.xlu0 %v4469_v62, %s4564_s22 }
 0x2f0   :  { %v2452_v24 = vsel %vm1167_vm6, %v2450_v1, %v2451_v7 }
 0x2f1   :  { %v2403_v41 = vpop.f32.mrb[30].mxu1  ;;  %v4474_v57 = vpack.i.bf16 %v2452_v24, %v6235_v3 }
 0x2f2   :  { %v2453_v47 = vrot.slane %v2403_v41, 6  ;;  %v2405_v9 = vpop.f32.mrb[31].mxu1  ;;  %v2462_v31 = vrot.slane %v2403_v41, 1 }
 0x2f3   :  { %4475 = vrot.lane.b32.xlu0 %v4474_v57, %s4565_s0 }
 0x2f4   :  { %v2454_v13 = vsel %vm1167_vm6, %v2451_v7, %v2453_v47 }
 0x2f5   :  { %v2408_v30 = vpop.f32.mrb[32].mxu1  ;;  %v4479_v0 = vpack.i.bf16 %v2454_v13, %v6238_v32 }
 0x2f6   :  { %v2463_v14 = vrot.slane %v2408_v30, 1  ;;  %v2410_v3 = vpop.f32.mrb[33].mxu1  ;;  %v2472_v49 = vrot.slane %v2408_v30, 4 }
 0x2f7   :  { %4480 = vrot.lane.b32.xlu1 %v4479_v0, %s4565_s0 }
 0x2f8   :  { %v4484_v4 = vpack.i.bf16 %v2463_v14, %v1543_v44  ;;  %v2464_v48 = vsel %vm677_vm1, %v2462_v31, %v2463_v14  ;;  %vm6463_vm1 = vmpackc.low %vm1069_vm5, %vm4573_vm15 }
 0x2f9   :  { %v2413_v32 = vpop.f32.mrb[34].mxu1  ;;  %v4489_v12 = vpack.i.bf16 %v2464_v48, %v6247_v26 }
 0x2fa   :  { %v2473_v8 = vrot.slane %v2413_v32, 4  ;;  %v2415_v23 = vpop.f32.mrb[35].mxu1  ;;  %v2483_v52 = vrot.slane %v2413_v32, 7 }
 0x2fb   :  { %4485 = vrot.lane.b32.xlu1 %v4484_v4, %s4566_s26 }
 0x2fc   :  { %v4494_v6 = vpack.i.bf16 %v2473_v8, %v1553_v29  ;;  %v2474_v39 = vsel %vm971_vm4, %v2472_v49, %v2473_v8  ;;  %v2550_v29 = vld [vmem:[%s6724_s4 + $0x70] sm:$0xff]  ;;  %vm3862_vm4 = vcmask 1024  }
 0x2fd   :  { %v2418_v36 = vpop.f32.mrb[36].mxu1  ;;  %v4499_v44 = vpack.i.bf16 %v2474_v39, %v6256_v53  ;;  %v2551_v53 = vld [vmem:[%s6724_s4 + $0x78] sm:$0xff]  ;;  %s4571_s4 = smov 112  }
 0x2fe   :  { %v2484_v46 = vrot.slane %v2418_v36, 7  ;;  %v2420_v16 = vpop.f32.mrb[37].mxu1  ;;  %v4332_v58 = vpack.c.bf16 %v2551_v53, %v2550_v29 }
 0x2ff   :  { %4490 = vrot.lane.b32.xlu1 %v4489_v12, %s4566_s26  ;;  %4500 = vrot.lane.b32.xlu0 %v4499_v44, %s4567_s27 }
 0x300   :  { %v2485_v26 = vsel %vm1265_vm7, %v2483_v52, %v2484_v46  ;;  %4333 = vmatpush3.bf16.msra.mxu0 %v4332_v58 }
 0x301   :  { %v2423_v54 = vpop.f32.mrb[38].mxu1  ;;  %v4504_v55 = vpack.i.bf16 %v2485_v26, %v6259_v43  ;;  %4334 = vmatprep.subr.bf16.mxu0 %v6742_v11 }
 0x302   :  { %v2486_v22 = vrot.slane %v2423_v54, 7  ;;  %v2425_v19 = vpop.f32.mrb[39].mxu1  ;;  %v2495_v5 = vrot.slane %v2423_v54, 2 }
 0x303   :  { %4495 = vrot.lane.b32.xlu1 %v4494_v6, %s4567_s27  ;;  %4505 = vrot.lane.b32.xlu0 %v4504_v55, %s4568_s3 }
 0x304   :  { %v2487_v40 = vsel %vm1265_vm7, %v2484_v46, %v2486_v22 }
 0x305   :  { %v2428_v43 = vpop.f32.mrb[40].mxu1  ;;  %v4509_v61 = vpack.i.bf16 %v2487_v40, %v6262_v60 }
 0x306   :  { %v2496_v20 = vrot.slane %v2428_v43, 2  ;;  %v2430_v63 = vpop.f32.mrb[41].mxu1  ;;  %v2505_v28 = vrot.slane %v2428_v43, 5 }
 0x307   :  { %4510 = vrot.lane.b32.xlu1 %v4509_v61, %s4568_s3 }
 0x308   :  { %v2497_v51 = vsel %vm775_vm2, %v2495_v5, %v2496_v20  ;;  %vm2644_vm2 = vcmask 89088  }
 0x309   :  { %v2433_v15 = vpop.f32.mrb[42].mxu1  ;;  %v4514_v59 = vpack.i.bf16 %v2497_v51, %v6271_v10 }
 0x30a   :  { %v2506_v35 = vrot.slane %v2433_v15, 5  ;;  %v2435_v62 = vpop.f32.mrb[43].mxu1 }
 0x30b   :  { %1590 = vrot.lane.b32.xlu1 %v1586_v56, %s4571_s4  ;;  %4515 = vrot.lane.b32.xlu0 %v4514_v59, %s4572_s17 }
 0x30c   :  { %v2507_v60 = vsel %vm1069_vm5, %v2505_v28, %v2506_v35 }
 0x30d   :  { %v4519_v1 = vpack.i.bf16 %v2507_v60, %v6279_v33 }
 0x30f   :  { %2510 = vrot.lane.b32.xlu1 %v2506_v35, %s4571_s4  ;;  %4520 = vrot.lane.b32.xlu0 %v4519_v1, %s4571_s4 }
 0x313   :  { %1580 = vrot.lane.b32.xlu0 %v1576_v18, %s4572_s17 }
 0x317   :  { %2500 = vrot.lane.b32.xlu0 %v2496_v20, %s4572_s17 }
 0x360   :  { %v4466_v10 = vpop.permute.xlu1 %4465 }
 0x361   :  { %v4471_v7 = vpop.permute.xlu0 %4470  ;;  %v4467_v37 = vunpack.i.l.bf16 %v4466_v10  ;;  %v4468_v39 = vunpack.i.h.bf16 %v4466_v10 }
 0x362   :  { %v4473_v57 = vunpack.i.h.bf16 %v4471_v7  ;;  %v4472_v47 = vunpack.i.l.bf16 %v4471_v7 }
 0x363   :  { %v1595_v36 = vsel %vm114_vm0, %v6222_v2, %v4467_v37  ;;  %v2515_v15 = vsel %vm114_vm0, %v6318_v38, %v4468_v39  ;;  %v3061_v37 = vld [vmem:[%s6725_s9 + $0x38] sm:$0xff] }
 0x364   :  { %v2514_v18 = vsel %vm114_vm0, %v6316_v42, %v4473_v57  ;;  %v1594_v21 = vsel %vm114_vm0, %v6220_v25, %v4472_v47 }
 0x365   :  { %v4476_v34 = vpop.permute.xlu0 %4475 }
 0x366   :  { %v4478_v9 = vunpack.i.h.bf16 %v4476_v34  ;;  %v4477_v33 = vunpack.i.l.bf16 %v4476_v34 }
 0x368   :  { %v2516_v31 = vsel %vm1596_vm10, %v2514_v18, %v4478_v9  ;;  %v1597_v14 = vsel %vm1596_vm10, %v1594_v21, %v4477_v33  ;;  %v3057_v33 = vld [vmem:[%s6725_s9 + $0x18] sm:$0xff]  ;;  %v3059_v18 = vld [vmem:[%s6725_s9 + $0x28] sm:$0xff] }
 0x369   :  { %v6375_v45 = vpop.permute.xlu1 %4480 }
 0x36a   :  { %v4482_v3 = vunpack.i.l.bf16 %v6375_v45  ;;  %v4483_v44 = vunpack.i.h.bf16 %v6375_v45 }
 0x36c   :  { %v1598_v46 = vsel %vm1596_vm10, %v1595_v36, %v4482_v3  ;;  %v2517_v60 = vsel %vm1596_vm10, %v2515_v15, %v4483_v44  ;;  %v3060_v3 = vld [vmem:[%s6725_s9 + $0x30] sm:$0xff]  ;;  %v3063_v15 = vld [vmem:[%s6725_s9 + $0x48] sm:$0xff] }
 0x36d   :  { %v6377_v24 = vpop.permute.xlu1 %4485 }
 0x36e   :  { %v4487_v23 = vunpack.i.l.bf16 %v6377_v24  ;;  %v4488_v58 = vunpack.i.h.bf16 %v6377_v24 }
 0x370   :  { %v1601_v2 = vsel %vm1599_vm11, %v1598_v46, %v4487_v23  ;;  %v2519_v10 = vsel %vm1599_vm11, %v2517_v60, %v4488_v58  ;;  %v2642_v46 = vld [vmem:[%s6727_s6] sm:$0x1f]  ;;  %v3064_v60 = vld [vmem:[%s6725_s9 + $0x50] sm:$0xff] }
 0x371   :  { %v4491_v56 = vpop.permute.xlu1 %4490  ;;  %v4501_v41 = vpop.permute.xlu0 %4500  ;;  %v2947_v58 = vld [vmem:[%s6729_s8] sm:$0xff] }
 0x372   :  { %v4493_v0 = vunpack.i.h.bf16 %v4491_v56  ;;  %v4492_v50 = vunpack.i.l.bf16 %v4491_v56  ;;  %v4503_v17 = vunpack.i.h.bf16 %v4501_v41  ;;  %v4502_v4 = vunpack.i.l.bf16 %v4501_v41 }
 0x374   :  { %v2518_v32 = vsel %vm1599_vm11, %v2516_v31, %v4493_v0  ;;  %v1600_v42 = vsel %vm1599_vm11, %v1597_v14, %v4492_v50  ;;  %v3056_v50 = vld [vmem:[%s6725_s9 + $0x10] sm:$0xff]  ;;  %v6445_v31 = vpack.c.bf16 %v3061_v37, %v3059_v18  ;;  %v3058_v14 = vld [vmem:[%s6725_s9 + $0x20] sm:$0xff] }
 0x375   :  { %v4496_v13 = vpop.permute.xlu1 %4495  ;;  %v4506_v30 = vpop.permute.xlu0 %4505  ;;  %v2520_v16 = vsel %vm1363_vm8, %v2518_v32, %v4503_v17  ;;  %v1602_v26 = vsel %vm1363_vm8, %v1600_v42, %v4502_v4  ;;  %v6455_v17 = vpack.c.bf16 %v3060_v3, %v3058_v14  ;;  %v3941_v4 = vld [vmem:[%s6726_s5] ss:$0 sm:$0xff] }
 0x376   :  { %v4508_v12 = vunpack.i.h.bf16 %v4506_v30  ;;  %v4507_v49 = vunpack.i.l.bf16 %v4506_v30  ;;  %v4497_v52 = vunpack.i.l.bf16 %v4496_v13  ;;  %v4498_v61 = vunpack.i.h.bf16 %v4496_v13  ;;  %v3055_v13 = vld [vmem:[%s6725_s9 + $0x8] sm:$0xff]  ;;  %v3054_v30 = vld [vmem:[%s6725_s9] sm:$0xff] }
 0x377   :  { %v6432_v0 = vpack.c.bf16 %v3057_v33, %v3055_v13  ;;  %v6443_v21 = vpack.c.bf16 %v3056_v50, %v3054_v30 }
 0x378   :  { %v2522_v22 = vsel %vm1604_vm12, %v2520_v16, %v4508_v12  ;;  %v1605_v19 = vsel %vm1604_vm12, %v1602_v26, %v4507_v49  ;;  %v1603_v20 = vsel %vm1363_vm8, %v1601_v2, %v4497_v52  ;;  %v2521_v45 = vsel %vm1363_vm8, %v2519_v10, %v4498_v61  ;;  %v2952_v61 = vld [vmem:[%s6729_s8 + $0x28] sm:$0xff] }
 0x379   :  { %v4511_v8 = vpop.permute.xlu1 %4510  ;;  %4359 = vmatprep.subr.bf16.mxu1 %v6432_v0  ;;  %v3067_v10 = vld [vmem:[%s6725_s9 + $0x68] sm:$0xff] }
 0x37a   :  { %v4512_v54 = vunpack.i.l.bf16 %v4511_v8  ;;  %v4513_v59 = vunpack.i.h.bf16 %v4511_v8  ;;  %4361 = vmatpush1.bf16.msra.mxu1 %v6443_v21 }
 0x37b   :  { %4363 = vmatprep.subr.bf16.mxu1 %v6445_v31 }
 0x37c   :  { %v1606_v28 = vsel %vm1604_vm12, %v1603_v20, %v4512_v54  ;;  %v2523_v24 = vsel %vm1604_vm12, %v2521_v45, %v4513_v59  ;;  %v2951_v20 = vld [vmem:[%s6729_s8 + $0x20] sm:$0xff]  ;;  %v3065_v59 = vld [vmem:[%s6725_s9 + $0x58] sm:$0xff] }
 0x37d   :  { %v4516_v48 = vpop.permute.xlu0 %4515  ;;  %v1591_v5 = vpop.permute.xlu1 %1590  ;;  %v3066_v45 = vld [vmem:[%s6725_s9 + $0x60] sm:$0xff] }
 0x37e   :  { %v4518_v25 = vunpack.i.h.bf16 %v4516_v48  ;;  %v4517_v6 = vunpack.i.l.bf16 %v4516_v48  ;;  %4365 = vmatpush1.bf16.msra.mxu1 %v6455_v17 }
 0x380   :  { %v1608_v40 = vsel %vm1607_vm13, %v1605_v19, %v4517_v6  ;;  %v2524_v43 = vsel %vm1607_vm13, %v2522_v22, %v4518_v25 }
 0x381   :  { %v4521_v55 = vpop.permute.xlu0 %4520  ;;  %v2511_v56 = vpop.permute.xlu1 %2510 }
 0x382   :  { %v4523_v29 = vunpack.i.h.bf16 %v4521_v55  ;;  %v4522_v53 = vunpack.i.l.bf16 %v4521_v55  ;;  %v2643_v55 = vld [vmem:[%s6728_s7] sm:$0x1f] }
 0x384   :  { %v1611_v63 = vsel %vm1610_vm14, %v1608_v40, %v4522_v53  ;;  %v2526_v51 = vsel %vm1610_vm14, %v2524_v43, %v4523_v29  ;;  %v2948_v29 = vld [vmem:[%s6729_s8 + $0x8] sm:$0xff]  ;;  %v2950_v53 = vld [vmem:[%s6729_s8 + $0x18] sm:$0xff]  ;;  %v2949_v40 = vld [vmem:[%s6729_s8 + $0x10] sm:$0xff] }
 0x385   :  { %v1581_v35 = vpop.permute.xlu0 %1580  ;;  %4172 = vmatmul.mubr.f32.vlgmr.msra.gmra.mrb[50].mxu0 %v1611_v63  ;;  %v2530_v62 = vrot.slane %v2526_v51, 5  ;;  %v4350_v2 = vpack.c.bf16 %v2950_v53, %v2948_v29  ;;  %v4352_v43 = vpack.c.bf16 %v2949_v40, %v2947_v58  ;;  %v2953_v51 = vld [vmem:[%s6729_s8 + $0x30] sm:$0xff] }
 0x386   :  { %v1609_v1 = vsel %vm1607_vm13, %v1606_v28, %v1581_v35  ;;  %4174 = vmatprep.mubr.msk.f32.mxu0 %vm4569_vm9, %v4570_v27  ;;  %v4356_v28 = vpack.c.bf16 %v2953_v51, %v2951_v20  ;;  %v6526_v35 = vpack.c.bf16 %v3065_v59, %v3063_v15 }
 0x387   :  { %v1612_v7 = vsel %vm1610_vm14, %v1609_v1, %v1591_v5  ;;  %v2954_v5 = vld [vmem:[%s6729_s8 + $0x38] sm:$0xff] }
 0x388   :  { %v2535_v38 = vsel %vm1069_vm5, %v1612_v7, %v2530_v62  ;;  %v4354_v63 = vpack.c.bf16 %v2954_v5, %v2952_v61  ;;  %4367 = vmatprep.subr.bf16.mxu1 %v6526_v35  ;;  %v3069_v7 = vld [vmem:[%s6725_s9 + $0x78] sm:$0xff] }
 0x389   :  { %v2501_v34 = vpop.permute.xlu0 %2500  ;;  %4175 = vmatmul.mubr.f32.gmra.mrb[52].mxu0 %v2535_v38  ;;  %v6548_v38 = vpack.c.bf16 %v3069_v7, %v3067_v10 }
 0x38a   :  { %v2525_v41 = vsel %vm1607_vm13, %v2523_v24, %v2501_v34  ;;  %4177 = vmatprep.mubr.msk.f32.mxu0 %vm4569_vm9, %v4570_v27  ;;  %v3068_v24 = vld [vmem:[%s6725_s9 + $0x70] sm:$0xff] }
 0x38b   :  { %v2527_v57 = vsel %vm1610_vm14, %v2525_v41, %v2511_v56  ;;  %v6553_v34 = vpack.c.bf16 %v3068_v24, %v3066_v45 }
 0x38c   :  { %v2531_v47 = vrot.slane %v2527_v57, 5 }
 0x38e   :  { %v2532_v9 = vsel %vm1069_vm5, %v2530_v62, %v2531_v47  ;;  %v3062_v62 = vld [vmem:[%s6725_s9 + $0x40] sm:$0xff] }
 0x38f   :  { %4178 = vmatmul.mubr.f32.gmra.mrb[54].mxu0 %v2532_v9  ;;  %v6534_v1 = vpack.c.bf16 %v3064_v60, %v3062_v62 }
 0x390   :  { %4184 = vmatprep.mubr.msk.f32.mxu0 %vm4569_vm9, %v4570_v27 }
 0x391   :  { %4369 = vmatpush1.bf16.msra.mxu1 %v6534_v1 }
 0x392   :  { %4371 = vmatprep.subr.bf16.mxu1 %v6548_v38 }
 0x395   :  { %4373 = vmatpush1.bf16.msra.mxu1 %v6553_v34 }
 0x396   :  { %4391 = vmatprep.subr.bf16.mxu1 %v6432_v0 }
 0x398   :  { %3177 = vmatmul.mubr.f32.vlgmr.msra.gmra.mrb[44].mxu1 %v4570_v27 }
 0x399   :  { %4393 = vmatpush1.bf16.msra.mxu1 %v6443_v21  ;;  %3420 = vmatprep.mubr.f32.mxu1 %v4570_v27 }
 0x39a   :  { %4395 = vmatprep.subr.bf16.mxu1 %v6445_v31 }
 0x39d   :  { %4397 = vmatpush1.bf16.msra.mxu1 %v6455_v17 }
 0x39e   :  { %4399 = vmatprep.subr.bf16.mxu1 %v6526_v35 }
 0x3a1   :  { %4401 = vmatpush1.bf16.msra.mxu1 %v6534_v1 }
 0x3a2   :  { %4403 = vmatprep.subr.bf16.mxu1 %v6548_v38 }
 0x3a5   :  { %4405 = vmatpush1.bf16.msra.mxu1 %v6553_v34 }
 0x3a6   :  { %4423 = vmatprep.subr.bf16.mxu1 %v6432_v0 }
 0x458   :  { %v2625_v48 = vpop.f32.mrb[50].mxu0 }
 0x459   :  { %v4173_v32 = vpop.f32.mrb[51].mxu0  ;;  %v2626_v42 = vadd.f32 %v3941_v4, %v2625_v48  ;;  %v2957_v48 = vlaneseq }
 0x45b   :  { %v2639_v23 = vmax.f32 %v2626_v42, 0.0  ;;  %v2958_v32 = vshrl.u32 %v2957_v48, 7 }
 0x45c   :  { %v2630_v12 = vpop.f32.mrb[52].mxu0 }
 0x45d   :  { %v2631_v49 = vadd.f32 %v3941_v4, %v2630_v12  ;;  %v4176_v8 = vpop.f32.mrb[53].mxu0  ;;  %v6581_v42 = vsub.s32 0, %v2958_v32  ;;  %v2955_v12 = vld [vmem:[%s6730_s10] sm:$0x3] }
 0x45f   :  { %v2640_v25 = vmax.f32 %v2631_v49, 0.0  ;;  %v6586_v49 = vsub.s32 1, %v2958_v32  ;;  %v2960_v8 = vrot.slane %v2955_v12, %v6581_v42 }
 0x461   :  { %v4335_v39 = vpack.c.bf16 %v2640_v25, %v2639_v23  ;;  %v2796_v26 = vrot.slane %v2640_v25, 3  ;;  %v2964_v23 = vrot.slane %v2955_v12, %v6586_v49 }
 0x462   :  { %v2635_v36 = vpop.f32.mrb[54].mxu0 }
 0x463   :  { %v2636_v44 = vadd.f32 %v3941_v4, %v2635_v36  ;;  %v4179_v52 = vpop.f32.mrb[55].mxu0  ;;  %4337 = vmatpush3.bf16.msk.msra.mxu0 %vm6463_vm1, %v4335_v39 }
 0x464   :  { %4338 = vmatprep.subr.bf16.mxu0 %v6742_v11 }
 0x465   :  { %v2641_v16 = vmax.f32 %v2636_v44, 0.0  ;;  %v3070_v44 = vld [vmem:[%s6731_s11] sm:$0x3] }
 0x466   :  { %4185 = vmatmul.mubr.msk.f32.vlgmr.msra.gmra.mrb[56].mxu0 %vm2644_vm2, %v2642_v46  ;;  %v6602_v61 = vrot.slane %v3070_v44, %v6586_v49 }
 0x467   :  { %v2797_v54 = vrot.slane %v2641_v16, 3  ;;  %4341 = vmatpush3.bf16.msk.msra.mxu0 %vm6463_vm1, %v4335_v39  ;;  %4191 = vmatprep.mubr.msk.f32.mxu0 %vm4569_vm9, %v4570_v27 }
 0x468   :  { %4342 = vmatprep.subr.bf16.mxu0 %v6742_v11 }
 0x469   :  { %v2798_v22 = vsel %vm873_vm3, %v2796_v26, %v2797_v54  ;;  %v6595_v26 = vrot.slane %v3070_v44, %v6581_v42 }
 0x46a   :  { %v4343_v19 = vpack.c.bf16 %v2797_v54, %v2798_v22  ;;  %4192 = vmatmul.mubr.msk.f32.vlgmr.msra.gmra.mrb[58].mxu0 %vm2644_vm2, %v2643_v55 }
 0x46b   :  { %4198 = vmatprep.mubr.msk.f32.mxu0 %vm4569_vm9, %v4570_v27  ;;  %v3178_v3 = vpop.f32.mrb[44].mxu1 }
 0x46c   :  { %4345 = vmatpush3.bf16.msk.msra.mxu0 %vm6463_vm1, %v4343_v19  ;;  %v3180_v4 = vpop.f32.mrb[45].mxu1  ;;  %v3179_v22 = vadd.f32 %v3178_v3, %v6595_v26 }
 0x46d   :  { %4346 = vmatprep.subr.bf16.mxu0 %v6742_v11 }
 0x46f   :  { %4199 = vmatmul.mubr.msk.f32.vlgmr.msra.gmra.mrb[60].mxu0 %vm2644_vm2, %v2642_v46 }
 0x470   :  { %4349 = vmatpush3.bf16.msk.msra.mxu0 %vm6463_vm1, %v4343_v19  ;;  %4205 = vmatprep.mubr.msk.f32.mxu0 %vm4569_vm9, %v4570_v27 }
 0x471   :  { %4351 = vmatprep.subr.bf16.mxu0 %v4350_v2 }
 0x473   :  { %4206 = vmatmul.mubr.msk.f32.vlgmr.msra.gmra.mrb[62].mxu0 %vm2644_vm2, %v2643_v55 }
 0x474   :  { %3036 = vmatprep.mubr.f32.mxu0 %v4570_v27  ;;  %4353 = vmatpush1.bf16.msra.mxu0 %v4352_v43 }
 0x475   :  { %4355 = vmatprep.subr.bf16.mxu0 %v4354_v63  ;;  %v3181_v63 = vadd.f32 %v3180_v4, %v6602_v61 }
 0x478   :  { %4357 = vmatpush1.bf16.msra.mxu0 %v4356_v28 }
 0x479   :  { %4375 = vmatprep.subr.bf16.mxu0 %v6432_v0 }
 0x539   :  { %v2717_v56 = vpop.f32.mrb[56].mxu0 }
 0x53a   :  { %v4186_v41 = vpop.f32.mrb[57].mxu0 }
 0x53d   :  { %v2790_v57 = vpop.f32.mrb[58].mxu0 }
 0x53e   :  { %v2794_v47 = vmax.f32 %v2717_v56, %v2790_v57  ;;  %v4193_v9 = vpop.f32.mrb[59].mxu0 }
 0x542   :  { %v2868_v13 = vpop.f32.mrb[60].mxu0 }
 0x543   :  { %v4200_v33 = vpop.f32.mrb[61].mxu0 }
 0x546   :  { %v2938_v30 = vpop.f32.mrb[62].mxu0 }
 0x547   :  { %v2942_v50 = vmax.f32 %v2868_v13, %v2938_v30  ;;  %v4207_v18 = vpop.f32.mrb[63].mxu0 }
 0x549   :  { %v2944_v37 = vrot.slane %v2942_v50, 3 }
 0x54b   :  { %v2946_v14 = vsel %vm873_vm3, %v2794_v47, %v2944_v37  ;;  %vm3052_vm3 = vcmask 517120  }
 0x54c   :  { %3950 = vmatmul.mubr.msk.f32.vlgmr.msra.gmra.mrb[64].mxu0 %vm1596_vm10, %v2946_v14 }
 0x54d   :  { %3042 = vmatprep.mubr.f32.mxu0 %v4570_v27  ;;  %4377 = vmatpush1.bf16.msra.mxu0 %v6443_v21 }
 0x54e   :  { %4379 = vmatprep.subr.bf16.mxu0 %v6445_v31 }
 0x550   :  { %3951 = vmatmul.mubr.msk.f32.gmra.mrb[66].mxu0 %vm1596_vm10, %v2944_v37 }
 0x551   :  { %4381 = vmatpush1.bf16.msra.mxu0 %v6455_v17  ;;  %3298 = vmatprep.mubr.f32.mxu0 %v4570_v27 }
 0x552   :  { %4383 = vmatprep.subr.bf16.mxu0 %v6526_v35 }
 0x555   :  { %4385 = vmatpush1.bf16.msra.mxu0 %v6534_v1 }
 0x556   :  { %4387 = vmatprep.subr.bf16.mxu0 %v6548_v38 }
 0x559   :  { %4389 = vmatpush1.bf16.msra.mxu0 %v6553_v34 }
 0x55a   :  { %4407 = vmatprep.subr.bf16.mxu0 %v6432_v0 }
 0x61f   :  { %v3038_v25 = vpop.f32.mrb[64].mxu0 }
 0x620   :  { %v3039_v6 = vadd.f32 %v3038_v25, %v2960_v8  ;;  %v3040_v39 = vpop.f32.mrb[65].mxu0 }
 0x621   :  { %v3041_v0 = vadd.f32 %v3040_v39, %v2964_v23 }
 0x622   :  { %3049 = vst [vmem:[#allocation2] sm:$0xff] %v3039_v6 }
 0x623   :  { %3050 = vst.msk [vmem:[#allocation2 + $0x8] sm:$0xff] %vm1363_vm8, %v3041_v0  ;;  %v3044_v36 = vpop.f32.mrb[66].mxu0 }
 0x624   :  { %v3045_v52 = vadd.f32 %v3044_v36, %v2960_v8  ;;  %v3046_v46 = vpop.f32.mrb[67].mxu0 }
 0x625   :  { %v3047_v16 = vadd.f32 %v3046_v46, %v2964_v23 }
 0x626   :  { %3051 = vst [vmem:[#allocation2 + $0x10] sm:$0x3] %v3045_v52 }
 0x627   :  { %3053 = vst.msk [vmem:[#allocation2 + $0x18] sm:$0x3] %vm3052_vm3, %v3047_v16 }
 0x62a   :  { %v3071_v54 = vld [vmem:[#allocation2] ss:$8 sm:$0x3]  ;;  %v3073_v55 = vld [vmem:[#allocation2 + $0x5] ss:$8 sm:$0x3] }
 0x62b   :  { %v3078_v19 = vrot.slane %v3071_v54, %v6581_v42  ;;  %v3089_v29 = vrot.slane %v3073_v55, %v6581_v42  ;;  %v3082_v5 = vrot.slane %v3071_v54, %v6586_v49  ;;  %v3093_v20 = vrot.slane %v3073_v55, %v6586_v49  ;;  %v3202_v41 = vld [vmem:[#allocation2 + $0x1] ss:$8 sm:$0x3]  ;;  %v3204_v57 = vld [vmem:[#allocation2 + $0x6] ss:$8 sm:$0x3] }
 0x62c   :  { %v3209_v47 = vrot.slane %v3202_v41, %v6581_v42  ;;  %v3220_v9 = vrot.slane %v3204_v57, %v6581_v42  ;;  %v3213_v4 = vrot.slane %v3202_v41, %v6586_v49  ;;  %v3224_v48 = vrot.slane %v3204_v57, %v6586_v49  ;;  %v3324_v16 = vld [vmem:[#allocation2 + $0x2] ss:$8 sm:$0x3]  ;;  %v3326_v54 = vld [vmem:[#allocation2 + $0x7] ss:$8 sm:$0x3] }
 0x62d   :  { %v3096_v53 = vsel %vm1265_vm7, %v3078_v19, %v3089_v29  ;;  %v3097_v59 = vsel %vm1265_vm7, %v3082_v5, %v3093_v20  ;;  %v3342_v55 = vrot.slane %v3326_v54, %v6581_v42 }
 0x62e   :  { %v3183_v58 = vadd.f32 %v3179_v22, %v3096_v53  ;;  %v3227_v50 = vsel %vm1265_vm7, %v3209_v47, %v3220_v9  ;;  %v3228_v23 = vsel %vm1265_vm7, %v3213_v4, %v3224_v48  ;;  %v3346_v53 = vrot.slane %v3326_v54, %v6586_v49 }
 0x630   :  { %v3952_v2 = vmul.f32 -1.442695, %v3183_v58 }
 0x632   :  { %4524 = vpow2.f32 %v3952_v2 }
 0x63c   :  { %v4525_v40 = vpop.eup %4524 }
 0x63d   :  { %v3187_v43 = vadd.f32 1.0, %v4525_v40 }
 0x63f   :  { %4526 = vrcp.f32 %v3187_v43 }
 0x649   :  { %v4527_v51 = vpop.eup %4526 }
 0x64a   :  { %v3190_v15 = vmul.f32 %v4527_v51, %v3181_v63  ;;  %v3193_v60 = vsub.f32 1.0, %v4527_v51  ;;  %v3199_v7 = vmul.f32 0.0, %v4527_v51 }
 0x64c   :  { %v3191_v28 = vadd.f32 %v3190_v15, %v3097_v59 }
 0x64e   :  { %4528 = vtanh.f32 %v3191_v28 }
 0x658   :  { %v4529_v62 = vpop.eup %4528 }
 0x659   :  { %3195 = vrot.lane.b32.xlu0 %v4529_v62, %s4567_s27 }
 0x6cb   :  { %v3196_v10 = vpop.permute.xlu0 %3195 }
 0x6cc   :  { %v3198_v45 = vmul.f32 %v3196_v10, %v3193_v60  ;;  %v3448_v60 = vld [vmem:[#allocation2 + $0x10] ss:$8 sm:$0x3]  ;;  %v3446_v10 = vld [vmem:[#allocation2 + $0x3] ss:$8 sm:$0x3] }
 0x6ce   :  { %v3200_v24 = vadd.f32 %v3199_v7, %v3198_v45  ;;  %v3464_v7 = vrot.slane %v3448_v60, %v6581_v42  ;;  %v3453_v45 = vrot.slane %v3446_v10, %v6581_v42 }
 0x6d0   :  { %3230 = vrot.lane.b32.xlu1 %v3200_v24, %s4567_s27  ;;  %v3471_v57 = vsel %vm1265_vm7, %v3453_v45, %v3464_v7  ;;  %v3781_v7 = vld [vmem:[%s6733_s14 + $0x8] sm:$0xff]  ;;  %v21_v45 = vstv %s6734_s15 }
 0x6d1   :  { %22 = vst [vmem:[#allocation3] sm:$0x1] %v21_v45 }
 0x742   :  { %v3231_v56 = vpop.permute.xlu1 %3230 }
 0x743   :  { %3953 = vmatmul.mubr.msk.f32.vlgmr.msra.gmra.mrb[68].mxu0 %vm1363_vm8, %v3231_v56 }
 0x744   :  { %4409 = vmatpush1.bf16.msra.mxu0 %v6443_v21  ;;  %3542 = vmatprep.mubr.f32.mxu0 %v4570_v27 }
 0x745   :  { %4411 = vmatprep.subr.bf16.mxu0 %v6445_v31 }
 0x748   :  { %4413 = vmatpush1.bf16.msra.mxu0 %v6455_v17 }
 0x749   :  { %4415 = vmatprep.subr.bf16.mxu0 %v6526_v35 }
 0x74c   :  { %4417 = vmatpush1.bf16.msra.mxu0 %v6534_v1 }
 0x74d   :  { %4419 = vmatprep.subr.bf16.mxu0 %v6548_v38 }
 0x750   :  { %4421 = vmatpush1.bf16.msra.mxu0 %v6553_v34 }
 0x751   :  { %4438 = vmatprep.subr.bf16.mxu0 %v6742_v11 }
 0x816   :  { %v3300_v13 = vpop.f32.mrb[68].mxu0 }
 0x817   :  { %v3301_v33 = vadd.f32 %v3300_v13, %v6595_v26  ;;  %v3302_v30 = vpop.f32.mrb[69].mxu0 }
 0x818   :  { %v3303_v32 = vadd.f32 %v3302_v30, %v6602_v61  ;;  %v3468_v30 = vrot.slane %v3448_v60, %v6586_v49 }
 0x819   :  { %v3305_v18 = vadd.f32 %v3301_v33, %v3227_v50 }
 0x81b   :  { %v3954_v37 = vmul.f32 -1.442695, %v3305_v18 }
 0x81d   :  { %4530 = vpow2.f32 %v3954_v37  ;;  %v3457_v37 = vrot.slane %v3446_v10, %v6586_v49  ;;  %v3780_v10 = vld [vmem:[%s6733_s14] sm:$0xff] }
 0x827   :  { %v4531_v14 = vpop.eup %4530 }
 0x828   :  { %v3309_v3 = vadd.f32 1.0, %v4531_v14 }
 0x82a   :  { %4532 = vrcp.f32 %v3309_v3  ;;  %v3472_v3 = vsel %vm1265_vm7, %v3457_v37, %v3468_v30 }
 0x834   :  { %v4533_v12 = vpop.eup %4532 }
 0x835   :  { %v3312_v8 = vmul.f32 %v4533_v12, %v3303_v32  ;;  %v3315_v39 = vsub.f32 1.0, %v4533_v12  ;;  %v3321_v36 = vmul.f32 %v4533_v12, %v3200_v24 }
 0x837   :  { %v3313_v25 = vadd.f32 %v3312_v8, %v3228_v23 }
 0x839   :  { %4534 = vtanh.f32 %v3313_v25 }
 0x843   :  { %v4535_v6 = vpop.eup %4534 }
 0x844   :  { %3317 = vrot.lane.b32.xlu0 %v4535_v6, %s4567_s27 }
 0x8b6   :  { %v3318_v0 = vpop.permute.xlu0 %3317 }
 0x8b7   :  { %v3320_v44 = vmul.f32 %v3318_v0, %v3315_v39  ;;  %v3570_v39 = vld [vmem:[#allocation2 + $0x11] ss:$8 sm:$0x3]  ;;  %v3568_v0 = vld [vmem:[#allocation2 + $0x4] ss:$8 sm:$0x3] }
 0x8b9   :  { %v3322_v52 = vadd.f32 %v3321_v36, %v3320_v44  ;;  %v3586_v36 = vrot.slane %v3570_v39, %v6581_v42  ;;  %v3575_v44 = vrot.slane %v3568_v0, %v6581_v42 }
 0x8bb   :  { %3352 = vrot.lane.b32.xlu1 %v3322_v52, %s4567_s27  ;;  %v3593_v54 = vsel %vm1265_vm7, %v3575_v44, %v3586_v36 }
 0x92d   :  { %v3353_v46 = vpop.permute.xlu1 %3352 }
 0x92e   :  { %3955 = vmatmul.mubr.msk.f32.vlgmr.msra.gmra.mrb[46].mxu1 %vm1363_vm8, %v3353_v46 }
 0x92f   :  { %4425 = vmatpush1.bf16.msra.mxu1 %v6443_v21  ;;  %3664 = vmatprep.mubr.f32.mxu1 %v4570_v27  ;;  %v3331_v21 = vrot.slane %v3324_v16, %v6581_v42 }
 0x930   :  { %4427 = vmatprep.subr.bf16.mxu1 %v6445_v31 }
 0x933   :  { %4429 = vmatpush1.bf16.msra.mxu1 %v6455_v17 }
 0x934   :  { %4431 = vmatprep.subr.bf16.mxu1 %v6526_v35  ;;  %v3349_v35 = vsel %vm1265_vm7, %v3331_v21, %v3342_v55 }
 0x937   :  { %4433 = vmatpush1.bf16.msra.mxu1 %v6534_v1 }
 0x938   :  { %4435 = vmatprep.subr.bf16.mxu1 %v6548_v38 }
 0x93b   :  { %4437 = vmatpush1.bf16.msra.mxu1 %v6553_v34  ;;  %v3335_v34 = vrot.slane %v3324_v16, %v6586_v49 }
 0x93c   :  { %4450 = vmatprep.subr.bf16.mxu1 %v6742_v11 }
 0x93d   :  { %v3350_v43 = vsel %vm1265_vm7, %v3335_v34, %v3346_v53 }
 0xa01   :  { %v3422_v22 = vpop.f32.mrb[46].mxu1 }
 0xa02   :  { %v3423_v31 = vadd.f32 %v3422_v22, %v6595_v26  ;;  %v3424_v17 = vpop.f32.mrb[47].mxu1 }
 0xa03   :  { %v3425_v58 = vadd.f32 %v3424_v17, %v6602_v61 }
 0xa04   :  { %v3427_v19 = vadd.f32 %v3423_v31, %v3349_v35 }
 0xa06   :  { %v3956_v1 = vmul.f32 -1.442695, %v3427_v19  ;;  %v3579_v19 = vrot.slane %v3568_v0, %v6586_v49 }
 0xa08   :  { %4536 = vpow2.f32 %v3956_v1 }
 0xa12   :  { %v4537_v38 = vpop.eup %4536 }
 0xa13   :  { %v3431_v29 = vadd.f32 1.0, %v4537_v38  ;;  %v3689_v38 = vld [vmem:[%s6732_s12] sm:$0xff] }
 0xa15   :  { %4538 = vrcp.f32 %v3431_v29  ;;  %v3690_v29 = vld [vmem:[%s6732_s12 + $0x8] sm:$0xff] }
 0xa16   :  { %v4439_v34 = vpack.c.bf16 %v3690_v29, %v3689_v38 }
 0xa1f   :  { %v4539_v2 = vpop.eup %4538 }
 0xa20   :  { %v3434_v40 = vmul.f32 %v4539_v2, %v3425_v58  ;;  %v3437_v63 = vsub.f32 1.0, %v4539_v2  ;;  %v3443_v15 = vmul.f32 %v4539_v2, %v3322_v52  ;;  %v3693_v58 = vld [vmem:[%s6732_s12 + $0x20] sm:$0xff]  ;;  %v3694_v2 = vld [vmem:[%s6732_s12 + $0x28] sm:$0xff] }
 0xa22   :  { %v3435_v5 = vadd.f32 %v3434_v40, %v3350_v43  ;;  %v4445_v43 = vpack.c.bf16 %v3694_v2, %v3693_v58 }
 0xa24   :  { %4540 = vtanh.f32 %v3435_v5  ;;  %v3695_v5 = vld [vmem:[%s6732_s12 + $0x30] sm:$0xff] }
 0xa2e   :  { %v4541_v20 = vpop.eup %4540 }
 0xa2f   :  { %3439 = vrot.lane.b32.xlu0 %v4541_v20, %s4567_s27  ;;  %v3696_v20 = vld [vmem:[%s6732_s12 + $0x38] sm:$0xff] }
 0xaa1   :  { %v3440_v51 = vpop.permute.xlu0 %3439 }
 0xaa2   :  { %v3442_v59 = vmul.f32 %v3440_v51, %v3437_v63  ;;  %v4448_v63 = vpack.c.bf16 %v3696_v20, %v3695_v5 }
 0xaa4   :  { %v3444_v28 = vadd.f32 %v3443_v15, %v3442_v59 }
 0xaa6   :  { %3474 = vrot.lane.b32.xlu1 %v3444_v28, %s4567_s27 }
 0xb18   :  { %v3475_v62 = vpop.permute.xlu1 %3474 }
 0xb19   :  { %3957 = vmatmul.mubr.msk.f32.vlgmr.msra.gmra.mrb[70].mxu0 %vm1363_vm8, %v3475_v62 }
 0xb1a   :  { %4224 = vmatprep.mubr.msk.f32.mxu0 %vm4569_vm9, %v4570_v27  ;;  %4440 = vmatpush3.bf16.msra.mxu0 %v4439_v34 }
 0xb1b   :  { %4441 = vmatprep.subr.bf16.mxu0 %v6742_v11 }
 0xbec   :  { %v3544_v24 = vpop.f32.mrb[70].mxu0 }
 0xbed   :  { %v3545_v56 = vadd.f32 %v3544_v24, %v6595_v26  ;;  %v3546_v41 = vpop.f32.mrb[71].mxu0  ;;  %v3961_v24 = vld [vmem:[%s6735_s13] ss:$0 sm:$0xff] }
 0xbee   :  { %v3547_v50 = vadd.f32 %v3546_v41, %v6602_v61 }
 0xbef   :  { %v3549_v47 = vadd.f32 %v3545_v56, %v3471_v57 }
 0xbf1   :  { %v3958_v9 = vmul.f32 -1.442695, %v3549_v47 }
 0xbf3   :  { %4542 = vpow2.f32 %v3958_v9  ;;  %v3963_v9 = vld [vmem:[#allocation3] ss:$0 sm:$0xff] }
 0xbfd   :  { %v4543_v13 = vpop.eup %4542 }
 0xbfe   :  { %v3553_v33 = vadd.f32 1.0, %v4543_v13 }
 0xc00   :  { %4544 = vrcp.f32 %v3553_v33 }
 0xc0a   :  { %v4545_v18 = vpop.eup %4544 }
 0xc0b   :  { %v3556_v14 = vmul.f32 %v4545_v18, %v3547_v50  ;;  %v3559_v32 = vsub.f32 1.0, %v4545_v18  ;;  %v3565_v8 = vmul.f32 %v4545_v18, %v3444_v28 }
 0xc0d   :  { %v3557_v4 = vadd.f32 %v3556_v14, %v3472_v3 }
 0xc0f   :  { %4546 = vtanh.f32 %v3557_v4 }
 0xc19   :  { %v4547_v48 = vpop.eup %4546 }
 0xc1a   :  { %3561 = vrot.lane.b32.xlu0 %v4547_v48, %s4567_s27 }
 0xc8c   :  { %v3562_v12 = vpop.permute.xlu0 %3561 }
 0xc8d   :  { %v3564_v23 = vmul.f32 %v3562_v12, %v3559_v32 }
 0xc8f   :  { %v3566_v25 = vadd.f32 %v3565_v8, %v3564_v23 }
 0xc91   :  { %3596 = vrot.lane.b32.xlu1 %v3566_v25, %s4567_s27 }
 0xd03   :  { %v3597_v6 = vpop.permute.xlu1 %3596 }
 0xd04   :  { %3959 = vmatmul.mubr.msk.f32.vlgmr.msra.gmra.mrb[48].mxu1 %vm1363_vm8, %v3597_v6 }
 0xd05   :  { %4231 = vmatprep.mubr.msk.f32.mxu1 %vm4569_vm9, %v4570_v27  ;;  %v3590_v27 = vrot.slane %v3570_v39, %v6586_v49  ;;  %v3692_v49 = vld [vmem:[%s6732_s12 + $0x18] sm:$0xff] }
 0xd07   :  { %v3594_v1 = vsel %vm1265_vm7, %v3579_v19, %v3590_v27 }
 0xdd7   :  { %v3666_v52 = vpop.f32.mrb[48].mxu1 }
 0xdd8   :  { %v3667_v46 = vadd.f32 %v3666_v52, %v6595_v26  ;;  %v3668_v16 = vpop.f32.mrb[49].mxu1 }
 0xdd9   :  { %v3669_v17 = vadd.f32 %v3668_v16, %v6602_v61  ;;  %v3691_v61 = vld [vmem:[%s6732_s12 + $0x10] sm:$0xff] }
 0xdda   :  { %v3671_v21 = vadd.f32 %v3667_v46, %v3593_v54  ;;  %v4442_v53 = vpack.c.bf16 %v3692_v49, %v3691_v61 }
 0xddc   :  { %v3960_v55 = vmul.f32 -1.442695, %v3671_v21  ;;  %4443 = vmatpush3.bf16.msra.mxu0 %v4442_v53 }
 0xddd   :  { %4444 = vmatprep.subr.bf16.mxu0 %v6742_v11 }
 0xdde   :  { %4548 = vpow2.f32 %v3960_v55 }
 0xde0   :  { %4446 = vmatpush3.bf16.msra.mxu0 %v4445_v43 }
 0xde1   :  { %4447 = vmatprep.subr.bf16.mxu0 %v6742_v11  ;;  %v4451_v11 = vpack.c.bf16 %v3781_v7, %v3780_v10 }
 0xde3   :  { %4452 = vmatpush3.bf16.msra.mxu1 %v4451_v11 }
 0xde4   :  { %4449 = vmatpush3.bf16.msra.mxu0 %v4448_v63 }
 0xde8   :  { %v4549_v22 = vpop.eup %4548 }
 0xde9   :  { %v3675_v31 = vadd.f32 1.0, %v4549_v22 }
 0xdeb   :  { %4550 = vrcp.f32 %v3675_v31 }
 0xdf5   :  { %v4551_v35 = vpop.eup %4550 }
 0xdf6   :  { %v3678_v42 = vmul.f32 %v4551_v35, %v3669_v17  ;;  %v3681_v51 = vsub.f32 1.0, %v4551_v35  ;;  %v3687_v59 = vmul.f32 %v4551_v35, %v3566_v25 }
 0xdf8   :  { %v3679_v26 = vadd.f32 %v3678_v42, %v3594_v1 }
 0xdfa   :  { %4552 = vtanh.f32 %v3679_v26 }
 0xe04   :  { %v4553_v40 = vpop.eup %4552 }
 0xe05   :  { %3683 = vrot.lane.b32.xlu0 %v4553_v40, %s4567_s27 }
 0xe77   :  { %v3684_v15 = vpop.permute.xlu0 %3683 }
 0xe78   :  { %v3686_v28 = vmul.f32 %v3684_v15, %v3681_v51 }
 0xe7a   :  { %v3688_v62 = vadd.f32 %v3687_v59, %v3686_v28 }
 0xe7c   :  { %3705 = vrot.lane.b32.xlu1 %v3688_v62, %s4567_s27 }
 0xeee   :  { %v3706_v60 = vpop.permute.xlu1 %3705 }
 0xeef   :  { %4225 = vmatmul.mubr.msk.f32.vlgmr.msra.gmra.mrb[72].mxu0 %vm1363_vm8, %v3706_v60 }
 0xfc2   :  { %v3775_v56 = vpop.f32.mrb[72].mxu0 }
 0xfc3   :  { %v3776_v41 = vadd.f32 %v3961_v24, %v3775_v56  ;;  %v4226_v57 = vpop.f32.mrb[73].mxu0 }
 0xfc5   :  { %v3779_v47 = vmax.f32 %v3776_v41, 0.0 }
 0xfc7   :  { %4232 = vmatmul.mubr.msk.f32.vlgmr.msra.gmra.mrb[50].mxu1 %vm114_vm0, %v3779_v47 }
0x109a   :  { %v3858_v13 = vpop.f32.mrb[50].mxu1 }
0x109b   :  { %v3859_v33 = vadd.f32 %v3963_v9, %v3858_v13  ;;  %v4233_v30 = vpop.f32.mrb[51].mxu1 }
0x109d   :  { %3863 = vst.msk [vmem:[%s6736_s16] sm:$0x3] %vm3862_vm4, %v3859_v33 }

</bundles_post_ra>
